<compile_context>
chip_gen: v7x
topology: tpu7x:2x2x1
jax: 0.10.0
libtpu: 0.0.40
codegen_flags: <defaults>
</compile_context>

<pallas_src>
import functools

import jax
import jax.numpy as jnp
from jax.experimental import pallas as pl
from jax.experimental.pallas import tpu as pltpu

_LANE = 128


# --------------------------- in-kernel helpers ------------------------------ #
def _interleave_cols(even, odd, cp):
    """even: (R, W*cp), odd: (R, (W-1)*cp) -> columns interleaved (R, (2W-1)*cp)."""
    w = even.shape[1] // cp
    parts = []
    for j in range(w - 1):
        parts.append(even[:, j * cp:(j + 1) * cp])
        parts.append(odd[:, j * cp:(j + 1) * cp])
    parts.append(even[:, (w - 1) * cp:w * cp])
    return jnp.concatenate(parts, axis=1)


def _interleave_rows(even, odd, batch, h):
    """even: (batch*h, L), odd: (batch*h - 1, L) -> (batch*(2h-1), L).

    Output row p of sample b comes from even[b*h + p//2] (p even) or
    odd[b*h + p//2] (p odd).  "Seam" rows of `odd` (which mix two samples)
    are never selected.
    """
    parts = []
    for b in range(batch):
        for p in range(2 * h - 1):
            src = even if p % 2 == 0 else odd
            r = b * h + p // 2
            parts.append(src[r:r + 1, :])
    return jnp.concatenate(parts, axis=0)


def _conv_t_phase_step(x, a_ee, a_eo, a_oe, a_oo, b_e, b_o, *, batch, h, cp, act):
    """One ConvTranspose2d(k=3, s=2, p=1) via 4-phase decomposition.

    x: (batch*h, w*cin) joint row slab.  Returns (batch*(2h-1), (2w-1)*cp).
      even-row/even-col : x[i, j]              @ T[1][1]
      even-row/odd-col  : x[i, j+1]@T[1][0]  + x[i, j]@T[1][2]
      odd-row /even-col : x[i+1, j]@T[0][1]  + x[i, j]@T[2][1]
      odd-row /odd-col  : x[i+1,j+1]@T[0][0] + x[i+1,j]@T[0][2]
                          + x[i,j+1]@T[2][0] + x[i,j]@T[2][2]
    Column shifts are folded into block-banded weight matrices (prepared at
    init), so each phase is a single 2-D matmul (odd-row phases consume
    concat([x[i+1], x[i]], lanes) against vertically stacked bands).
    """
    top = x[1:, :]        # row i+1
    bot = x[:-1, :]       # row i
    tb = jnp.concatenate([top, bot], axis=1)

    y_ee = jnp.dot(x, a_ee, preferred_element_type=jnp.float32) + b_e
    y_eo = jnp.dot(x, a_eo, preferred_element_type=jnp.float32) + b_o
    y_oe = jnp.dot(tb, a_oe, preferred_element_type=jnp.float32) + b_e
    y_oo = jnp.dot(tb, a_oo, preferred_element_type=jnp.float32) + b_o

    if act == "relu":
        f = lambda v: jnp.maximum(v, 0.0)
    else:
        f = jnp.tanh

    even_rows = _interleave_cols(f(y_ee), f(y_eo), cp)
    odd_rows = _interleave_cols(f(y_oe), f(y_oo), cp)
    return _interleave_rows(even_rows, odd_rows, batch, h)


# ------------------------------ fused kernel -------------------------------- #
def _decoder_kernel(z_ref, wl_ref, bl_ref,
                    a1ee, a1eo, a1oe, a1oo, b1e, b1o,
                    a2ee, a2eo, a2oe, a2oo, b2e, b2o,
                    a3ee, a3eo, a3oe, a3oo, b3e, b3o,
                    o_ref, *, batch, s):
    # Linear + ReLU (weight columns already NHWC-ordered, latent zero-padded).
    hid = jnp.dot(z_ref[...], wl_ref[...], preferred_element_type=jnp.float32)
    hid = jnp.maximum(hid + bl_ref[...], 0.0)          # (rows_pad, s*s*128)

    # Unflatten to the joint row-slab layout (batch*s, s*128) by row slicing.
    row_w = s * _LANE
    rows = []
    for b in range(batch):
        for i in range(s):
            rows.append(hid[b:b + 1, i * row_w:(i + 1) * row_w])
    x = jnp.concatenate(rows, axis=0)

    h1 = s
    x = _conv_t_phase_step(
        x, a1ee[...], a1eo[...], a1oe[...], a1oo[...], b1e[...], b1o[...],
        batch=batch, h=h1, cp=a1ee.shape[1] // h1, act="relu")
    h2 = 2 * h1 - 1
    x = _conv_t_phase_step(
        x, a2ee[...], a2eo[...], a2oe[...], a2oo[...], b2e[...], b2o[...],
        batch=batch, h=h2, cp=a2ee.shape[1] // h2, act="relu")
    h3 = 2 * h2 - 1
    x = _conv_t_phase_step(
        x, a3ee[...], a3eo[...], a3oe[...], a3oo[...], b3e[...], b3o[...],
        batch=batch, h=h3, cp=a3ee.shape[1] // h3, act="tanh")

    o_ref[...] = x                                     # (batch*(8s-7), (8s-7)*128)


# -------------------- one-time parameter preparation ------------------------ #
def _band_matrix(t_diag, t_up, w_in, w_out):
    """Block matrix A with block (wi, wo) = t_diag if wi==wo, t_up if wi==wo+1."""
    cin, cp = t_diag.shape
    zero = jnp.zeros((cin, cp), jnp.float32)
    cols = []
    for wo in range(w_out):
        blocks = []
        for wi in range(w_in):
            if wi == wo:
                blocks.append(t_diag)
            elif wi == wo + 1:
                blocks.append(t_up)
            else:
                blocks.append(zero)
        cols.append(jnp.concatenate(blocks, axis=0))
    return jnp.concatenate(cols, axis=1)


def _prep_conv(w_t, bias, w_in, cout_pad):
    """torch ConvTranspose2d weight (Cin, Cout, 3, 3) -> 4-phase band matrices."""
    cin, cout = w_t.shape[0], w_t.shape[1]
    pad = cout_pad - cout
    tap = {}
    for ky in range(3):
        for kx in range(3):
            t = w_t[:, :, ky, kx].astype(jnp.float32)
            tap[(ky, kx)] = jnp.pad(t, ((0, 0), (0, pad)))
    zero = jnp.zeros((cin, cout_pad), jnp.float32)

    a_ee = _band_matrix(tap[(1, 1)], zero, w_in, w_in)
    a_eo = _band_matrix(tap[(1, 2)], tap[(1, 0)], w_in, w_in - 1)
    # odd-row phases consume concat([x[i+1], x[i]], lanes): top band then bottom band
    a_oe = jnp.concatenate([_band_matrix(tap[(0, 1)], zero, w_in, w_in),
                            _band_matrix(tap[(2, 1)], zero, w_in, w_in)], axis=0)
    a_oo = jnp.concatenate([_band_matrix(tap[(0, 2)], tap[(0, 0)], w_in, w_in - 1),
                            _band_matrix(tap[(2, 2)], tap[(2, 0)], w_in, w_in - 1)],
                           axis=0)

    b_pad = jnp.pad(bias.astype(jnp.float32), (0, pad))
    b_even = jnp.tile(b_pad, w_in)[None, :]
    b_odd = jnp.tile(b_pad, w_in - 1)[None, :]
    return a_ee, a_eo, a_oe, a_oo, b_even, b_odd


def _prep_linear(w_lin, b_lin, s, latent_pad):
    """Permute Linear outputs from NCHW (c,i,j) to NHWC (i,j,c) order, pad latent."""
    latent = w_lin.shape[1]
    w = w_lin.reshape(128, s, s, latent).transpose(1, 2, 0, 3).reshape(128 * s * s,
                                                                       latent)
    b = b_lin.reshape(128, s, s).transpose(1, 2, 0).reshape(128 * s * s)
    w_t = jnp.pad(w.T.astype(jnp.float32), ((0, latent_pad - latent), (0, 0)))
    return w_t, b[None, :].astype(jnp.float32)


def prepare_params(params, *, distance, channels):
    s = int((distance - 1) / 8 + 1)
    assert s >= 2, "stride-2 decoder needs s >= 2 (see module docstring)"
    assert channels <= _LANE
    latent = params["linear"][0].shape[1]
    latent_pad = max(_LANE, -(-latent // _LANE) * _LANE)
    wl, bl = _prep_linear(*params["linear"], s=s, latent_pad=latent_pad)
    return {
        "linear": (wl, bl),
        "conv1": _prep_conv(*params["conv1"], w_in=s, cout_pad=64),
        "conv2": _prep_conv(*params["conv2"], w_in=2 * s - 1, cout_pad=32),
        "conv3": _prep_conv(*params["conv3"], w_in=2 * (2 * s - 1) - 1,
                            cout_pad=_LANE),
    }


# ------------------------------ forward pass -------------------------------- #
@functools.partial(jax.jit, static_argnames=("distance", "channels"))
def decoder_ising_forward(z, prep, *, distance, channels):
    s = int((distance - 1) / 8 + 1)
    batch, latent = z.shape
    wl, bl = prep["linear"]
    latent_pad = wl.shape[0]
    rows_pad = max(8, -(-batch // 8) * 8)

    zp = jnp.zeros((rows_pad, latent_pad), jnp.float32)
    zp = zp.at[:batch, :latent].set(z.astype(jnp.float32))

    p_out = 8 * s - 7                              # 2 -> 3 -> 5 -> 9 for s=2
    args = (zp, wl, bl) + prep["conv1"] + prep["conv2"] + prep["conv3"]

    out = pl.pallas_call(
        functools.partial(_decoder_kernel, batch=batch, s=s),
        out_shape=jax.ShapeDtypeStruct((batch * p_out, p_out * _LANE), jnp.float32),
        in_specs=[pl.BlockSpec(memory_space=pltpu.MemorySpace.VMEM)
                  for _ in args],
        out_specs=pl.BlockSpec(memory_space=pltpu.MemorySpace.VMEM),
    )(*args)

    out = out.reshape(batch, p_out, p_out, _LANE)[:, :, :, :channels]
    return out.transpose(0, 3, 1, 2)               # NCHW, like PyTorch


# --------------------- deterministic parameter init ------------------------- #
def init_params(key, latent_dims, distance, channels):
    s = int((distance - 1) / 8 + 1)
    ks = jax.random.split(key, 8)

    def nrm(k, shape, scale=0.05):
        return scale * jax.random.normal(k, shape, jnp.float32)

    return {
        "linear": (nrm(ks[0], (128 * s * s, latent_dims)), nrm(ks[1], (128 * s * s,))),
        "conv1": (nrm(ks[2], (128, 64, 3, 3)), nrm(ks[3], (64,))),
        "conv2": (nrm(ks[4], (64, 32, 3, 3)), nrm(ks[5], (32,))),
        "conv3": (nrm(ks[6], (32, channels, 3, 3)), nrm(ks[7], (channels,))),
    }


# ------------------------- pure-JAX reference ------------------------------- #
def reference_forward(z, params, *, distance, channels):
    s = int((distance - 1) / 8 + 1)
    w_lin, b_lin = params["linear"]
    h = jax.nn.relu(z @ w_lin.T + b_lin)
    x = h.reshape(z.shape[0], 128, s, s).transpose(0, 2, 3, 1)

    def ct(x, w_t, b, act):
        w_hwio = jnp.transpose(jnp.flip(w_t, (2, 3)), (2, 3, 0, 1))
        y = jax.lax.conv_general_dilated(
            x, w_hwio, window_strides=(1, 1), padding=((1, 1), (1, 1)),
            lhs_dilation=(2, 2), dimension_numbers=("NHWC", "HWIO", "NHWC"))
        return act(y + b)

    x = ct(x, *params["conv1"], act=jax.nn.relu)
    x = ct(x, *params["conv2"], act=jax.nn.relu)
    x = ct(x, *params["conv3"], act=jnp.tanh)
    return x.transpose(0, 3, 1, 2)


# --------------------------------- main -------------------------------------- #
if __name__ == "__main__":
    latent_dims, distance, channels, batch = 8, 9, 4, 2
    key = jax.random.PRNGKey(0)
    kz, kp = jax.random.split(key)
    z = jax.random.normal(kz, (batch, latent_dims), jnp.float32)
    params = init_params(kp, latent_dims, distance, channels)

    prep = prepare_params(params, distance=distance, channels=channels)  # one-time

    out = jax.block_until_ready(
        decoder_ising_forward(z, prep, distance=distance, channels=channels))
    ref = jax.block_until_ready(
        reference_forward(z, params, distance=distance, channels=channels))

    s = int((distance - 1) / 8 + 1)
    hw = 8 * s - 7                                  # 2 -> 3 -> 5 -> 9
    assert out.shape == (batch, channels, hw, hw), out.shape
    err = float(jnp.max(jnp.abs(out - ref)))
    assert jnp.allclose(out, ref, atol=1e-4, rtol=1e-4), err
    print("KERNEL_OK")
</pallas_src>

<mosaic_0001>
module attributes {stable_mosaic.version = 11 : i64} {
  func.func @_decoder_kernel(%arg0: memref<8x128xf32, #tpu.memory_space<vmem>>, %arg1: memref<128x512xf32, #tpu.memory_space<vmem>>, %arg2: memref<1x512xf32, #tpu.memory_space<vmem>>, %arg3: memref<256x128xf32, #tpu.memory_space<vmem>>, %arg4: memref<256x64xf32, #tpu.memory_space<vmem>>, %arg5: memref<512x128xf32, #tpu.memory_space<vmem>>, %arg6: memref<512x64xf32, #tpu.memory_space<vmem>>, %arg7: memref<1x128xf32, #tpu.memory_space<vmem>>, %arg8: memref<1x64xf32, #tpu.memory_space<vmem>>, %arg9: memref<192x96xf32, #tpu.memory_space<vmem>>, %arg10: memref<192x64xf32, #tpu.memory_space<vmem>>, %arg11: memref<384x96xf32, #tpu.memory_space<vmem>>, %arg12: memref<384x64xf32, #tpu.memory_space<vmem>>, %arg13: memref<1x96xf32, #tpu.memory_space<vmem>>, %arg14: memref<1x64xf32, #tpu.memory_space<vmem>>, %arg15: memref<160x640xf32, #tpu.memory_space<vmem>>, %arg16: memref<160x512xf32, #tpu.memory_space<vmem>>, %arg17: memref<320x640xf32, #tpu.memory_space<vmem>>, %arg18: memref<320x512xf32, #tpu.memory_space<vmem>>, %arg19: memref<1x640xf32, #tpu.memory_space<vmem>>, %arg20: memref<1x512xf32, #tpu.memory_space<vmem>>, %arg21: memref<18x1152xf32, #tpu.memory_space<vmem>>) attributes {dimension_semantics = [], scalar_prefetch = 0 : i64, scratch_operands = 0 : i64, tpu.core_type = #tpu.core_type<tc>} {
    %c0 = arith.constant 0 : index
    %c0_0 = arith.constant 0 : index
    %0 = vector.load %arg0[%c0, %c0_0] : memref<8x128xf32, #tpu.memory_space<vmem>>, vector<8x128xf32>
    %c0_1 = arith.constant 0 : index
    %c0_2 = arith.constant 0 : index
    %1 = vector.load %arg1[%c0_1, %c0_2] : memref<128x512xf32, #tpu.memory_space<vmem>>, vector<128x512xf32>
    %cst = arith.constant dense<0.000000e+00> : vector<8x512xf32>
    %2 = tpu.matmul %0, %1, %cst {dimension_numbers = #tpu.dot_dimension_numbers<[1], [0], [0], [1], [0, 0, 1, 1], [], []>} : vector<8x128xf32>, vector<128x512xf32>, vector<8x512xf32> -> vector<8x512xf32>
    %c0_3 = arith.constant 0 : index
    %c0_4 = arith.constant 0 : index
    %3 = vector.load %arg2[%c0_3, %c0_4] : memref<1x512xf32, #tpu.memory_space<vmem>>, vector<1x512xf32>
    %4 = vector.broadcast %3 : vector<1x512xf32> to vector<8x512xf32>
    %5 = arith.addf %2, %4 : vector<8x512xf32>
    %cst_5 = arith.constant 0.000000e+00 : f32
    %6 = vector.broadcast %cst_5 : f32 to vector<8x512xf32>
    %7 = arith.maximumf %5, %6 : vector<8x512xf32>
    %8 = vector.extract_strided_slice %7 {offsets = [0, 0], sizes = [1, 256], strides = [1, 1]} : vector<8x512xf32> to vector<1x256xf32>
    %9 = vector.extract_strided_slice %7 {offsets = [0, 256], sizes = [1, 256], strides = [1, 1]} : vector<8x512xf32> to vector<1x256xf32>
    %10 = vector.extract_strided_slice %7 {offsets = [1, 0], sizes = [1, 256], strides = [1, 1]} : vector<8x512xf32> to vector<1x256xf32>
    %11 = vector.extract_strided_slice %7 {offsets = [1, 256], sizes = [1, 256], strides = [1, 1]} : vector<8x512xf32> to vector<1x256xf32>
    %12 = tpu.concatenate %8, %9, %10, %11 in 0 : vector<1x256xf32>, vector<1x256xf32>, vector<1x256xf32>, vector<1x256xf32> -> vector<4x256xf32>
    %c0_6 = arith.constant 0 : index
    %c0_7 = arith.constant 0 : index
    %13 = vector.load %arg3[%c0_6, %c0_7] : memref<256x128xf32, #tpu.memory_space<vmem>>, vector<256x128xf32>
    %c0_8 = arith.constant 0 : index
    %c0_9 = arith.constant 0 : index
    %14 = vector.load %arg4[%c0_8, %c0_9] : memref<256x64xf32, #tpu.memory_space<vmem>>, vector<256x64xf32>
    %c0_10 = arith.constant 0 : index
    %c0_11 = arith.constant 0 : index
    %15 = vector.load %arg5[%c0_10, %c0_11] : memref<512x128xf32, #tpu.memory_space<vmem>>, vector<512x128xf32>
    %c0_12 = arith.constant 0 : index
    %c0_13 = arith.constant 0 : index
    %16 = vector.load %arg6[%c0_12, %c0_13] : memref<512x64xf32, #tpu.memory_space<vmem>>, vector<512x64xf32>
    %c0_14 = arith.constant 0 : index
    %c0_15 = arith.constant 0 : index
    %17 = vector.load %arg7[%c0_14, %c0_15] : memref<1x128xf32, #tpu.memory_space<vmem>>, vector<1x128xf32>
    %c0_16 = arith.constant 0 : index
    %c0_17 = arith.constant 0 : index
    %18 = vector.load %arg8[%c0_16, %c0_17] : memref<1x64xf32, #tpu.memory_space<vmem>>, vector<1x64xf32>
    %19 = vector.extract_strided_slice %12 {offsets = [1, 0], sizes = [3, 256], strides = [1, 1]} : vector<4x256xf32> to vector<3x256xf32>
    %20 = vector.extract_strided_slice %12 {offsets = [0, 0], sizes = [3, 256], strides = [1, 1]} : vector<4x256xf32> to vector<3x256xf32>
    %21 = tpu.concatenate %19, %20 in 1 : vector<3x256xf32>, vector<3x256xf32> -> vector<3x512xf32>
    %cst_18 = arith.constant dense<0.000000e+00> : vector<4x128xf32>
    %22 = tpu.matmul %12, %13, %cst_18 {dimension_numbers = #tpu.dot_dimension_numbers<[1], [0], [0], [1], [0, 0, 1, 1], [], []>} : vector<4x256xf32>, vector<256x128xf32>, vector<4x128xf32> -> vector<4x128xf32>
    %23 = vector.broadcast %17 : vector<1x128xf32> to vector<4x128xf32>
    %24 = arith.addf %22, %23 : vector<4x128xf32>
    %cst_19 = arith.constant dense<0.000000e+00> : vector<4x64xf32>
    %25 = tpu.matmul %12, %14, %cst_19 {dimension_numbers = #tpu.dot_dimension_numbers<[1], [0], [0], [1], [0, 0, 1, 1], [], []>} : vector<4x256xf32>, vector<256x64xf32>, vector<4x64xf32> -> vector<4x64xf32>
    %26 = vector.broadcast %18 : vector<1x64xf32> to vector<4x64xf32>
    %27 = arith.addf %25, %26 : vector<4x64xf32>
    %cst_20 = arith.constant dense<0.000000e+00> : vector<3x128xf32>
    %28 = tpu.matmul %21, %15, %cst_20 {dimension_numbers = #tpu.dot_dimension_numbers<[1], [0], [0], [1], [0, 0, 1, 1], [], []>} : vector<3x512xf32>, vector<512x128xf32>, vector<3x128xf32> -> vector<3x128xf32>
    %29 = vector.broadcast %17 : vector<1x128xf32> to vector<3x128xf32>
    %30 = arith.addf %28, %29 : vector<3x128xf32>
    %cst_21 = arith.constant dense<0.000000e+00> : vector<3x64xf32>
    %31 = tpu.matmul %21, %16, %cst_21 {dimension_numbers = #tpu.dot_dimension_numbers<[1], [0], [0], [1], [0, 0, 1, 1], [], []>} : vector<3x512xf32>, vector<512x64xf32>, vector<3x64xf32> -> vector<3x64xf32>
    %32 = vector.broadcast %18 : vector<1x64xf32> to vector<3x64xf32>
    %33 = arith.addf %31, %32 : vector<3x64xf32>
    %cst_22 = arith.constant 0.000000e+00 : f32
    %34 = vector.broadcast %cst_22 : f32 to vector<4x128xf32>
    %35 = arith.maximumf %24, %34 : vector<4x128xf32>
    %cst_23 = arith.constant 0.000000e+00 : f32
    %36 = vector.broadcast %cst_23 : f32 to vector<4x64xf32>
    %37 = arith.maximumf %27, %36 : vector<4x64xf32>
    %38 = vector.extract_strided_slice %35 {offsets = [0, 0], sizes = [4, 64], strides = [1, 1]} : vector<4x128xf32> to vector<4x64xf32>
    %39 = vector.extract_strided_slice %35 {offsets = [0, 64], sizes = [4, 64], strides = [1, 1]} : vector<4x128xf32> to vector<4x64xf32>
    %40 = tpu.concatenate %38, %37, %39 in 1 : vector<4x64xf32>, vector<4x64xf32>, vector<4x64xf32> -> vector<4x192xf32>
    %cst_24 = arith.constant 0.000000e+00 : f32
    %41 = vector.broadcast %cst_24 : f32 to vector<3x128xf32>
    %42 = arith.maximumf %30, %41 : vector<3x128xf32>
    %cst_25 = arith.constant 0.000000e+00 : f32
    %43 = vector.broadcast %cst_25 : f32 to vector<3x64xf32>
    %44 = arith.maximumf %33, %43 : vector<3x64xf32>
    %45 = vector.extract_strided_slice %42 {offsets = [0, 0], sizes = [3, 64], strides = [1, 1]} : vector<3x128xf32> to vector<3x64xf32>
    %46 = vector.extract_strided_slice %42 {offsets = [0, 64], sizes = [3, 64], strides = [1, 1]} : vector<3x128xf32> to vector<3x64xf32>
    %47 = tpu.concatenate %45, %44, %46 in 1 : vector<3x64xf32>, vector<3x64xf32>, vector<3x64xf32> -> vector<3x192xf32>
    %48 = vector.extract_strided_slice %40 {offsets = [0, 0], sizes = [1, 192], strides = [1, 1]} : vector<4x192xf32> to vector<1x192xf32>
    %49 = vector.extract_strided_slice %47 {offsets = [0, 0], sizes = [1, 192], strides = [1, 1]} : vector<3x192xf32> to vector<1x192xf32>
    %50 = vector.extract_strided_slice %40 {offsets = [1, 0], sizes = [1, 192], strides = [1, 1]} : vector<4x192xf32> to vector<1x192xf32>
    %51 = vector.extract_strided_slice %40 {offsets = [2, 0], sizes = [1, 192], strides = [1, 1]} : vector<4x192xf32> to vector<1x192xf32>
    %52 = vector.extract_strided_slice %47 {offsets = [2, 0], sizes = [1, 192], strides = [1, 1]} : vector<3x192xf32> to vector<1x192xf32>
    %53 = vector.extract_strided_slice %40 {offsets = [3, 0], sizes = [1, 192], strides = [1, 1]} : vector<4x192xf32> to vector<1x192xf32>
    %54 = tpu.concatenate %48, %49, %50, %51, %52, %53 in 0 : vector<1x192xf32>, vector<1x192xf32>, vector<1x192xf32>, vector<1x192xf32>, vector<1x192xf32>, vector<1x192xf32> -> vector<6x192xf32>
    %c0_26 = arith.constant 0 : index
    %c0_27 = arith.constant 0 : index
    %55 = vector.load %arg9[%c0_26, %c0_27] : memref<192x96xf32, #tpu.memory_space<vmem>>, vector<192x96xf32>
    %c0_28 = arith.constant 0 : index
    %c0_29 = arith.constant 0 : index
    %56 = vector.load %arg10[%c0_28, %c0_29] : memref<192x64xf32, #tpu.memory_space<vmem>>, vector<192x64xf32>
    %c0_30 = arith.constant 0 : index
    %c0_31 = arith.constant 0 : index
    %57 = vector.load %arg11[%c0_30, %c0_31] : memref<384x96xf32, #tpu.memory_space<vmem>>, vector<384x96xf32>
    %c0_32 = arith.constant 0 : index
    %c0_33 = arith.constant 0 : index
    %58 = vector.load %arg12[%c0_32, %c0_33] : memref<384x64xf32, #tpu.memory_space<vmem>>, vector<384x64xf32>
    %c0_34 = arith.constant 0 : index
    %c0_35 = arith.constant 0 : index
    %59 = vector.load %arg13[%c0_34, %c0_35] : memref<1x96xf32, #tpu.memory_space<vmem>>, vector<1x96xf32>
    %c0_36 = arith.constant 0 : index
    %c0_37 = arith.constant 0 : index
    %60 = vector.load %arg14[%c0_36, %c0_37] : memref<1x64xf32, #tpu.memory_space<vmem>>, vector<1x64xf32>
    %61 = vector.extract_strided_slice %54 {offsets = [1, 0], sizes = [5, 192], strides = [1, 1]} : vector<6x192xf32> to vector<5x192xf32>
    %62 = vector.extract_strided_slice %54 {offsets = [0, 0], sizes = [5, 192], strides = [1, 1]} : vector<6x192xf32> to vector<5x192xf32>
    %63 = tpu.concatenate %61, %62 in 1 : vector<5x192xf32>, vector<5x192xf32> -> vector<5x384xf32>
    %cst_38 = arith.constant dense<0.000000e+00> : vector<6x96xf32>
    %64 = tpu.matmul %54, %55, %cst_38 {dimension_numbers = #tpu.dot_dimension_numbers<[1], [0], [0], [1], [0, 0, 1, 1], [], []>} : vector<6x192xf32>, vector<192x96xf32>, vector<6x96xf32> -> vector<6x96xf32>
    %65 = vector.broadcast %59 : vector<1x96xf32> to vector<6x96xf32>
    %66 = arith.addf %64, %65 : vector<6x96xf32>
    %cst_39 = arith.constant dense<0.000000e+00> : vector<6x64xf32>
    %67 = tpu.matmul %54, %56, %cst_39 {dimension_numbers = #tpu.dot_dimension_numbers<[1], [0], [0], [1], [0, 0, 1, 1], [], []>} : vector<6x192xf32>, vector<192x64xf32>, vector<6x64xf32> -> vector<6x64xf32>
    %68 = vector.broadcast %60 : vector<1x64xf32> to vector<6x64xf32>
    %69 = arith.addf %67, %68 : vector<6x64xf32>
    %cst_40 = arith.constant dense<0.000000e+00> : vector<5x96xf32>
    %70 = tpu.matmul %63, %57, %cst_40 {dimension_numbers = #tpu.dot_dimension_numbers<[1], [0], [0], [1], [0, 0, 1, 1], [], []>} : vector<5x384xf32>, vector<384x96xf32>, vector<5x96xf32> -> vector<5x96xf32>
    %71 = vector.broadcast %59 : vector<1x96xf32> to vector<5x96xf32>
    %72 = arith.addf %70, %71 : vector<5x96xf32>
    %cst_41 = arith.constant dense<0.000000e+00> : vector<5x64xf32>
    %73 = tpu.matmul %63, %58, %cst_41 {dimension_numbers = #tpu.dot_dimension_numbers<[1], [0], [0], [1], [0, 0, 1, 1], [], []>} : vector<5x384xf32>, vector<384x64xf32>, vector<5x64xf32> -> vector<5x64xf32>
    %74 = vector.broadcast %60 : vector<1x64xf32> to vector<5x64xf32>
    %75 = arith.addf %73, %74 : vector<5x64xf32>
    %cst_42 = arith.constant 0.000000e+00 : f32
    %76 = vector.broadcast %cst_42 : f32 to vector<6x96xf32>
    %77 = arith.maximumf %66, %76 : vector<6x96xf32>
    %cst_43 = arith.constant 0.000000e+00 : f32
    %78 = vector.broadcast %cst_43 : f32 to vector<6x64xf32>
    %79 = arith.maximumf %69, %78 : vector<6x64xf32>
    %80 = vector.extract_strided_slice %77 {offsets = [0, 0], sizes = [6, 32], strides = [1, 1]} : vector<6x96xf32> to vector<6x32xf32>
    %81 = vector.extract_strided_slice %79 {offsets = [0, 0], sizes = [6, 32], strides = [1, 1]} : vector<6x64xf32> to vector<6x32xf32>
    %82 = vector.extract_strided_slice %77 {offsets = [0, 32], sizes = [6, 32], strides = [1, 1]} : vector<6x96xf32> to vector<6x32xf32>
    %83 = vector.extract_strided_slice %79 {offsets = [0, 32], sizes = [6, 32], strides = [1, 1]} : vector<6x64xf32> to vector<6x32xf32>
    %84 = vector.extract_strided_slice %77 {offsets = [0, 64], sizes = [6, 32], strides = [1, 1]} : vector<6x96xf32> to vector<6x32xf32>
    %85 = tpu.concatenate %80, %81, %82, %83, %84 in 1 : vector<6x32xf32>, vector<6x32xf32>, vector<6x32xf32>, vector<6x32xf32>, vector<6x32xf32> -> vector<6x160xf32>
    %cst_44 = arith.constant 0.000000e+00 : f32
    %86 = vector.broadcast %cst_44 : f32 to vector<5x96xf32>
    %87 = arith.maximumf %72, %86 : vector<5x96xf32>
    %cst_45 = arith.constant 0.000000e+00 : f32
    %88 = vector.broadcast %cst_45 : f32 to vector<5x64xf32>
    %89 = arith.maximumf %75, %88 : vector<5x64xf32>
    %90 = vector.extract_strided_slice %87 {offsets = [0, 0], sizes = [5, 32], strides = [1, 1]} : vector<5x96xf32> to vector<5x32xf32>
    %91 = vector.extract_strided_slice %89 {offsets = [0, 0], sizes = [5, 32], strides = [1, 1]} : vector<5x64xf32> to vector<5x32xf32>
    %92 = vector.extract_strided_slice %87 {offsets = [0, 32], sizes = [5, 32], strides = [1, 1]} : vector<5x96xf32> to vector<5x32xf32>
    %93 = vector.extract_strided_slice %89 {offsets = [0, 32], sizes = [5, 32], strides = [1, 1]} : vector<5x64xf32> to vector<5x32xf32>
    %94 = vector.extract_strided_slice %87 {offsets = [0, 64], sizes = [5, 32], strides = [1, 1]} : vector<5x96xf32> to vector<5x32xf32>
    %95 = tpu.concatenate %90, %91, %92, %93, %94 in 1 : vector<5x32xf32>, vector<5x32xf32>, vector<5x32xf32>, vector<5x32xf32>, vector<5x32xf32> -> vector<5x160xf32>
    %96 = vector.extract_strided_slice %85 {offsets = [0, 0], sizes = [1, 160], strides = [1, 1]} : vector<6x160xf32> to vector<1x160xf32>
    %97 = vector.extract_strided_slice %95 {offsets = [0, 0], sizes = [1, 160], strides = [1, 1]} : vector<5x160xf32> to vector<1x160xf32>
    %98 = vector.extract_strided_slice %85 {offsets = [1, 0], sizes = [1, 160], strides = [1, 1]} : vector<6x160xf32> to vector<1x160xf32>
    %99 = vector.extract_strided_slice %95 {offsets = [1, 0], sizes = [1, 160], strides = [1, 1]} : vector<5x160xf32> to vector<1x160xf32>
    %100 = vector.extract_strided_slice %85 {offsets = [2, 0], sizes = [1, 160], strides = [1, 1]} : vector<6x160xf32> to vector<1x160xf32>
    %101 = vector.extract_strided_slice %85 {offsets = [3, 0], sizes = [1, 160], strides = [1, 1]} : vector<6x160xf32> to vector<1x160xf32>
    %102 = vector.extract_strided_slice %95 {offsets = [3, 0], sizes = [1, 160], strides = [1, 1]} : vector<5x160xf32> to vector<1x160xf32>
    %103 = vector.extract_strided_slice %85 {offsets = [4, 0], sizes = [1, 160], strides = [1, 1]} : vector<6x160xf32> to vector<1x160xf32>
    %104 = vector.extract_strided_slice %95 {offsets = [4, 0], sizes = [1, 160], strides = [1, 1]} : vector<5x160xf32> to vector<1x160xf32>
    %105 = vector.extract_strided_slice %85 {offsets = [5, 0], sizes = [1, 160], strides = [1, 1]} : vector<6x160xf32> to vector<1x160xf32>
    %106 = tpu.concatenate %96, %97, %98, %99, %100, %101, %102, %103, %104, %105 in 0 : vector<1x160xf32>, vector<1x160xf32>, vector<1x160xf32>, vector<1x160xf32>, vector<1x160xf32>, vector<1x160xf32>, vector<1x160xf32>, vector<1x160xf32>, vector<1x160xf32>, vector<1x160xf32> -> vector<10x160xf32>
    %c0_46 = arith.constant 0 : index
    %c0_47 = arith.constant 0 : index
    %107 = vector.load %arg15[%c0_46, %c0_47] : memref<160x640xf32, #tpu.memory_space<vmem>>, vector<160x640xf32>
    %c0_48 = arith.constant 0 : index
    %c0_49 = arith.constant 0 : index
    %108 = vector.load %arg16[%c0_48, %c0_49] : memref<160x512xf32, #tpu.memory_space<vmem>>, vector<160x512xf32>
    %c0_50 = arith.constant 0 : index
    %c0_51 = arith.constant 0 : index
    %109 = vector.load %arg17[%c0_50, %c0_51] : memref<320x640xf32, #tpu.memory_space<vmem>>, vector<320x640xf32>
    %c0_52 = arith.constant 0 : index
    %c0_53 = arith.constant 0 : index
    %110 = vector.load %arg18[%c0_52, %c0_53] : memref<320x512xf32, #tpu.memory_space<vmem>>, vector<320x512xf32>
    %c0_54 = arith.constant 0 : index
    %c0_55 = arith.constant 0 : index
    %111 = vector.load %arg19[%c0_54, %c0_55] : memref<1x640xf32, #tpu.memory_space<vmem>>, vector<1x640xf32>
    %c0_56 = arith.constant 0 : index
    %c0_57 = arith.constant 0 : index
    %112 = vector.load %arg20[%c0_56, %c0_57] : memref<1x512xf32, #tpu.memory_space<vmem>>, vector<1x512xf32>
    %113 = vector.extract_strided_slice %106 {offsets = [1, 0], sizes = [9, 160], strides = [1, 1]} : vector<10x160xf32> to vector<9x160xf32>
    %114 = vector.extract_strided_slice %106 {offsets = [0, 0], sizes = [9, 160], strides = [1, 1]} : vector<10x160xf32> to vector<9x160xf32>
    %115 = tpu.concatenate %113, %114 in 1 : vector<9x160xf32>, vector<9x160xf32> -> vector<9x320xf32>
    %cst_58 = arith.constant dense<0.000000e+00> : vector<10x640xf32>
    %116 = tpu.matmul %106, %107, %cst_58 {dimension_numbers = #tpu.dot_dimension_numbers<[1], [0], [0], [1], [0, 0, 1, 1], [], []>} : vector<10x160xf32>, vector<160x640xf32>, vector<10x640xf32> -> vector<10x640xf32>
    %117 = vector.broadcast %111 : vector<1x640xf32> to vector<10x640xf32>
    %118 = arith.addf %116, %117 : vector<10x640xf32>
    %cst_59 = arith.constant dense<0.000000e+00> : vector<10x512xf32>
    %119 = tpu.matmul %106, %108, %cst_59 {dimension_numbers = #tpu.dot_dimension_numbers<[1], [0], [0], [1], [0, 0, 1, 1], [], []>} : vector<10x160xf32>, vector<160x512xf32>, vector<10x512xf32> -> vector<10x512xf32>
    %120 = vector.broadcast %112 : vector<1x512xf32> to vector<10x512xf32>
    %121 = arith.addf %119, %120 : vector<10x512xf32>
    %cst_60 = arith.constant dense<0.000000e+00> : vector<9x640xf32>
    %122 = tpu.matmul %115, %109, %cst_60 {dimension_numbers = #tpu.dot_dimension_numbers<[1], [0], [0], [1], [0, 0, 1, 1], [], []>} : vector<9x320xf32>, vector<320x640xf32>, vector<9x640xf32> -> vector<9x640xf32>
    %123 = vector.broadcast %111 : vector<1x640xf32> to vector<9x640xf32>
    %124 = arith.addf %122, %123 : vector<9x640xf32>
    %cst_61 = arith.constant dense<0.000000e+00> : vector<9x512xf32>
    %125 = tpu.matmul %115, %110, %cst_61 {dimension_numbers = #tpu.dot_dimension_numbers<[1], [0], [0], [1], [0, 0, 1, 1], [], []>} : vector<9x320xf32>, vector<320x512xf32>, vector<9x512xf32> -> vector<9x512xf32>
    %126 = vector.broadcast %112 : vector<1x512xf32> to vector<9x512xf32>
    %127 = arith.addf %125, %126 : vector<9x512xf32>
    %128 = math.tanh %118 : vector<10x640xf32>
    %129 = math.tanh %121 : vector<10x512xf32>
    %130 = vector.extract_strided_slice %128 {offsets = [0, 0], sizes = [10, 128], strides = [1, 1]} : vector<10x640xf32> to vector<10x128xf32>
    %131 = vector.extract_strided_slice %129 {offsets = [0, 0], sizes = [10, 128], strides = [1, 1]} : vector<10x512xf32> to vector<10x128xf32>
    %132 = vector.extract_strided_slice %128 {offsets = [0, 128], sizes = [10, 128], strides = [1, 1]} : vector<10x640xf32> to vector<10x128xf32>
    %133 = vector.extract_strided_slice %129 {offsets = [0, 128], sizes = [10, 128], strides = [1, 1]} : vector<10x512xf32> to vector<10x128xf32>
    %134 = vector.extract_strided_slice %128 {offsets = [0, 256], sizes = [10, 128], strides = [1, 1]} : vector<10x640xf32> to vector<10x128xf32>
    %135 = vector.extract_strided_slice %129 {offsets = [0, 256], sizes = [10, 128], strides = [1, 1]} : vector<10x512xf32> to vector<10x128xf32>
    %136 = vector.extract_strided_slice %128 {offsets = [0, 384], sizes = [10, 128], strides = [1, 1]} : vector<10x640xf32> to vector<10x128xf32>
    %137 = vector.extract_strided_slice %129 {offsets = [0, 384], sizes = [10, 128], strides = [1, 1]} : vector<10x512xf32> to vector<10x128xf32>
    %138 = vector.extract_strided_slice %128 {offsets = [0, 512], sizes = [10, 128], strides = [1, 1]} : vector<10x640xf32> to vector<10x128xf32>
    %139 = tpu.concatenate %130, %131, %132, %133, %134, %135, %136, %137, %138 in 1 : vector<10x128xf32>, vector<10x128xf32>, vector<10x128xf32>, vector<10x128xf32>, vector<10x128xf32>, vector<10x128xf32>, vector<10x128xf32>, vector<10x128xf32>, vector<10x128xf32> -> vector<10x1152xf32>
    %140 = math.tanh %124 : vector<9x640xf32>
    %141 = math.tanh %127 : vector<9x512xf32>
    %142 = vector.extract_strided_slice %140 {offsets = [0, 0], sizes = [9, 128], strides = [1, 1]} : vector<9x640xf32> to vector<9x128xf32>
    %143 = vector.extract_strided_slice %141 {offsets = [0, 0], sizes = [9, 128], strides = [1, 1]} : vector<9x512xf32> to vector<9x128xf32>
    %144 = vector.extract_strided_slice %140 {offsets = [0, 128], sizes = [9, 128], strides = [1, 1]} : vector<9x640xf32> to vector<9x128xf32>
    %145 = vector.extract_strided_slice %141 {offsets = [0, 128], sizes = [9, 128], strides = [1, 1]} : vector<9x512xf32> to vector<9x128xf32>
    %146 = vector.extract_strided_slice %140 {offsets = [0, 256], sizes = [9, 128], strides = [1, 1]} : vector<9x640xf32> to vector<9x128xf32>
    %147 = vector.extract_strided_slice %141 {offsets = [0, 256], sizes = [9, 128], strides = [1, 1]} : vector<9x512xf32> to vector<9x128xf32>
    %148 = vector.extract_strided_slice %140 {offsets = [0, 384], sizes = [9, 128], strides = [1, 1]} : vector<9x640xf32> to vector<9x128xf32>
    %149 = vector.extract_strided_slice %141 {offsets = [0, 384], sizes = [9, 128], strides = [1, 1]} : vector<9x512xf32> to vector<9x128xf32>
    %150 = vector.extract_strided_slice %140 {offsets = [0, 512], sizes = [9, 128], strides = [1, 1]} : vector<9x640xf32> to vector<9x128xf32>
    %151 = tpu.concatenate %142, %143, %144, %145, %146, %147, %148, %149, %150 in 1 : vector<9x128xf32>, vector<9x128xf32>, vector<9x128xf32>, vector<9x128xf32>, vector<9x128xf32>, vector<9x128xf32>, vector<9x128xf32>, vector<9x128xf32>, vector<9x128xf32> -> vector<9x1152xf32>
    %152 = vector.extract_strided_slice %139 {offsets = [0, 0], sizes = [1, 1152], strides = [1, 1]} : vector<10x1152xf32> to vector<1x1152xf32>
    %153 = vector.extract_strided_slice %151 {offsets = [0, 0], sizes = [1, 1152], strides = [1, 1]} : vector<9x1152xf32> to vector<1x1152xf32>
    %154 = vector.extract_strided_slice %139 {offsets = [1, 0], sizes = [1, 1152], strides = [1, 1]} : vector<10x1152xf32> to vector<1x1152xf32>
    %155 = vector.extract_strided_slice %151 {offsets = [1, 0], sizes = [1, 1152], strides = [1, 1]} : vector<9x1152xf32> to vector<1x1152xf32>
    %156 = vector.extract_strided_slice %139 {offsets = [2, 0], sizes = [1, 1152], strides = [1, 1]} : vector<10x1152xf32> to vector<1x1152xf32>
    %157 = vector.extract_strided_slice %151 {offsets = [2, 0], sizes = [1, 1152], strides = [1, 1]} : vector<9x1152xf32> to vector<1x1152xf32>
    %158 = vector.extract_strided_slice %139 {offsets = [3, 0], sizes = [1, 1152], strides = [1, 1]} : vector<10x1152xf32> to vector<1x1152xf32>
    %159 = vector.extract_strided_slice %151 {offsets = [3, 0], sizes = [1, 1152], strides = [1, 1]} : vector<9x1152xf32> to vector<1x1152xf32>
    %160 = vector.extract_strided_slice %139 {offsets = [4, 0], sizes = [1, 1152], strides = [1, 1]} : vector<10x1152xf32> to vector<1x1152xf32>
    %161 = vector.extract_strided_slice %139 {offsets = [5, 0], sizes = [1, 1152], strides = [1, 1]} : vector<10x1152xf32> to vector<1x1152xf32>
    %162 = vector.extract_strided_slice %151 {offsets = [5, 0], sizes = [1, 1152], strides = [1, 1]} : vector<9x1152xf32> to vector<1x1152xf32>
    %163 = vector.extract_strided_slice %139 {offsets = [6, 0], sizes = [1, 1152], strides = [1, 1]} : vector<10x1152xf32> to vector<1x1152xf32>
    %164 = vector.extract_strided_slice %151 {offsets = [6, 0], sizes = [1, 1152], strides = [1, 1]} : vector<9x1152xf32> to vector<1x1152xf32>
    %165 = vector.extract_strided_slice %139 {offsets = [7, 0], sizes = [1, 1152], strides = [1, 1]} : vector<10x1152xf32> to vector<1x1152xf32>
    %166 = vector.extract_strided_slice %151 {offsets = [7, 0], sizes = [1, 1152], strides = [1, 1]} : vector<9x1152xf32> to vector<1x1152xf32>
    %167 = vector.extract_strided_slice %139 {offsets = [8, 0], sizes = [1, 1152], strides = [1, 1]} : vector<10x1152xf32> to vector<1x1152xf32>
    %168 = vector.extract_strided_slice %151 {offsets = [8, 0], sizes = [1, 1152], strides = [1, 1]} : vector<9x1152xf32> to vector<1x1152xf32>
    %169 = vector.extract_strided_slice %139 {offsets = [9, 0], sizes = [1, 1152], strides = [1, 1]} : vector<10x1152xf32> to vector<1x1152xf32>
    %170 = tpu.concatenate %152, %153, %154, %155, %156, %157, %158, %159, %160, %161, %162, %163, %164, %165, %166, %167 in 0 : vector<1x1152xf32>, vector<1x1152xf32>, vector<1x1152xf32>, vector<1x1152xf32>, vector<1x1152xf32>, vector<1x1152xf32>, vector<1x1152xf32>, vector<1x1152xf32>, vector<1x1152xf32>, vector<1x1152xf32>, vector<1x1152xf32>, vector<1x1152xf32>, vector<1x1152xf32>, vector<1x1152xf32>, vector<1x1152xf32>, vector<1x1152xf32> -> vector<16x1152xf32>
    %171 = tpu.concatenate %168, %169 in 0 : vector<1x1152xf32>, vector<1x1152xf32> -> vector<2x1152xf32>
    %172 = tpu.concatenate %170, %171 in 0 : vector<16x1152xf32>, vector<2x1152xf32> -> vector<18x1152xf32>
    %c0_62 = arith.constant 0 : index
    %c0_63 = arith.constant 0 : index
    %173 = vector.load %arg21[%c0_62, %c0_63] : memref<18x1152xf32, #tpu.memory_space<vmem>>, vector<18x1152xf32>
    tpu.vector_store %arg21[%c0_62, %c0_63], %172 {strides = array<i32>} : memref<18x1152xf32, #tpu.memory_space<vmem>>, vector<18x1152xf32>,
    return
  }
}

</mosaic_0001>

<bundles_post_ra>
// kernel: decoder_ising_forward.1
= control target key start
LH: loop header
LB: loop body
LE: loop exit
PB: predicated region body
PF: predicated region fallthrough
CT: control target
= control target key end

     0   :  { %s8335_s0 = inlined_call_operand.vmem [shape: f32[8,128], index: 0, kind: input, shape index: {}]   ;;  %s8336_s1 = inlined_call_operand.hbm [shape: f32[128,512], index: 1, kind: input, shape index: {}]   ;;  %s8337_s2 = inlined_call_operand.vmem [shape: f32[1,512], index: 2, kind: input, shape index: {}]   ;;  %s8338_s3 = inlined_call_operand.hbm [shape: f32[256,128], index: 3, kind: input, shape index: {}]   ;;  %s8339_s4 = inlined_call_operand.vmem [shape: f32[256,64], index: 4, kind: input, shape index: {}]   ;;  %s8340_s5 = inlined_call_operand.hbm [shape: f32[512,128], index: 5, kind: input, shape index: {}]   ;;  %s8341_s6 = inlined_call_operand.vmem [shape: f32[512,64], index: 6, kind: input, shape index: {}]   ;;  %s8342_s7 = inlined_call_operand.vmem [shape: f32[1,128], index: 7, kind: input, shape index: {}]   ;;  %s8343_s8 = inlined_call_operand.vmem [shape: f32[1,64], index: 8, kind: input, shape index: {}]   ;;  %s8344_s9 = inlined_call_operand.hbm [shape: f32[192,96], index: 9, kind: input, shape index: {}]   ;;  %s8345_s10 = inlined_call_operand.vmem [shape: f32[192,64], index: 10, kind: input, shape index: {}]   ;;  %s8346_s11 = inlined_call_operand.vmem [shape: f32[384,96], index: 11, kind: input, shape index: {}]   ;;  %s8347_s12 = inlined_call_operand.vmem [shape: f32[384,64], index: 12, kind: input, shape index: {}]   ;;  %s8348_s13 = inlined_call_operand.vmem [shape: f32[1,96], index: 13, kind: input, shape index: {}]   ;;  %s8349_s14 = inlined_call_operand.vmem [shape: f32[1,64], index: 14, kind: input, shape index: {}]   ;;  %s8350_s15 = inlined_call_operand.vmem [shape: f32[160,640], index: 15, kind: input, shape index: {}]   ;;  %s8351_s16 = inlined_call_operand.hbm [shape: f32[160,512], index: 16, kind: input, shape index: {}]   ;;  %s8352_s17 = inlined_call_operand.vmem [shape: f32[320,640], index: 17, kind: input, shape index: {}]   ;;  %s8353_s18 = inlined_call_operand.hbm [shape: f32[320,512], index: 18, kind: input, shape index: {}]   ;;  %s8354_s19 = inlined_call_operand.vmem [shape: f32[1,640], index: 19, kind: input, shape index: {}]   ;;  %s8355_s20 = inlined_call_operand.vmem [shape: f32[1,512], index: 20, kind: input, shape index: {}]   ;;  %s8356_s21 = inlined_call_operand.vmem [shape: f32[18,1152], index: 21, kind: output, shape index: {}]  }
   0x1   :  { %8364 = sst [smem:[#allocation16_spill]] %s8335_s0 }
   0x2   :  { %8365 = sst [smem:[#allocation17_spill]] %s8336_s1 }
   0x3   :  { %8366 = sst [smem:[#allocation18_spill]] %s8337_s2 }
   0x4   :  { %8367 = sst [smem:[#allocation19_spill]] %s8338_s3 }
   0x5   :  { %8368 = sst [smem:[#allocation20_spill]] %s8339_s4 }
   0x6   :  { %8369 = sst [smem:[#allocation21_spill]] %s8340_s5 }
   0x7   :  { %8370 = sst [smem:[#allocation22_spill]] %s8355_s20 }
   0x8   :  { %8371 = sst [smem:[#allocation23_spill]] %s8356_s21 }
   0x9   :  { %26 = vsyncpa [#allocation3], 0 }
   0xa   :  { %27 = vsyncpa [#allocation5], 0 }
   0xb   :  { %28 = vsyncpa [#allocation8], 0 }
   0xc   :  { %29 = vsyncpa [#allocation11], 0  ;;  %s5786_s2 = smov [#allocation4]   ;;  %s8372_s3 = sld [smem:[#allocation19_spill]] }
   0xd   :  { %s51_s25 = sshll.u32 %s5786_s2, 4  ;;  %s52_s25 = int_to_ptr.vmem [resolvable:$true] %s51_s25 }
  0x12   :  { %s5646_s28 = scalar_lea.hbm %s8372_s3, 4096 }
  0x13   :  { %p5647_p0 = scmp.ne.s32.totalorder %s8372_s3, %s5646_s28  ;;  %p5650_p1 = scmp.lt.u32.totalorder %s5646_s28, %s8372_s3 }
  0x15   :  { %p5652_p2 = pnand %p5650_p1, %p5647_p0 }
  0x17   :  { %5655 = shalt.err (!%p5652_p2)
}
  0x18   :  { %s5656_s5 = scalar_lea.vmem %s52_s25, 4096  ;;  %p5661_p4 = scmp.lt.s32.totalorder %s52_s25, %s52_s25 }
  0x19   :  { %p5657_p3 = scmp.ne.s32.totalorder %s52_s25, %s5656_s5  ;;  %p5662_p5 = scmp.lt.s32.totalorder %s5656_s5, %s5656_s5 }
  0x1b   :  { %p5663_p6 = por %p5662_p5, %p5661_p4 }
  0x1d   :  { %p5664_p7 = pnand %p5663_p6, %p5657_p3 }
  0x1f   :  { %5667 = shalt.err (!%p5664_p7)
}
  0x20   :  { %s8362_s22 = smov 128   ;;  %s8363_s23 = smov 8  }
  0x21   :  { %57 = dma.hbm_to_vmem [thread:$0]  %s8372_s3, 4096, %s52_s25, [#allocation5], %s8362_s22, %s8362_s22, %s8363_s23  }
  0x22   :  { %s5789_s2 = smov [#allocation7]   ;;  %s5790_s27 = smov [#allocation2]  }
  0x23   :  { %s83_s26 = sshll.u32 %s5789_s2, 4  ;;  %s37_s28 = sshll.u32 %s5790_s27, 4  ;;  %s84_s26 = int_to_ptr.vmem [resolvable:$true] %s83_s26  ;;  %s38_s28 = int_to_ptr.vmem [resolvable:$true] %s37_s28 }
  0x24   :  { %s5668_s4 = scalar_lea.hbm %s8344_s9, 3072 }
  0x25   :  { %p5669_p8 = scmp.ne.s32.totalorder %s8344_s9, %s5668_s4  ;;  %p5672_p9 = scmp.lt.u32.totalorder %s5668_s4, %s8344_s9 }
  0x27   :  { %p5674_p10 = pnand %p5672_p9, %p5669_p8 }
  0x29   :  { %5677 = shalt.err (!%p5674_p10)
}
  0x2a   :  { %s5678_s25 = scalar_lea.vmem %s84_s26, 3072  ;;  %p5683_p12 = scmp.lt.s32.totalorder %s84_s26, %s84_s26 }
  0x2b   :  { %p5679_p11 = scmp.ne.s32.totalorder %s84_s26, %s5678_s25  ;;  %p5684_p13 = scmp.lt.s32.totalorder %s5678_s25, %s5678_s25 }
  0x2d   :  { %p5685_p0 = por %p5684_p13, %p5683_p12 }
  0x2f   :  { %p5686_p1 = pnand %p5685_p0, %p5679_p11 }
  0x31   :  { %5689 = shalt.err (!%p5686_p1)
}
  0x32   :  { %89 = dma.hbm_to_vmem [thread:$0]  %s8344_s9, 3072, %s84_s26, [#allocation8], %s8362_s22, %s8362_s22, %s8363_s23  }
  0x33   :  { %s8373_s21 = sld [smem:[#allocation17_spill]] }
  0x39   :  { %s5690_s2 = scalar_lea.hbm %s8373_s21, 8192 }
  0x3a   :  { %p5691_p2 = scmp.ne.s32.totalorder %s8373_s21, %s5690_s2  ;;  %p5694_p3 = scmp.lt.u32.totalorder %s5690_s2, %s8373_s21 }
  0x3c   :  { %p5696_p4 = pnand %p5694_p3, %p5691_p2 }
  0x3e   :  { %5699 = shalt.err (!%p5696_p4)
}
  0x3f   :  { %s5700_s30 = scalar_lea.vmem %s38_s28, 8192  ;;  %p5705_p6 = scmp.lt.s32.totalorder %s38_s28, %s38_s28 }
  0x40   :  { %p5701_p5 = scmp.ne.s32.totalorder %s38_s28, %s5700_s30  ;;  %p5706_p7 = scmp.lt.s32.totalorder %s5700_s30, %s5700_s30 }
  0x42   :  { %p5707_p8 = por %p5706_p7, %p5705_p6 }
  0x44   :  { %p5708_p9 = pnand %p5707_p8, %p5701_p5 }
  0x46   :  { %5711 = shalt.err (!%p5708_p9)
}
  0x47   :  { %s5791_s9 = smov 512   ;;  %s5792_s26 = smov 32  }
  0x48   :  { %43 = dma.hbm_to_vmem [thread:$0]  %s8373_s21, 8192, %s38_s28, [#allocation3], %s5791_s9, %s5791_s9, %s5792_s26  }
  0x49   :  { %s5793_s3 = smov [#allocation6]   ;;  %s5794_s24 = smov [#allocation9]  }
  0x4a   :  { %s65_s1 = sshll.u32 %s5793_s3, 4  ;;  %s107_s20 = sshll.u32 %s5794_s24, 4  ;;  %s66_s1 = int_to_ptr.vmem [resolvable:$true] %s65_s1  ;;  %s108_s20 = int_to_ptr.vmem [resolvable:$true] %s107_s20 }
  0x4b   :  { %s8374_s29 = sld [smem:[#allocation21_spill]] }
  0x51   :  { %s5712_s0 = scalar_lea.hbm %s8374_s29, 8192 }
  0x52   :  { %p5713_p10 = scmp.ne.s32.totalorder %s8374_s29, %s5712_s0  ;;  %p5716_p11 = scmp.lt.u32.totalorder %s5712_s0, %s8374_s29 }
  0x54   :  { %p5718_p12 = pnand %p5716_p11, %p5713_p10 }
  0x56   :  { %5721 = shalt.err (!%p5718_p12)
}
  0x57   :  { %s5722_s28 = scalar_lea.vmem %s66_s1, 8192  ;;  %p5727_p0 = scmp.lt.s32.totalorder %s66_s1, %s66_s1 }
  0x58   :  { %p5723_p13 = scmp.ne.s32.totalorder %s66_s1, %s5722_s28  ;;  %p5728_p1 = scmp.lt.s32.totalorder %s5722_s28, %s5722_s28 }
  0x5a   :  { %p5729_p2 = por %p5728_p1, %p5727_p0 }
  0x5c   :  { %p5730_p3 = pnand %p5729_p2, %p5723_p13 }
  0x5e   :  { %5733 = shalt.err (!%p5730_p3)
}
  0x5f   :  { %s8375_s21 = smov 8   ;;  %s8376_s5 = smov 128  }
  0x60   :  { %71 = dma.hbm_to_vmem [thread:$0]  %s8374_s29, 8192, %s66_s1, [#allocation5], %s8376_s5, %s8376_s5, %s8375_s21  }
  0x61   :  { %s5734_s23 = scalar_lea.hbm %s8351_s16, 10240 }
  0x62   :  { %p5735_p4 = scmp.ne.s32.totalorder %s8351_s16, %s5734_s23  ;;  %p5738_p5 = scmp.lt.u32.totalorder %s5734_s23, %s8351_s16 }
  0x64   :  { %p5740_p6 = pnand %p5738_p5, %p5735_p4 }
  0x66   :  { %5743 = shalt.err (!%p5740_p6)
}
  0x67   :  { %s5744_s30 = scalar_lea.vmem %s108_s20, 10240  ;;  %p5749_p8 = scmp.lt.s32.totalorder %s108_s20, %s108_s20 }
  0x68   :  { %p5745_p7 = scmp.ne.s32.totalorder %s108_s20, %s5744_s30  ;;  %p5750_p9 = scmp.lt.s32.totalorder %s5744_s30, %s5744_s30 }
  0x6a   :  { %p5751_p10 = por %p5750_p9, %p5749_p8 }
  0x6c   :  { %p5752_p11 = pnand %p5751_p10, %p5745_p7 }
  0x6e   :  { %5755 = shalt.err (!%p5752_p11)
}
  0x6f   :  { %113 = dma.hbm_to_vmem [thread:$0]  %s8351_s16, 10240, %s108_s20, [#allocation8], %s5791_s9, %s5791_s9, %s5792_s26  }
  0x70   :  { %s5795_s28 = smov [#allocation10]   ;;  %s5756_s3 = scalar_lea.hbm %s8353_s18, 20480 }
  0x71   :  { %s121_s21 = sshll.u32 %s5795_s28, 4  ;;  %p5757_p12 = scmp.ne.s32.totalorder %s8353_s18, %s5756_s3  ;;  %s122_s21 = int_to_ptr.vmem [resolvable:$true] %s121_s21 }
  0x72   :  { %p5760_p13 = scmp.lt.u32.totalorder %s5756_s3, %s8353_s18 }
  0x74   :  { %p5762_p0 = pnand %p5760_p13, %p5757_p12 }
  0x76   :  { %5765 = shalt.err (!%p5762_p0)
}
  0x77   :  { %s5766_s27 = scalar_lea.vmem %s122_s21, 20480  ;;  %p5771_p2 = scmp.lt.s32.totalorder %s122_s21, %s122_s21 }
  0x78   :  { %p5767_p1 = scmp.ne.s32.totalorder %s122_s21, %s5766_s27  ;;  %p5772_p3 = scmp.lt.s32.totalorder %s5766_s27, %s5766_s27 }
  0x7a   :  { %p5773_p4 = por %p5772_p3, %p5771_p2 }
  0x7c   :  { %p5774_p5 = pnand %p5773_p4, %p5767_p1 }
  0x7e   :  { %5777 = shalt.err (!%p5774_p5)
}
  0x7f   :  { %127 = dma.hbm_to_vmem [thread:$0]  %s8353_s18, 20480, %s122_s21, [#allocation11], %s5791_s9, %s5791_s9, %s5792_s26  }
  0x80   :  { %5778 = dma.done.wait [#allocation3], 8192  }
  0x81   :  { %5779 = vsyncadd [#allocation3], 4294959104 }
  0x82   :  { %5780 = dma.done.wait [#allocation5], 12288  }
  0x83   :  { %5781 = vsyncadd [#allocation5], 4294955008 }
  0x84   :  { %5782 = dma.done.wait [#allocation8], 13312  }
  0x85   :  { %5783 = vsyncadd [#allocation8], 4294953984 }
  0x86   :  { %5784 = dma.done.wait [#allocation11], 20480  }
  0x87   :  { %5785 = vsyncadd [#allocation11], 4294946816  ;;  %v5796_v0 = vmov 0.0   ;;  %v152_v1 = vld [vmem:[#allocation2 + $0x8] sm:$0xff]  ;;  %v154_v3 = vld [vmem:[#allocation2 + $0x18] sm:$0xff]  ;;  %s8377_s0 = sld [smem:[#allocation20_spill]] }
  0x88   :  { %301 = vmatprep.mubr.f32.mxu0 %v5796_v0  ;;  %372 = vmatprep.mubr.f32.mxu1 %v5796_v0  ;;  %v156_v2 = vld [vmem:[#allocation2 + $0x28] sm:$0xff]  ;;  %v158_v5 = vld [vmem:[#allocation2 + $0x38] sm:$0xff]  ;;  %v151_v6 = vld [vmem:[#allocation2] sm:$0xff]  ;;  %s8378_s2 = sld [smem:[#allocation16_spill]]  ;;  %vm399_vm0 = vcmask 1040384   ;;  %vm402_vm1 = vcmask 1041408  }
  0x89   :  { %v4525_v4 = vpack.c.bf16 %v156_v2, %v152_v1  ;;  %v155_v7 = vld [vmem:[#allocation2 + $0x20] sm:$0xff]  ;;  %v4557_v8 = vpack.c.bf16 %v158_v5, %v154_v3  ;;  %v153_v10 = vld [vmem:[#allocation2 + $0x10] sm:$0xff]  ;;  %v160_v12 = vld [vmem:[#allocation2 + $0x48] sm:$0xff]  ;;  %vm405_vm2 = vcmask 1042432   ;;  %s5798_s5 = smov 64   ;;  %vm1056_vm3 = vcmask 523264  }
  0x8a   :  { %v4527_v9 = vpack.c.bf16 %v155_v7, %v151_v6  ;;  %v157_v11 = vld [vmem:[#allocation2 + $0x30] sm:$0xff]  ;;  %v164_v14 = vld [vmem:[#allocation2 + $0x68] sm:$0xff]  ;;  %v162_v15 = vld [vmem:[#allocation2 + $0x58] sm:$0xff]  ;;  %vm1092_vm4 = vcmask 1043456   ;;  %vm1095_vm5 = vcmask 1044480   ;;  %vm5799_vm6 = vmmov 0  }
  0x8b   :  { %4526 = vmatprep.subr.bf16.mxu0 %v4525_v4  ;;  %v4559_v13 = vpack.c.bf16 %v157_v11, %v153_v10  ;;  %v166_v16 = vld [vmem:[#allocation2 + $0x78] sm:$0xff]  ;;  %4558 = vmatprep.subr.bf16.mxu1 %v4557_v8  ;;  %v4529_v17 = vpack.c.bf16 %v164_v14, %v160_v12  ;;  %v159_v19 = vld [vmem:[#allocation2 + $0x40] sm:$0xff]  ;;  %v161_v21 = vld [vmem:[#allocation2 + $0x50] sm:$0xff]  ;;  %vm1779_vm7 = vcmask 1045504   ;;  %vm1782_vm8 = vcmask 1046528   ;;  %s8380_s30 = sld [smem:[#allocation23_spill]] }
  0x8c   :  { %4528 = vmatpush1.bf16.msra.mxu0 %v4527_v9  ;;  %v4561_v18 = vpack.c.bf16 %v166_v16, %v162_v15  ;;  %v163_v20 = vld [vmem:[#allocation2 + $0x60] sm:$0xff]  ;;  %v165_v23 = vld [vmem:[#allocation2 + $0x70] sm:$0xff]  ;;  %v168_v24 = vld [vmem:[#allocation2 + $0x88] sm:$0xff]  ;;  %vm1712_vm9 = vcmask 261120   ;;  %vm1715_vm10 = vcmask 785408   ;;  %s8381_s1 = sld [smem:[#allocation22_spill]] }
  0x8d   :  { %4560 = vmatpush1.bf16.msra.mxu1 %v4559_v13  ;;  %v4531_v22 = vpack.c.bf16 %v163_v20, %v159_v19  ;;  %v172_v25 = vld [vmem:[#allocation2 + $0xa8] sm:$0xff]  ;;  %4530 = vmatprep.subr.bf16.mxu0 %v4529_v17  ;;  %v4563_v26 = vpack.c.bf16 %v165_v23, %v161_v21  ;;  %v170_v28 = vld [vmem:[#allocation2 + $0x98] sm:$0xff]  ;;  %v167_v30 = vld [vmem:[#allocation2 + $0x80] sm:$0xff] }
  0x8e   :  { %4562 = vmatprep.subr.bf16.mxu1 %v4561_v18  ;;  %v4533_v27 = vpack.c.bf16 %v172_v25, %v168_v24  ;;  %v174_v29 = vld [vmem:[#allocation2 + $0xb8] sm:$0xff]  ;;  %v171_v32 = vld [vmem:[#allocation2 + $0xa0] sm:$0xff]  ;;  %v169_v33 = vld [vmem:[#allocation2 + $0x90] sm:$0xff] }
  0x8f   :  { %v4565_v31 = vpack.c.bf16 %v174_v29, %v170_v28  ;;  %v173_v34 = vld [vmem:[#allocation2 + $0xb0] sm:$0xff]  ;;  %v4535_v35 = vpack.c.bf16 %v171_v32, %v167_v30  ;;  %v176_v36 = vld [vmem:[#allocation2 + $0xc8] sm:$0xff]  ;;  %v178_v38 = vld [vmem:[#allocation2 + $0xd8] sm:$0xff] }
  0x90   :  { %4532 = vmatpush1.bf16.msra.mxu0 %v4531_v22  ;;  %v180_v37 = vld [vmem:[#allocation2 + $0xe8] sm:$0xff]  ;;  %v4567_v39 = vpack.c.bf16 %v173_v34, %v169_v33  ;;  %v182_v41 = vld [vmem:[#allocation2 + $0xf8] sm:$0xff]  ;;  %v175_v42 = vld [vmem:[#allocation2 + $0xc0] sm:$0xff] }
  0x91   :  { %4564 = vmatpush1.bf16.msra.mxu1 %v4563_v26  ;;  %4534 = vmatprep.subr.bf16.mxu0 %v4533_v27  ;;  %v4537_v40 = vpack.c.bf16 %v180_v37, %v176_v36  ;;  %v179_v43 = vld [vmem:[#allocation2 + $0xe0] sm:$0xff]  ;;  %v4569_v44 = vpack.c.bf16 %v182_v41, %v178_v38  ;;  %v177_v45 = vld [vmem:[#allocation2 + $0xd0] sm:$0xff]  ;;  %v184_v47 = vld [vmem:[#allocation2 + $0x108] sm:$0xff] }
  0x92   :  { %4566 = vmatprep.subr.bf16.mxu1 %v4565_v31  ;;  %v181_v46 = vld [vmem:[#allocation2 + $0xf0] sm:$0xff]  ;;  %v188_v48 = vld [vmem:[#allocation2 + $0x128] sm:$0xff]  ;;  %v186_v49 = vld [vmem:[#allocation2 + $0x118] sm:$0xff]  ;;  %v4539_v51 = vpack.c.bf16 %v179_v43, %v175_v42 }
  0x93   :  { %v190_v50 = vld [vmem:[#allocation2 + $0x138] sm:$0xff]  ;;  %v4571_v52 = vpack.c.bf16 %v181_v46, %v177_v45  ;;  %v4541_v53 = vpack.c.bf16 %v188_v48, %v184_v47  ;;  %v183_v54 = vld [vmem:[#allocation2 + $0x100] sm:$0xff]  ;;  %v185_v56 = vld [vmem:[#allocation2 + $0x110] sm:$0xff] }
  0x94   :  { %4536 = vmatpush1.bf16.msra.mxu0 %v4535_v35  ;;  %v187_v55 = vld [vmem:[#allocation2 + $0x120] sm:$0xff]  ;;  %v4573_v57 = vpack.c.bf16 %v190_v50, %v186_v49  ;;  %v189_v58 = vld [vmem:[#allocation2 + $0x130] sm:$0xff]  ;;  %v192_v59 = vld [vmem:[#allocation2 + $0x148] sm:$0xff] }
  0x95   :  { %4568 = vmatpush1.bf16.msra.mxu1 %v4567_v39  ;;  %4538 = vmatprep.subr.bf16.mxu0 %v4537_v40  ;;  %v196_v60 = vld [vmem:[#allocation2 + $0x168] sm:$0xff]  ;;  %v194_v61 = vld [vmem:[#allocation2 + $0x158] sm:$0xff]  ;;  %v4543_v63 = vpack.c.bf16 %v187_v55, %v183_v54  ;;  %v4575_v1 = vpack.c.bf16 %v189_v58, %v185_v56  ;;  %v191_v3 = vld [vmem:[#allocation2 + $0x140] sm:$0xff] }
  0x96   :  { %4570 = vmatprep.subr.bf16.mxu1 %v4569_v44  ;;  %v198_v62 = vld [vmem:[#allocation2 + $0x178] sm:$0xff]  ;;  %v4545_v2 = vpack.c.bf16 %v196_v60, %v192_v59  ;;  %v195_v4 = vld [vmem:[#allocation2 + $0x160] sm:$0xff]  ;;  %v193_v5 = vld [vmem:[#allocation2 + $0x150] sm:$0xff] }
  0x97   :  { %v4577_v6 = vpack.c.bf16 %v198_v62, %v194_v61  ;;  %v197_v7 = vld [vmem:[#allocation2 + $0x170] sm:$0xff]  ;;  %v200_v8 = vld [vmem:[#allocation2 + $0x188] sm:$0xff]  ;;  %v202_v10 = vld [vmem:[#allocation2 + $0x198] sm:$0xff]  ;;  %v4547_v12 = vpack.c.bf16 %v195_v4, %v191_v3 }
  0x98   :  { %4540 = vmatpush1.bf16.msra.mxu0 %v4539_v51  ;;  %v204_v9 = vld [vmem:[#allocation2 + $0x1a8] sm:$0xff]  ;;  %v206_v11 = vld [vmem:[#allocation2 + $0x1b8] sm:$0xff]  ;;  %v4579_v13 = vpack.c.bf16 %v197_v7, %v193_v5  ;;  %v199_v15 = vld [vmem:[#allocation2 + $0x180] sm:$0xff] }
  0x99   :  { %4572 = vmatpush1.bf16.msra.mxu1 %v4571_v52  ;;  %4542 = vmatprep.subr.bf16.mxu0 %v4541_v53  ;;  %v4549_v14 = vpack.c.bf16 %v204_v9, %v200_v8  ;;  %v203_v16 = vld [vmem:[#allocation2 + $0x1a0] sm:$0xff]  ;;  %v201_v17 = vld [vmem:[#allocation2 + $0x190] sm:$0xff]  ;;  %v4581_v18 = vpack.c.bf16 %v206_v11, %v202_v10  ;;  %v208_v20 = vld [vmem:[#allocation2 + $0x1c8] sm:$0xff] }
  0x9a   :  { %4574 = vmatprep.subr.bf16.mxu1 %v4573_v57  ;;  %v205_v19 = vld [vmem:[#allocation2 + $0x1b0] sm:$0xff]  ;;  %v212_v21 = vld [vmem:[#allocation2 + $0x1e8] sm:$0xff]  ;;  %v210_v22 = vld [vmem:[#allocation2 + $0x1d8] sm:$0xff]  ;;  %v4551_v24 = vpack.c.bf16 %v203_v16, %v199_v15 }
  0x9b   :  { %v214_v23 = vld [vmem:[#allocation2 + $0x1f8] sm:$0xff]  ;;  %v4583_v25 = vpack.c.bf16 %v205_v19, %v201_v17  ;;  %v4553_v26 = vpack.c.bf16 %v212_v21, %v208_v20  ;;  %v207_v27 = vld [vmem:[#allocation2 + $0x1c0] sm:$0xff]  ;;  %v209_v29 = vld [vmem:[#allocation2 + $0x1d0] sm:$0xff] }
  0x9c   :  { %4544 = vmatpush1.bf16.msra.mxu0 %v4543_v63  ;;  %v211_v28 = vld [vmem:[#allocation2 + $0x1e0] sm:$0xff]  ;;  %v4585_v30 = vpack.c.bf16 %v214_v23, %v210_v22  ;;  %v213_v31 = vld [vmem:[#allocation2 + $0x1f0] sm:$0xff]  ;;  %v425_v33 = vld [vmem:[#allocation4 + $0x88] sm:$0xff] }
  0x9d   :  { %4576 = vmatpush1.bf16.msra.mxu1 %v4575_v1  ;;  %4546 = vmatprep.subr.bf16.mxu0 %v4545_v2  ;;  %v424_v32 = vld [vmem:[#allocation4 + $0x80] sm:$0xff]  ;;  %v457_v35 = vld [vmem:[%s8377_s0 + $0x88] sm:$0xff]  ;;  %v4555_v36 = vpack.c.bf16 %v211_v28, %v207_v27  ;;  %v4587_v37 = vpack.c.bf16 %v213_v31, %v209_v29  ;;  %v426_v44 = vld [vmem:[#allocation4 + $0x90] sm:$0xff] }
  0x9e   :  { %4578 = vmatprep.subr.bf16.mxu1 %v4577_v6  ;;  %v456_v34 = vld [vmem:[%s8377_s0 + $0x80] sm:$0xff]  ;;  %v4589_v38 = vpack.c.bf16 %v425_v33, %v424_v32  ;;  %v409_v40 = vld [vmem:[#allocation4 + $0x8] sm:$0xff]  ;;  %v427_v45 = vld [vmem:[#allocation4 + $0x98] sm:$0xff] }
  0x9f   :  { %v408_v39 = vld [vmem:[#allocation4] sm:$0xff]  ;;  %v4621_v42 = vpack.c.bf16 %v457_v35, %v456_v34  ;;  %v441_v43 = vld [vmem:[%s8377_s0 + $0x8] sm:$0xff]  ;;  %v458_v46 = vld [vmem:[%s8377_s0 + $0x90] sm:$0xff]  ;;  %v4593_v51 = vpack.c.bf16 %v427_v45, %v426_v44 }
  0xa0   :  { %4548 = vmatpush1.bf16.msra.mxu0 %v4547_v12  ;;  %v440_v41 = vld [vmem:[%s8377_s0] sm:$0xff]  ;;  %v459_v47 = vld [vmem:[%s8377_s0 + $0x98] sm:$0xff]  ;;  %v4591_v49 = vpack.c.bf16 %v409_v40, %v408_v39  ;;  %v410_v52 = vld [vmem:[#allocation4 + $0x10] sm:$0xff] }
  0xa1   :  { %4580 = vmatpush1.bf16.msra.mxu1 %v4579_v13  ;;  %4550 = vmatprep.subr.bf16.mxu0 %v4549_v14  ;;  %v150_v48 = vld [vmem:[%s8378_s2] sm:$0xff]  ;;  %v4623_v50 = vpack.c.bf16 %v441_v43, %v440_v41  ;;  %v411_v53 = vld [vmem:[#allocation4 + $0x18] sm:$0xff]  ;;  %v442_v54 = vld [vmem:[%s8377_s0 + $0x10] sm:$0xff]  ;;  %v4625_v55 = vpack.c.bf16 %v459_v47, %v458_v46  ;;  %s8379_s2 = sld [smem:[#allocation18_spill]] }
  0xa2   :  { %4582 = vmatprep.subr.bf16.mxu1 %v4581_v18  ;;  %v443_v56 = vld [vmem:[%s8377_s0 + $0x18] sm:$0xff]  ;;  %v428_v57 = vld [vmem:[#allocation4 + $0xa0] sm:$0xff]  ;;  %v429_v58 = vld [vmem:[#allocation4 + $0xa8] sm:$0xff]  ;;  %v4595_v61 = vpack.c.bf16 %v411_v53, %v410_v52 }
  0xa3   :  { %v460_v59 = vld [vmem:[%s8377_s0 + $0xa0] sm:$0xff]  ;;  %v461_v60 = vld [vmem:[%s8377_s0 + $0xa8] sm:$0xff]  ;;  %v4627_v62 = vpack.c.bf16 %v443_v56, %v442_v54  ;;  %v4597_v63 = vpack.c.bf16 %v429_v58, %v428_v57  ;;  %v430_v6 = vld [vmem:[#allocation4 + $0xb0] sm:$0xff] }
  0xa4   :  { %4552 = vmatpush1.bf16.msra.mxu0 %v4551_v24  ;;  %v412_v1 = vld [vmem:[#allocation4 + $0x20] sm:$0xff]  ;;  %v413_v2 = vld [vmem:[#allocation4 + $0x28] sm:$0xff]  ;;  %v4629_v4 = vpack.c.bf16 %v461_v60, %v460_v59  ;;  %v431_v7 = vld [vmem:[#allocation4 + $0xb8] sm:$0xff] }
  0xa5   :  { %4584 = vmatpush1.bf16.msra.mxu1 %v4583_v25  ;;  %4554 = vmatprep.subr.bf16.mxu0 %v4553_v26  ;;  %v444_v3 = vld [vmem:[%s8377_s0 + $0x20] sm:$0xff]  ;;  %v445_v5 = vld [vmem:[%s8377_s0 + $0x28] sm:$0xff]  ;;  %v462_v8 = vld [vmem:[%s8377_s0 + $0xb0] sm:$0xff]  ;;  %v4599_v10 = vpack.c.bf16 %v413_v2, %v412_v1  ;;  %v4601_v12 = vpack.c.bf16 %v431_v7, %v430_v6 }
  0xa6   :  { %4586 = vmatprep.subr.bf16.mxu1 %v4585_v30  ;;  %v463_v9 = vld [vmem:[%s8377_s0 + $0xb8] sm:$0xff]  ;;  %v4631_v11 = vpack.c.bf16 %v445_v5, %v444_v3  ;;  %v414_v13 = vld [vmem:[#allocation4 + $0x30] sm:$0xff]  ;;  %v432_v18 = vld [vmem:[#allocation4 + $0xc0] sm:$0xff] }
  0xa7   :  { %v415_v14 = vld [vmem:[#allocation4 + $0x38] sm:$0xff]  ;;  %v446_v15 = vld [vmem:[%s8377_s0 + $0x30] sm:$0xff]  ;;  %v4633_v16 = vpack.c.bf16 %v463_v9, %v462_v8  ;;  %v433_v19 = vld [vmem:[#allocation4 + $0xc8] sm:$0xff] }
  0xa8   :  { %4556 = vmatpush1.bf16.msra.mxu0 %v4555_v36  ;;  %v447_v17 = vld [vmem:[%s8377_s0 + $0x38] sm:$0xff]  ;;  %v464_v20 = vld [vmem:[%s8377_s0 + $0xc0] sm:$0xff]  ;;  %v465_v21 = vld [vmem:[%s8377_s0 + $0xc8] sm:$0xff]  ;;  %v4603_v22 = vpack.c.bf16 %v415_v14, %v414_v13  ;;  %v4605_v24 = vpack.c.bf16 %v433_v19, %v432_v18 }
  0xa9   :  { %4588 = vmatpush1.bf16.msra.mxu1 %v4587_v37  ;;  %4590 = vmatprep.subr.bf16.mxu0 %v4589_v38  ;;  %v4635_v23 = vpack.c.bf16 %v447_v17, %v446_v15  ;;  %v416_v25 = vld [vmem:[#allocation4 + $0x40] sm:$0xff]  ;;  %v417_v26 = vld [vmem:[#allocation4 + $0x48] sm:$0xff]  ;;  %v4637_v28 = vpack.c.bf16 %v465_v21, %v464_v20  ;;  %v434_v30 = vld [vmem:[#allocation4 + $0xd0] sm:$0xff] }
  0xaa   :  { %4622 = vmatprep.subr.bf16.mxu1 %v4621_v42  ;;  %v448_v27 = vld [vmem:[%s8377_s0 + $0x40] sm:$0xff]  ;;  %v449_v29 = vld [vmem:[%s8377_s0 + $0x48] sm:$0xff]  ;;  %v435_v31 = vld [vmem:[#allocation4 + $0xd8] sm:$0xff]  ;;  %v4607_v34 = vpack.c.bf16 %v417_v26, %v416_v25 }
  0xab   :  { %302 = vmatmul.mubr.f32.vlgmr.msra.gmra.mrb[0].mxu0 %v150_v48  ;;  %v466_v32 = vld [vmem:[%s8377_s0 + $0xd0] sm:$0xff]  ;;  %v467_v33 = vld [vmem:[%s8377_s0 + $0xd8] sm:$0xff]  ;;  %v4639_v35 = vpack.c.bf16 %v449_v29, %v448_v27  ;;  %v4609_v36 = vpack.c.bf16 %v435_v31, %v434_v30  ;;  %v436_v44 = vld [vmem:[#allocation4 + $0xe0] sm:$0xff] }
  0xac   :  { %373 = vmatmul.mubr.f32.vlgmr.msra.gmra.mrb[0].mxu1 %v150_v48  ;;  %4592 = vmatpush3.bf16.msra.mxu0 %v4591_v49  ;;  %v4641_v37 = vpack.c.bf16 %v467_v33, %v466_v32  ;;  %v418_v38 = vld [vmem:[#allocation4 + $0x50] sm:$0xff]  ;;  %v419_v39 = vld [vmem:[#allocation4 + $0x58] sm:$0xff]  ;;  %v437_v45 = vld [vmem:[#allocation4 + $0xe8] sm:$0xff] }
  0xad   :  { %4624 = vmatpush3.bf16.msra.mxu1 %v4623_v50  ;;  %4594 = vmatprep.subr.bf16.mxu0 %v4593_v51  ;;  %v450_v40 = vld [vmem:[%s8377_s0 + $0x50] sm:$0xff]  ;;  %v4611_v41 = vpack.c.bf16 %v419_v39, %v418_v38  ;;  %v451_v42 = vld [vmem:[%s8377_s0 + $0x58] sm:$0xff]  ;;  %v468_v46 = vld [vmem:[%s8377_s0 + $0xe0] sm:$0xff]  ;;  %v4613_v47 = vpack.c.bf16 %v437_v45, %v436_v44 }
  0xae   :  { %4626 = vmatprep.subr.bf16.mxu1 %v4625_v55  ;;  %v4643_v43 = vpack.c.bf16 %v451_v42, %v450_v40  ;;  %v469_v48 = vld [vmem:[%s8377_s0 + $0xe8] sm:$0xff]  ;;  %v420_v49 = vld [vmem:[#allocation4 + $0x60] sm:$0xff]  ;;  %v438_v56 = vld [vmem:[#allocation4 + $0xf0] sm:$0xff] }
  0xaf   :  { %v421_v50 = vld [vmem:[#allocation4 + $0x68] sm:$0xff]  ;;  %v4645_v51 = vpack.c.bf16 %v469_v48, %v468_v46  ;;  %v452_v53 = vld [vmem:[%s8377_s0 + $0x60] sm:$0xff]  ;;  %v439_v57 = vld [vmem:[#allocation4 + $0xf8] sm:$0xff] }
  0xb0   :  { %4596 = vmatpush3.bf16.msra.mxu0 %v4595_v61  ;;  %v4615_v52 = vpack.c.bf16 %v421_v50, %v420_v49  ;;  %v453_v54 = vld [vmem:[%s8377_s0 + $0x68] sm:$0xff]  ;;  %v470_v58 = vld [vmem:[%s8377_s0 + $0xf0] sm:$0xff]  ;;  %v4617_v59 = vpack.c.bf16 %v439_v57, %v438_v56  ;;  %v471_v60 = vld [vmem:[%s8377_s0 + $0xf8] sm:$0xff] }
  0xb1   :  { %4628 = vmatpush3.bf16.msra.mxu1 %v4627_v62  ;;  %4598 = vmatprep.subr.bf16.mxu0 %v4597_v63  ;;  %v4647_v55 = vpack.c.bf16 %v453_v54, %v452_v53  ;;  %v422_v61 = vld [vmem:[#allocation4 + $0x70] sm:$0xff]  ;;  %v423_v62 = vld [vmem:[#allocation4 + $0x78] sm:$0xff]  ;;  %v4649_v63 = vpack.c.bf16 %v471_v60, %v470_v58  ;;  %v488_v5 = vld [vmem:[#allocation6 + $0x80] sm:$0xff] }
  0xb2   :  { %4630 = vmatprep.subr.bf16.mxu1 %v4629_v4  ;;  %v4619_v1 = vpack.c.bf16 %v423_v62, %v422_v61  ;;  %v454_v2 = vld [vmem:[%s8377_s0 + $0x70] sm:$0xff]  ;;  %v455_v3 = vld [vmem:[%s8377_s0 + $0x78] sm:$0xff]  ;;  %v489_v6 = vld [vmem:[#allocation6 + $0x88] sm:$0xff] }
  0xb3   :  { %v4651_v4 = vpack.c.bf16 %v455_v3, %v454_v2  ;;  %v520_v7 = vld [vmem:[#allocation6 + $0x180] sm:$0xff]  ;;  %v4653_v8 = vpack.c.bf16 %v489_v6, %v488_v5  ;;  %v521_v9 = vld [vmem:[#allocation6 + $0x188] sm:$0xff]  ;;  %v490_v44 = vld [vmem:[#allocation6 + $0x90] sm:$0xff] }
  0xb4   :  { %4600 = vmatpush3.bf16.msra.mxu0 %v4599_v10  ;;  %v4685_v10 = vpack.c.bf16 %v521_v9, %v520_v7  ;;  %v215_v14 = vld [vmem:[%s8379_s2] sm:$0xf]  ;;  %v473_v39 = vld [vmem:[#allocation6 + $0x8] sm:$0xff]  ;;  %v491_v45 = vld [vmem:[#allocation6 + $0x98] sm:$0xff] }
  0xb5   :  { %4632 = vmatpush3.bf16.msra.mxu1 %v4631_v11  ;;  %4602 = vmatprep.subr.bf16.mxu0 %v4601_v12  ;;  %v217_v11 = vlaneseq  ;;  %v504_v40 = vld [vmem:[#allocation6 + $0x100] sm:$0xff]  ;;  %v522_v49 = vld [vmem:[#allocation6 + $0x190] sm:$0xff]  ;;  %v523_v50 = vld [vmem:[#allocation6 + $0x198] sm:$0xff]  ;;  %v4657_v58 = vpack.c.bf16 %v491_v45, %v490_v44 }
  0xb6   :  { %4634 = vmatprep.subr.bf16.mxu1 %v4633_v16  ;;  %v475_v56 = vld [vmem:[#allocation6 + $0x18] sm:$0xff]  ;;  %v492_v61 = vld [vmem:[#allocation6 + $0xa0] sm:$0xff]  ;;  %v493_v2 = vld [vmem:[#allocation6 + $0xa8] sm:$0xff] }
  0xb7   :  { %v6101_v12 = vshrl.u32 %v217_v11, 7  ;;  %v507_v60 = vld [vmem:[#allocation6 + $0x118] sm:$0xff]  ;;  %v524_v3 = vld [vmem:[#allocation6 + $0x1a0] sm:$0xff]  ;;  %v477_v9 = vld [vmem:[#allocation6 + $0x28] sm:$0xff] }
  0xb8   :  { %4604 = vmatpush3.bf16.msra.mxu0 %v4603_v22  ;;  %v499_v44 = vld [vmem:[#allocation6 + $0xd8] sm:$0xff]  ;;  %v530_v45 = vld [vmem:[#allocation6 + $0x1d0] sm:$0xff] }
  0xb9   :  { %4636 = vmatpush3.bf16.msra.mxu1 %v4635_v23  ;;  %4606 = vmatprep.subr.bf16.mxu0 %v4605_v24  ;;  %v6104_v13 = vsub.s32 0, %v6101_v12  ;;  %v6110_v15 = vsub.s32 2, %v6101_v12  ;;  %v6113_v16 = vsub.s32 1, %v6101_v12  ;;  %v6116_v17 = vsub.s32 3, %v6101_v12 }
  0xba   :  { %4638 = vmatprep.subr.bf16.mxu1 %v4637_v28 }
  0xbb   :  { %v220_v18 = vrot.slane %v215_v14, %v6104_v13  ;;  %v228_v19 = vrot.slane %v215_v14, %v6110_v15  ;;  %v224_v20 = vrot.slane %v215_v14, %v6113_v16  ;;  %v232_v21 = vrot.slane %v215_v14, %v6116_v17  ;;  %v508_v14 = vld [vmem:[#allocation6 + $0x120] sm:$0xff] }
  0xbc   :  { %4608 = vmatpush3.bf16.msra.mxu0 %v4607_v34 }
  0xbd   :  { %4640 = vmatpush3.bf16.msra.mxu1 %v4639_v35  ;;  %4610 = vmatprep.subr.bf16.mxu0 %v4609_v36 }
  0xbe   :  { %4642 = vmatprep.subr.bf16.mxu1 %v4641_v37  ;;  %v472_v37 = vld [vmem:[#allocation6] sm:$0xff] }
  0xbf   :  { %v4655_v53 = vpack.c.bf16 %v473_v39, %v472_v37  ;;  %v480_v37 = vld [vmem:[#allocation6 + $0x40] sm:$0xff] }
  0xc0   :  { %4612 = vmatpush3.bf16.msra.mxu0 %v4611_v41  ;;  %v505_v41 = vld [vmem:[#allocation6 + $0x108] sm:$0xff] }
  0xc1   :  { %4644 = vmatpush3.bf16.msra.mxu1 %v4643_v43  ;;  %4614 = vmatprep.subr.bf16.mxu0 %v4613_v47  ;;  %v4687_v54 = vpack.c.bf16 %v505_v41, %v504_v40  ;;  %v512_v41 = vld [vmem:[#allocation6 + $0x140] sm:$0xff] }
  0xc2   :  { %4646 = vmatprep.subr.bf16.mxu1 %v4645_v51 }
  0xc4   :  { %4616 = vmatpush3.bf16.msra.mxu0 %v4615_v52 }
  0xc5   :  { %4648 = vmatpush3.bf16.msra.mxu1 %v4647_v55  ;;  %4618 = vmatprep.subr.bf16.mxu0 %v4617_v59  ;;  %v474_v55 = vld [vmem:[#allocation6 + $0x10] sm:$0xff] }
  0xc6   :  { %4650 = vmatprep.subr.bf16.mxu1 %v4649_v63  ;;  %v506_v59 = vld [vmem:[#allocation6 + $0x110] sm:$0xff]  ;;  %v4689_v63 = vpack.c.bf16 %v523_v50, %v522_v49  ;;  %v4659_v6 = vpack.c.bf16 %v475_v56, %v474_v55  ;;  %v483_v50 = vld [vmem:[#allocation6 + $0x58] sm:$0xff]  ;;  %v500_v56 = vld [vmem:[#allocation6 + $0xe0] sm:$0xff] }
  0xc7   :  { %v4691_v7 = vpack.c.bf16 %v507_v60, %v506_v59  ;;  %v482_v49 = vld [vmem:[#allocation6 + $0x50] sm:$0xff]  ;;  %v515_v55 = vld [vmem:[#allocation6 + $0x158] sm:$0xff]  ;;  %v532_v59 = vld [vmem:[#allocation6 + $0x1e0] sm:$0xff] }
  0xc8   :  { %4620 = vmatpush3.bf16.msra.mxu0 %v4619_v1  ;;  %v533_v60 = vld [vmem:[#allocation6 + $0x1e8] sm:$0xff] }
  0xc9   :  { %4652 = vmatpush3.bf16.msra.mxu1 %v4651_v4  ;;  %4654 = vmatprep.subr.bf16.mxu0 %v4653_v8  ;;  %v525_v4 = vld [vmem:[#allocation6 + $0x1a8] sm:$0xff]  ;;  %v476_v8 = vld [vmem:[#allocation6 + $0x20] sm:$0xff] }
  0xca   :  { %4686 = vmatprep.subr.bf16.mxu1 %v4685_v10  ;;  %v4661_v10 = vpack.c.bf16 %v493_v2, %v492_v61  ;;  %v4693_v11 = vpack.c.bf16 %v525_v4, %v524_v3  ;;  %v4675_v61 = vpack.c.bf16 %v483_v50, %v482_v49  ;;  %v485_v2 = vld [vmem:[#allocation6 + $0x68] sm:$0xff]  ;;  %v4709_v4 = vpack.c.bf16 %v533_v60, %v532_v59 }
 0x17e   :  { %v303_v22 = vpop.f32.mrb[0].mxu0 }
 0x17f   :  { %v304_v23 = vadd.f32 %v303_v22, %v220_v18  ;;  %v374_v24 = vpop.f32.mrb[0].mxu1  ;;  %v305_v25 = vpop.f32.mrb[1].mxu0  ;;  %v509_v18 = vld [vmem:[#allocation6 + $0x128] sm:$0xff]  ;;  %v527_v22 = vld [vmem:[#allocation6 + $0x1b8] sm:$0xff] }
 0x180   :  { %v375_v26 = vadd.f32 %v374_v24, %v228_v19  ;;  %v306_v27 = vadd.f32 %v305_v25, %v224_v20  ;;  %v376_v28 = vpop.f32.mrb[1].mxu1  ;;  %v494_v19 = vld [vmem:[#allocation6 + $0xb0] sm:$0xff]  ;;  %v495_v20 = vld [vmem:[#allocation6 + $0xb8] sm:$0xff]  ;;  %v4695_v24 = vpack.c.bf16 %v509_v18, %v508_v14 }
 0x181   :  { %v379_v29 = vmax.f32 %v304_v23, 0.0  ;;  %v377_v30 = vadd.f32 %v376_v28, %v232_v21  ;;  %v526_v21 = vld [vmem:[#allocation6 + $0x1b0] sm:$0xff]  ;;  %v4663_v23 = vpack.c.bf16 %v477_v9, %v476_v8  ;;  %v503_v9 = vld [vmem:[#allocation6 + $0xf8] sm:$0xff] }
 0x182   :  { %v381_v31 = vmax.f32 %v375_v26, 0.0  ;;  %v380_v32 = vmax.f32 %v306_v27, 0.0  ;;  %v478_v25 = vld [vmem:[#allocation6 + $0x30] sm:$0xff]  ;;  %v479_v26 = vld [vmem:[#allocation6 + $0x38] sm:$0xff]  ;;  %v4665_v27 = vpack.c.bf16 %v495_v20, %v494_v19  ;;  %v4697_v28 = vpack.c.bf16 %v527_v22, %v526_v21 }
 0x183   :  { %v391_v33 = vrot.slane %v379_v29, 7  ;;  %v382_v34 = vmax.f32 %v377_v30, 0.0  ;;  %v511_v30 = vld [vmem:[#allocation6 + $0x138] sm:$0xff]  ;;  %v502_v8 = vld [vmem:[#allocation6 + $0xf0] sm:$0xff] }
 0x184   :  { %v385_v35 = vrot.slane %v381_v31, 7  ;;  %v392_v36 = vrot.slane %v380_v32, 7  ;;  %v395_v42 = vrot.slane %v381_v31, 6  ;;  %v496_v31 = vld [vmem:[#allocation6 + $0xc0] sm:$0xff]  ;;  %v486_v19 = vld [vmem:[#allocation6 + $0x70] sm:$0xff]  ;;  %v487_v20 = vld [vmem:[#allocation6 + $0x78] sm:$0xff]  ;;  %v4681_v21 = vpack.c.bf16 %v503_v9, %v502_v8 }
 0x185   :  { %v386_v38 = vrot.slane %v382_v34, 7  ;;  %v396_v46 = vrot.slane %v382_v34, 6  ;;  %v529_v34 = vld [vmem:[#allocation6 + $0x1c8] sm:$0xff]  ;;  %v542_v9 = vld [vmem:[%s8341_s6 + $0x30] sm:$0xff] }
 0x186   :  { %v400_v43 = vsel %vm399_vm0, %v379_v29, %v385_v35  ;;  %v510_v29 = vld [vmem:[#allocation6 + $0x130] sm:$0xff]  ;;  %v4667_v35 = vpack.c.bf16 %v479_v26, %v478_v25  ;;  %v552_v25 = vld [vmem:[%s8341_s6 + $0x80] sm:$0xff]  ;;  %v553_v26 = vld [vmem:[%s8341_s6 + $0x88] sm:$0xff] }
 0x187   :  { %v401_v47 = vsel %vm399_vm0, %v380_v32, %v386_v38  ;;  %v403_v48 = vsel %vm402_vm1, %v400_v43, %v391_v33  ;;  %v497_v32 = vld [vmem:[#allocation6 + $0xc8] sm:$0xff]  ;;  %v528_v33 = vld [vmem:[#allocation6 + $0x1c0] sm:$0xff]  ;;  %v498_v43 = vld [vmem:[#allocation6 + $0xd0] sm:$0xff] }
 0x188   :  { %v404_v51 = vsel %vm402_vm1, %v401_v47, %v392_v36  ;;  %v6127_v52 = vsel %vm405_vm2, %v403_v48, %v395_v42  ;;  %v4699_v36 = vpack.c.bf16 %v511_v30, %v510_v29  ;;  %v481_v38 = vld [vmem:[#allocation6 + $0x48] sm:$0xff]  ;;  %v4669_v39 = vpack.c.bf16 %v497_v32, %v496_v31 }
 0x189   :  { %v6130_v57 = vsel %vm405_vm2, %v404_v51, %v396_v46  ;;  %v4701_v40 = vpack.c.bf16 %v529_v34, %v528_v33  ;;  %v513_v42 = vld [vmem:[#allocation6 + $0x148] sm:$0xff]  ;;  %v531_v46 = vld [vmem:[#allocation6 + $0x1d8] sm:$0xff]  ;;  %v4671_v47 = vpack.c.bf16 %v481_v38, %v480_v37  ;;  %v4673_v51 = vpack.c.bf16 %v499_v44, %v498_v43  ;;  %v536_v34 = vld [vmem:[%s8341_s6] sm:$0xff] }
 0x18a   :  { %676 = vmatprep.mubr.f32.mxu0 %v6130_v57  ;;  %752 = vmatprep.mubr.f32.mxu1 %v6130_v57  ;;  %v759_v62 = vrot.slane %v6130_v57, 1  ;;  %v605_v1 = vrot.slane %v6130_v57, 7  ;;  %v4703_v48 = vpack.c.bf16 %v513_v42, %v512_v41  ;;  %v4683_v29 = vpack.c.bf16 %v487_v20, %v486_v19  ;;  %v569_v37 = vld [vmem:[%s8341_s6 + $0x108] sm:$0xff]  ;;  %v554_v38 = vld [vmem:[%s8341_s6 + $0x90] sm:$0xff]  ;;  %v587_v41 = vld [vmem:[%s8341_s6 + $0x198] sm:$0xff] }
 0x18b   :  { %677 = vmatmul.mubr.f32.vlgmr.msra.gmra.mrb[2].mxu0 %v6127_v52  ;;  %753 = vmatmul.mubr.f32.vlgmr.msra.gmra.mrb[2].mxu1 %v6127_v52  ;;  %v604_v31 = vrot.slane %v6127_v52, 7  ;;  %v4717_v32 = vpack.c.bf16 %v553_v26, %v552_v25  ;;  %v758_v43 = vrot.slane %v6127_v52, 1  ;;  %v560_v19 = vld [vmem:[%s8341_s6 + $0xc0] sm:$0xff]  ;;  %v561_v20 = vld [vmem:[%s8341_s6 + $0xc8] sm:$0xff]  ;;  %v1100_v52 = vld [vmem:[#allocation7 + $0x10] sm:$0xff] }
 0x18c   :  { %4656 = vmatpush3.bf16.msra.mxu0 %v4655_v53  ;;  %4688 = vmatpush3.bf16.msra.mxu1 %v4687_v54  ;;  %v6138_v5 = vrot.slane %v605_v1, 1  ;;  %v4705_v53 = vpack.c.bf16 %v531_v46, %v530_v45  ;;  %v514_v54 = vld [vmem:[#allocation6 + $0x150] sm:$0xff]  ;;  %v484_v1 = vld [vmem:[#allocation6 + $0x60] sm:$0xff]  ;;  %v4733_v25 = vpack.c.bf16 %v561_v20, %v560_v19  ;;  %v1123_v19 = vld [vmem:[%s8345_s10 + $0x8] sm:$0xff] }
 0x18d   :  { %830 = vmatprep.mubr.f32.mxu0 %v759_v62  ;;  %4658 = vmatprep.subr.bf16.mxu0 %v4657_v58  ;;  %v501_v58 = vld [vmem:[#allocation6 + $0xe8] sm:$0xff]  ;;  %v4679_v14 = vpack.c.bf16 %v485_v2, %v484_v1  ;;  %v6181_v44 = vrot.slane %v604_v31, 1  ;;  %v538_v46 = vld [vmem:[%s8341_s6 + $0x10] sm:$0xff]  ;;  %v572_v1 = vld [vmem:[%s8341_s6 + $0x120] sm:$0xff] }
 0x18e   :  { %4690 = vmatprep.subr.bf16.mxu1 %v4689_v63  ;;  %900 = vmatprep.mubr.f32.mxu1 %v6138_v5  ;;  %v4707_v63 = vpack.c.bf16 %v515_v55, %v514_v54  ;;  %v4677_v3 = vpack.c.bf16 %v501_v58, %v500_v56  ;;  %v557_v54 = vld [vmem:[%s8341_s6 + $0xa8] sm:$0xff]  ;;  %v588_v55 = vld [vmem:[%s8341_s6 + $0x1a0] sm:$0xff]  ;;  %v559_v2 = vld [vmem:[%s8341_s6 + $0xb8] sm:$0xff] }
 0x18f   :  { %v589_v56 = vld [vmem:[%s8341_s6 + $0x1a8] sm:$0xff]  ;;  %v544_v26 = vld [vmem:[%s8341_s6 + $0x40] sm:$0xff]  ;;  %v562_v31 = vld [vmem:[%s8341_s6 + $0xd0] sm:$0xff] }
 0x190   :  { %4660 = vmatpush3.bf16.msra.mxu0 %v4659_v6  ;;  %4692 = vmatpush3.bf16.msra.mxu1 %v4691_v7  ;;  %v516_v6 = vld [vmem:[#allocation6 + $0x160] sm:$0xff]  ;;  %v517_v7 = vld [vmem:[#allocation6 + $0x168] sm:$0xff]  ;;  %v4757_v57 = vpack.c.bf16 %v589_v56, %v588_v55 }
 0x191   :  { %4662 = vmatprep.subr.bf16.mxu0 %v4661_v10  ;;  %4694 = vmatprep.subr.bf16.mxu1 %v4693_v11  ;;  %v534_v10 = vld [vmem:[#allocation6 + $0x1f0] sm:$0xff]  ;;  %v535_v11 = vld [vmem:[#allocation6 + $0x1f8] sm:$0xff]  ;;  %v4711_v18 = vpack.c.bf16 %v517_v7, %v516_v6  ;;  %v580_v55 = vld [vmem:[%s8341_s6 + $0x160] sm:$0xff] }
 0x192   :  { %v4713_v22 = vpack.c.bf16 %v535_v11, %v534_v10  ;;  %v543_v10 = vld [vmem:[%s8341_s6 + $0x38] sm:$0xff]  ;;  %v574_v11 = vld [vmem:[%s8341_s6 + $0x130] sm:$0xff] }
 0x194   :  { %4664 = vmatpush3.bf16.msra.mxu0 %v4663_v23  ;;  %4696 = vmatpush3.bf16.msra.mxu1 %v4695_v24  ;;  %v518_v23 = vld [vmem:[#allocation6 + $0x170] sm:$0xff]  ;;  %v519_v24 = vld [vmem:[#allocation6 + $0x178] sm:$0xff] }
 0x195   :  { %4666 = vmatprep.subr.bf16.mxu0 %v4665_v27  ;;  %4698 = vmatprep.subr.bf16.mxu1 %v4697_v28  ;;  %v584_v27 = vld [vmem:[%s8341_s6 + $0x180] sm:$0xff]  ;;  %v585_v28 = vld [vmem:[%s8341_s6 + $0x188] sm:$0xff]  ;;  %v4715_v30 = vpack.c.bf16 %v519_v24, %v518_v23  ;;  %v4731_v23 = vpack.c.bf16 %v543_v10, %v542_v9 }
 0x196   :  { %v4749_v33 = vpack.c.bf16 %v585_v28, %v584_v27  ;;  %v545_v27 = vld [vmem:[%s8341_s6 + $0x48] sm:$0xff]  ;;  %v576_v28 = vld [vmem:[%s8341_s6 + $0x140] sm:$0xff] }
 0x197   :  { %v1098_v9 = vld [vmem:[#allocation7] sm:$0xff]  ;;  %v1099_v10 = vld [vmem:[#allocation7 + $0x8] sm:$0xff] }
 0x198   :  { %4668 = vmatpush3.bf16.msra.mxu0 %v4667_v35  ;;  %4700 = vmatpush3.bf16.msra.mxu1 %v4699_v36  ;;  %v537_v35 = vld [vmem:[%s8341_s6 + $0x8] sm:$0xff]  ;;  %v568_v36 = vld [vmem:[%s8341_s6 + $0x100] sm:$0xff] }
 0x199   :  { %4670 = vmatprep.subr.bf16.mxu0 %v4669_v39  ;;  %4702 = vmatprep.subr.bf16.mxu1 %v4701_v40  ;;  %v555_v39 = vld [vmem:[%s8341_s6 + $0x98] sm:$0xff]  ;;  %v586_v40 = vld [vmem:[%s8341_s6 + $0x190] sm:$0xff]  ;;  %v4719_v42 = vpack.c.bf16 %v537_v35, %v536_v34  ;;  %v4751_v45 = vpack.c.bf16 %v569_v37, %v568_v36  ;;  %v4735_v35 = vpack.c.bf16 %v545_v27, %v544_v26 }
 0x19a   :  { %v4721_v49 = vpack.c.bf16 %v555_v39, %v554_v38  ;;  %v4753_v50 = vpack.c.bf16 %v587_v41, %v586_v40  ;;  %v595_v34 = vld [vmem:[%s8341_s6 + $0x1d8] sm:$0xff]  ;;  %v546_v38 = vld [vmem:[%s8341_s6 + $0x50] sm:$0xff] }
 0x19b   :  { %v547_v39 = vld [vmem:[%s8341_s6 + $0x58] sm:$0xff]  ;;  %v578_v40 = vld [vmem:[%s8341_s6 + $0x150] sm:$0xff] }
 0x19c   :  { %4672 = vmatpush3.bf16.msra.mxu0 %v4671_v47  ;;  %4704 = vmatpush3.bf16.msra.mxu1 %v4703_v48  ;;  %v539_v47 = vld [vmem:[%s8341_s6 + $0x18] sm:$0xff]  ;;  %v570_v48 = vld [vmem:[%s8341_s6 + $0x110] sm:$0xff] }
 0x19d   :  { %4674 = vmatprep.subr.bf16.mxu0 %v4673_v51  ;;  %4706 = vmatprep.subr.bf16.mxu1 %v4705_v53  ;;  %v571_v51 = vld [vmem:[%s8341_s6 + $0x118] sm:$0xff]  ;;  %v556_v53 = vld [vmem:[%s8341_s6 + $0xa0] sm:$0xff]  ;;  %v4723_v58 = vpack.c.bf16 %v539_v47, %v538_v46  ;;  %v565_v46 = vld [vmem:[%s8341_s6 + $0xe8] sm:$0xff] }
 0x19e   :  { %v4755_v59 = vpack.c.bf16 %v571_v51, %v570_v48  ;;  %v4725_v60 = vpack.c.bf16 %v557_v54, %v556_v53  ;;  %v596_v47 = vld [vmem:[%s8341_s6 + $0x1e0] sm:$0xff]  ;;  %v597_v48 = vld [vmem:[%s8341_s6 + $0x1e8] sm:$0xff] }
 0x19f   :  { %v548_v53 = vld [vmem:[%s8341_s6 + $0x60] sm:$0xff]  ;;  %v549_v54 = vld [vmem:[%s8341_s6 + $0x68] sm:$0xff]  ;;  %v4773_v56 = vpack.c.bf16 %v597_v48, %v596_v47 }
 0x1a0   :  { %4676 = vmatpush3.bf16.msra.mxu0 %v4675_v61  ;;  %4708 = vmatpush3.bf16.msra.mxu1 %v4707_v63  ;;  %v540_v61 = vld [vmem:[%s8341_s6 + $0x20] sm:$0xff]  ;;  %v541_v63 = vld [vmem:[%s8341_s6 + $0x28] sm:$0xff] }
 0x1a1   :  { %4678 = vmatprep.subr.bf16.mxu0 %v4677_v3  ;;  %4710 = vmatprep.subr.bf16.mxu1 %v4709_v4  ;;  %v590_v3 = vld [vmem:[%s8341_s6 + $0x1b0] sm:$0xff]  ;;  %v591_v4 = vld [vmem:[%s8341_s6 + $0x1b8] sm:$0xff]  ;;  %v4727_v6 = vpack.c.bf16 %v541_v63, %v540_v61  ;;  %v1106_v47 = vld [vmem:[#allocation7 + $0x40] sm:$0xff] }
 0x1a2   :  { %v598_v61 = vld [vmem:[%s8341_s6 + $0x1f0] sm:$0xff]  ;;  %v599_v63 = vld [vmem:[%s8341_s6 + $0x1f8] sm:$0xff]  ;;  %v1107_v48 = vld [vmem:[#allocation7 + $0x48] sm:$0xff] }
 0x1a4   :  { %4680 = vmatpush3.bf16.msra.mxu0 %v4679_v14  ;;  %4712 = vmatpush3.bf16.msra.mxu1 %v4711_v18  ;;  %v4761_v14 = vpack.c.bf16 %v591_v4, %v590_v3  ;;  %v575_v18 = vld [vmem:[%s8341_s6 + $0x138] sm:$0xff]  ;;  %v4777_v3 = vpack.c.bf16 %v599_v63, %v598_v61  ;;  %v582_v4 = vld [vmem:[%s8341_s6 + $0x170] sm:$0xff]  ;;  %v1110_v61 = vld [vmem:[#allocation7 + $0x60] sm:$0xff] }
 0x1a5   :  { %4682 = vmatprep.subr.bf16.mxu0 %v4681_v21  ;;  %4714 = vmatprep.subr.bf16.mxu1 %v4713_v22  ;;  %v592_v21 = vld [vmem:[%s8341_s6 + $0x1c0] sm:$0xff]  ;;  %v593_v22 = vld [vmem:[%s8341_s6 + $0x1c8] sm:$0xff]  ;;  %v4763_v24 = vpack.c.bf16 %v575_v18, %v574_v11  ;;  %v4782_v18 = vpack.c.bf16 %v1099_v10, %v1098_v9 }
 0x1a6   :  { %v1122_v11 = vld [vmem:[%s8345_s10] sm:$0xff]  ;;  %v1111_v63 = vld [vmem:[#allocation7 + $0x68] sm:$0xff] }
 0x1a7   :  { %v4818_v20 = vpack.c.bf16 %v1123_v19, %v1122_v11  ;;  %v1114_v9 = vld [vmem:[#allocation7 + $0x80] sm:$0xff]  ;;  %v1115_v10 = vld [vmem:[#allocation7 + $0x88] sm:$0xff] }
 0x1a8   :  { %4684 = vmatpush3.bf16.msra.mxu0 %v4683_v29  ;;  %4716 = vmatpush3.bf16.msra.mxu1 %v4715_v30  ;;  %v4765_v29 = vpack.c.bf16 %v593_v22, %v592_v21  ;;  %v577_v30 = vld [vmem:[%s8341_s6 + $0x148] sm:$0xff]  ;;  %v1125_v21 = vld [vmem:[%s8345_s10 + $0x18] sm:$0xff]  ;;  %v1138_v11 = vld [vmem:[%s8345_s10 + $0x80] sm:$0xff]  ;;  %v4806_v19 = vpack.c.bf16 %v1115_v10, %v1114_v9 }
 0x1a9   :  { %4718 = vmatprep.subr.bf16.mxu0 %v4717_v32  ;;  %4750 = vmatprep.subr.bf16.mxu1 %v4749_v33  ;;  %v563_v32 = vld [vmem:[%s8341_s6 + $0xd8] sm:$0xff]  ;;  %v594_v33 = vld [vmem:[%s8341_s6 + $0x1d0] sm:$0xff]  ;;  %v4767_v36 = vpack.c.bf16 %v577_v30, %v576_v28  ;;  %v1126_v28 = vld [vmem:[%s8345_s10 + $0x20] sm:$0xff] }
 0x1aa   :  { %v4737_v37 = vpack.c.bf16 %v563_v32, %v562_v31  ;;  %v4769_v41 = vpack.c.bf16 %v595_v34, %v594_v33  ;;  %v6373_v32 = vld [vmem:[%s8342_s7] ss:$0 sm:$0xff] }
 0x1ab   :  { %831 = vmatmul.mubr.f32.vlgmr.msra.gmra.mrb[4].mxu0 %v758_v43  ;;  %901 = vmatmul.mubr.f32.vlgmr.msra.gmra.mrb[4].mxu1 %v6181_v44 }
 0x1ac   :  { %4720 = vmatpush3.bf16.msra.mxu0 %v4719_v42  ;;  %970 = vmatprep.mubr.f32.mxu0 %v759_v62  ;;  %v573_v62 = vld [vmem:[%s8341_s6 + $0x128] sm:$0xff]  ;;  %v579_v42 = vld [vmem:[%s8341_s6 + $0x158] sm:$0xff] }
 0x1ad   :  { %4752 = vmatpush3.bf16.msra.mxu1 %v4751_v45  ;;  %1040 = vmatprep.mubr.f32.mxu1 %v6138_v5  ;;  %v558_v5 = vld [vmem:[%s8341_s6 + $0xb0] sm:$0xff]  ;;  %v4759_v7 = vpack.c.bf16 %v573_v62, %v572_v1  ;;  %v564_v45 = vld [vmem:[%s8341_s6 + $0xe0] sm:$0xff]  ;;  %v4743_v1 = vpack.c.bf16 %v549_v54, %v548_v53 }
 0x1ae   :  { %4722 = vmatprep.subr.bf16.mxu0 %v4721_v49  ;;  %4754 = vmatprep.subr.bf16.mxu1 %v4753_v50  ;;  %v4729_v8 = vpack.c.bf16 %v559_v2, %v558_v5  ;;  %v4739_v49 = vpack.c.bf16 %v547_v39, %v546_v38  ;;  %v4771_v50 = vpack.c.bf16 %v579_v42, %v578_v40  ;;  %v550_v5 = vld [vmem:[%s8341_s6 + $0x70] sm:$0xff]  ;;  %v551_v2 = vld [vmem:[%s8341_s6 + $0x78] sm:$0xff] }
 0x1af   :  { %v4741_v51 = vpack.c.bf16 %v565_v46, %v564_v45  ;;  %v1105_v38 = vld [vmem:[#allocation7 + $0x38] sm:$0xff]  ;;  %v1128_v40 = vld [vmem:[%s8345_s10 + $0x30] sm:$0xff] }
 0x1b0   :  { %4724 = vmatpush3.bf16.msra.mxu0 %v4723_v58  ;;  %v581_v58 = vld [vmem:[%s8341_s6 + $0x168] sm:$0xff]  ;;  %v1108_v54 = vld [vmem:[#allocation7 + $0x50] sm:$0xff] }
 0x1b1   :  { %4756 = vmatpush3.bf16.msra.mxu1 %v4755_v59  ;;  %4726 = vmatprep.subr.bf16.mxu0 %v4725_v60  ;;  %v566_v59 = vld [vmem:[%s8341_s6 + $0xf0] sm:$0xff]  ;;  %v567_v60 = vld [vmem:[%s8341_s6 + $0xf8] sm:$0xff] }
 0x1b2   :  { %4758 = vmatprep.subr.bf16.mxu1 %v4757_v57  ;;  %v4775_v57 = vpack.c.bf16 %v581_v58, %v580_v55  ;;  %v4745_v62 = vpack.c.bf16 %v567_v60, %v566_v59  ;;  %v1109_v55 = vld [vmem:[#allocation7 + $0x58] sm:$0xff] }
 0x1b3   :  { %v1133_v58 = vld [vmem:[%s8345_s10 + $0x58] sm:$0xff]  ;;  %v4797_v59 = vpack.c.bf16 %v1109_v55, %v1108_v54  ;;  %v1120_v54 = vld [vmem:[#allocation7 + $0xb0] sm:$0xff] }
 0x1b4   :  { %4728 = vmatpush3.bf16.msra.mxu0 %v4727_v6  ;;  %v583_v6 = vld [vmem:[%s8341_s6 + $0x178] sm:$0xff] }
 0x1b5   :  { %4760 = vmatpush3.bf16.msra.mxu1 %v4759_v7  ;;  %4730 = vmatprep.subr.bf16.mxu0 %v4729_v8  ;;  %v4747_v7 = vpack.c.bf16 %v551_v2, %v550_v5  ;;  %v4779_v8 = vpack.c.bf16 %v583_v6, %v582_v4  ;;  %v1112_v2 = vld [vmem:[#allocation7 + $0x70] sm:$0xff]  ;;  %v1137_v6 = vld [vmem:[%s8345_s10 + $0x78] sm:$0xff] }
 0x1b6   :  { %4762 = vmatprep.subr.bf16.mxu1 %v4761_v14  ;;  %v5797_v14 = vmov 0.0|0.0   ;;  %v1136_v4 = vld [vmem:[%s8345_s10 + $0x70] sm:$0xff]  ;;  %v1121_v55 = vld [vmem:[#allocation7 + $0xb8] sm:$0xff] }
 0x1b8   :  { %4732 = vmatpush3.bf16.msra.mxu0 %v4731_v23 }
 0x1b9   :  { %4764 = vmatpush3.bf16.msra.mxu1 %v4763_v24  ;;  %4734 = vmatprep.subr.bf16.mxu0 %v4733_v25  ;;  %v1102_v24 = vld [vmem:[#allocation7 + $0x20] sm:$0xff]  ;;  %v1103_v25 = vld [vmem:[#allocation7 + $0x28] sm:$0xff] }
 0x1ba   :  { %4766 = vmatprep.subr.bf16.mxu1 %v4765_v29  ;;  %v1127_v29 = vld [vmem:[%s8345_s10 + $0x28] sm:$0xff] }
 0x1bc   :  { %4736 = vmatpush3.bf16.msra.mxu0 %v4735_v35  ;;  %v4788_v35 = vpack.c.bf16 %v1103_v25, %v1102_v24 }
 0x1bd   :  { %4768 = vmatpush3.bf16.msra.mxu1 %v4767_v36  ;;  %4738 = vmatprep.subr.bf16.mxu0 %v4737_v37  ;;  %v4824_v36 = vpack.c.bf16 %v1127_v29, %v1126_v28  ;;  %v1104_v37 = vld [vmem:[#allocation7 + $0x30] sm:$0xff] }
 0x1be   :  { %4770 = vmatprep.subr.bf16.mxu1 %v4769_v41  ;;  %v1129_v41 = vld [vmem:[%s8345_s10 + $0x38] sm:$0xff]  ;;  %v4791_v45 = vpack.c.bf16 %v1105_v38, %v1104_v37  ;;  %v1140_v28 = vld [vmem:[%s8345_s10 + $0x90] sm:$0xff] }
 0x1bf   :  { %v4827_v46 = vpack.c.bf16 %v1129_v41, %v1128_v40  ;;  %v1118_v40 = vld [vmem:[#allocation7 + $0xa0] sm:$0xff]  ;;  %v1119_v41 = vld [vmem:[#allocation7 + $0xa8] sm:$0xff] }
 0x1c0   :  { %4740 = vmatpush3.bf16.msra.mxu0 %v4739_v49  ;;  %v1130_v49 = vld [vmem:[%s8345_s10 + $0x40] sm:$0xff] }
 0x1c1   :  { %4772 = vmatpush3.bf16.msra.mxu1 %v4771_v50  ;;  %4742 = vmatprep.subr.bf16.mxu0 %v4741_v51  ;;  %v1131_v50 = vld [vmem:[%s8345_s10 + $0x48] sm:$0xff]  ;;  %v4794_v51 = vpack.c.bf16 %v1107_v48, %v1106_v47  ;;  %v4812_v47 = vpack.c.bf16 %v1119_v41, %v1118_v40  ;;  %v1148_v40 = vld [vmem:[%s8346_s11 + $0x10] sm:$0xff] }
 0x1c2   :  { %4774 = vmatprep.subr.bf16.mxu1 %v4773_v56  ;;  %v4830_v53 = vpack.c.bf16 %v1131_v50, %v1130_v49  ;;  %v1132_v56 = vld [vmem:[%s8345_s10 + $0x50] sm:$0xff]  ;;  %v1143_v48 = vld [vmem:[%s8345_s10 + $0xa8] sm:$0xff] }
 0x1c3   :  { %v4833_v60 = vpack.c.bf16 %v1133_v58, %v1132_v56  ;;  %v1144_v56 = vld [vmem:[%s8345_s10 + $0xb0] sm:$0xff]  ;;  %v4815_v58 = vpack.c.bf16 %v1121_v55, %v1120_v54  ;;  %v1150_v54 = vld [vmem:[%s8346_s11 + $0x20] sm:$0xff] }
 0x1c4   :  { %4744 = vmatpush3.bf16.msra.mxu0 %v4743_v1  ;;  %v1134_v1 = vld [vmem:[%s8345_s10 + $0x60] sm:$0xff] }
 0x1c5   :  { %4776 = vmatpush3.bf16.msra.mxu1 %v4775_v57  ;;  %4746 = vmatprep.subr.bf16.mxu0 %v4745_v62  ;;  %v1135_v57 = vld [vmem:[%s8345_s10 + $0x68] sm:$0xff]  ;;  %v4800_v62 = vpack.c.bf16 %v1111_v63, %v1110_v61 }
 0x1c6   :  { %4778 = vmatprep.subr.bf16.mxu1 %v4777_v3  ;;  %v4836_v5 = vpack.c.bf16 %v1135_v57, %v1134_v1  ;;  %v1113_v3 = vld [vmem:[#allocation7 + $0x78] sm:$0xff]  ;;  %v1162_v1 = vld [vmem:[%s8346_s11 + $0x80] sm:$0xff]  ;;  %v1163_v57 = vld [vmem:[%s8346_s11 + $0x88] sm:$0xff] }
 0x1c8   :  { %4748 = vmatpush3.bf16.msra.mxu0 %v4747_v7  ;;  %v4803_v7 = vpack.c.bf16 %v1113_v3, %v1112_v2 }
 0x1c9   :  { %4780 = vmatpush3.bf16.msra.mxu1 %v4779_v8  ;;  %4781 = vmatprep.subr.bf16.mxu0 %v5797_v14  ;;  %v4839_v8 = vpack.c.bf16 %v1137_v6, %v1136_v4 }
 0x1ca   :  { %4817 = vmatprep.subr.bf16.mxu1 %v5797_v14 }
 0x1cb   :  { %971 = vmatmul.mubr.f32.vlgmr.msra.gmra.mrb[6].mxu0 %v758_v43  ;;  %v1101_v43 = vld [vmem:[#allocation7 + $0x18] sm:$0xff] }
 0x1cc   :  { %1041 = vmatmul.mubr.f32.vlgmr.msra.gmra.mrb[6].mxu1 %v6181_v44  ;;  %v1124_v44 = vld [vmem:[%s8345_s10 + $0x10] sm:$0xff]  ;;  %4783 = vmatpush1.bf16.msra.mxu0 %v4782_v18  ;;  %v4785_v22 = vpack.c.bf16 %v1101_v43, %v1100_v52  ;;  %v1139_v18 = vld [vmem:[%s8345_s10 + $0x88] sm:$0xff] }
 0x1cd   :  { %4819 = vmatpush1.bf16.msra.mxu1 %v4818_v20  ;;  %4784 = vmatprep.subr.bf16.mxu0 %v5797_v14  ;;  %v4821_v23 = vpack.c.bf16 %v1125_v21, %v1124_v44  ;;  %v4842_v52 = vpack.c.bf16 %v1139_v18, %v1138_v11 }
 0x1ce   :  { %4820 = vmatprep.subr.bf16.mxu1 %v5797_v14 }
 0x1d0   :  { %4786 = vmatpush1.bf16.msra.mxu0 %v4785_v22 }
 0x1d1   :  { %4822 = vmatpush1.bf16.msra.mxu1 %v4821_v23  ;;  %4787 = vmatprep.subr.bf16.mxu0 %v5797_v14 }
 0x1d2   :  { %4823 = vmatprep.subr.bf16.mxu1 %v5797_v14 }
 0x1d4   :  { %4789 = vmatpush1.bf16.msra.mxu0 %v4788_v35  ;;  %v4049_v35 = vld [vmem:[%s8343_s8] ss:$0 sm:$0xff] }
 0x1d5   :  { %4825 = vmatpush1.bf16.msra.mxu1 %v4824_v36  ;;  %4790 = vmatprep.subr.bf16.mxu0 %v5797_v14 }
 0x1d6   :  { %4826 = vmatprep.subr.bf16.mxu1 %v5797_v14 }
 0x1d8   :  { %4792 = vmatpush1.bf16.msra.mxu0 %v4791_v45  ;;  %v1142_v45 = vld [vmem:[%s8345_s10 + $0xa0] sm:$0xff] }
 0x1d9   :  { %4828 = vmatpush1.bf16.msra.mxu1 %v4827_v46  ;;  %4793 = vmatprep.subr.bf16.mxu0 %v5797_v14 }
 0x1da   :  { %4829 = vmatprep.subr.bf16.mxu1 %v5797_v14 }
 0x1dc   :  { %4795 = vmatpush1.bf16.msra.mxu0 %v4794_v51  ;;  %v4848_v51 = vpack.c.bf16 %v1143_v48, %v1142_v45  ;;  %v1181_v48 = vld [vmem:[%s8346_s11 + $0x118] sm:$0xff] }
 0x1dd   :  { %4831 = vmatpush1.bf16.msra.mxu1 %v4830_v53  ;;  %4796 = vmatprep.subr.bf16.mxu0 %v5797_v14 }
 0x1de   :  { %4832 = vmatprep.subr.bf16.mxu1 %v5797_v14 }
 0x1e0   :  { %4798 = vmatpush1.bf16.msra.mxu0 %v4797_v59 }
 0x1e1   :  { %4834 = vmatpush1.bf16.msra.mxu1 %v4833_v60  ;;  %4799 = vmatprep.subr.bf16.mxu0 %v5797_v14 }
 0x1e2   :  { %4835 = vmatprep.subr.bf16.mxu1 %v5797_v14 }
 0x1e4   :  { %4801 = vmatpush1.bf16.msra.mxu0 %v4800_v62  ;;  %v4853_v62 = vpack.c.bf16 %v1163_v57, %v1162_v1  ;;  %v1152_v1 = vld [vmem:[%s8346_s11 + $0x30] sm:$0xff] }
 0x1e5   :  { %4837 = vmatpush1.bf16.msra.mxu1 %v4836_v5  ;;  %4802 = vmatprep.subr.bf16.mxu0 %v5797_v14 }
 0x1e6   :  { %4838 = vmatprep.subr.bf16.mxu1 %v5797_v14 }
 0x1e8   :  { %4804 = vmatpush1.bf16.msra.mxu0 %v4803_v7 }
 0x1e9   :  { %4840 = vmatpush1.bf16.msra.mxu1 %v4839_v8  ;;  %4805 = vmatprep.subr.bf16.mxu0 %v5797_v14 }
 0x1ea   :  { %4841 = vmatprep.subr.bf16.mxu1 %v5797_v14 }
 0x1ec   :  { %4807 = vmatpush1.bf16.msra.mxu0 %v4806_v19 }
 0x1ed   :  { %4843 = vmatpush1.bf16.msra.mxu1 %v4842_v52  ;;  %4808 = vmatprep.subr.bf16.mxu0 %v5797_v14 }
 0x1ee   :  { %4844 = vmatprep.subr.bf16.mxu1 %v5797_v14 }
 0x25e   :  { %v4106_v26 = vpop.f32.mrb[2].mxu0  ;;  %v4141_v27 = vpop.f32.mrb[2].mxu1 }
 0x25f   :  { %v4107_v30 = vpop.f32.mrb[3].mxu0  ;;  %v4142_v31 = vpop.f32.mrb[3].mxu1 }
 0x260   :  { %v4108_v33 = vadd.f32 %v4107_v30, %v4106_v26  ;;  %v6375_v34 = vadd.f32 %v4142_v31, %v4141_v27  ;;  %v1116_v26 = vld [vmem:[#allocation7 + $0x90] sm:$0xff]  ;;  %v1117_v27 = vld [vmem:[#allocation7 + $0x98] sm:$0xff] }
 0x261   :  { %v4809_v29 = vpack.c.bf16 %v1117_v27, %v1116_v26  ;;  %v1141_v30 = vld [vmem:[%s8345_s10 + $0x98] sm:$0xff]  ;;  %v1179_v26 = vld [vmem:[%s8346_s11 + $0x108] sm:$0xff] }
 0x262   :  { %v6379_v39 = vadd.f32 %v4108_v33, %v6373_v32  ;;  %v4845_v33 = vpack.c.bf16 %v1141_v30, %v1140_v28  ;;  %v755_v49 = vadd.f32 %v6375_v34, %v4049_v35  ;;  %v1145_v34 = vld [vmem:[%s8345_s10 + $0xb8] sm:$0xff]  ;;  %v1164_v30 = vld [vmem:[%s8346_s11 + $0x90] sm:$0xff] }
 0x263   :  { %4810 = vmatpush1.bf16.msra.mxu0 %v4809_v29  ;;  %v4851_v61 = vpack.c.bf16 %v1145_v34, %v1144_v56  ;;  %v1151_v56 = vld [vmem:[%s8346_s11 + $0x28] sm:$0xff] }
 0x264   :  { %v1046_v42 = vmax.f32 %v6379_v39, 0.0  ;;  %4846 = vmatpush1.bf16.msra.mxu1 %v4845_v33  ;;  %4811 = vmatprep.subr.bf16.mxu0 %v5797_v14  ;;  %v1047_v59 = vmax.f32 %v755_v49, 0.0  ;;  %v1146_v39 = vld [vmem:[%s8346_s11] sm:$0xff]  ;;  %v1183_v34 = vld [vmem:[%s8346_s11 + $0x128] sm:$0xff] }
 0x265   :  { %4847 = vmatprep.subr.bf16.mxu1 %v5797_v14  ;;  %v1166_v49 = vld [vmem:[%s8346_s11 + $0xa0] sm:$0xff] }
 0x266   :  { %1053 = vrot.lane.b32.xlu1 %v1046_v42, %s5798_s5 }
 0x267   :  { %4813 = vmatpush1.bf16.msra.mxu0 %v4812_v47  ;;  %v1180_v47 = vld [vmem:[%s8346_s11 + $0x110] sm:$0xff] }
 0x268   :  { %4849 = vmatpush1.bf16.msra.mxu1 %v4848_v51  ;;  %4814 = vmatprep.subr.bf16.mxu0 %v5797_v14 }
 0x269   :  { %4850 = vmatprep.subr.bf16.mxu1 %v5797_v14 }
 0x26b   :  { %4816 = vmatpush1.bf16.msra.mxu0 %v4815_v58  ;;  %v1182_v58 = vld [vmem:[%s8346_s11 + $0x120] sm:$0xff] }
 0x26c   :  { %4852 = vmatpush1.bf16.msra.mxu1 %v4851_v61  ;;  %4854 = vmatprep.subr.bf16.mxu0 %v4853_v62  ;;  %v4863_v61 = vpack.c.bf16 %v1151_v56, %v1150_v54  ;;  %v1153_v62 = vld [vmem:[%s8346_s11 + $0x38] sm:$0xff]  ;;  %v1226_v54 = vld [vmem:[%s8347_s12 + $0x100] sm:$0xff] }
 0x26d   :  { %4885 = vmatprep.subr.bf16.mxu1 %v5797_v14  ;;  %v1194_v56 = vld [vmem:[%s8347_s12] sm:$0xff] }
 0x27e   :  { %v4176_v43 = vpop.f32.mrb[4].mxu0  ;;  %v4211_v20 = vpop.f32.mrb[4].mxu1 }
 0x27f   :  { %v4177_v44 = vpop.f32.mrb[5].mxu0  ;;  %v4212_v21 = vpop.f32.mrb[5].mxu1 }
 0x280   :  { %v4178_v22 = vadd.f32 %v4177_v44, %v4176_v43  ;;  %v4213_v23 = vadd.f32 %v4212_v21, %v4211_v20 }
 0x282   :  { %v833_v24 = vadd.f32 %v4178_v22, %v6373_v32 }
 0x284   :  { %v903_v25 = vadd.f32 %v4213_v23, %v833_v24  ;;  %v1147_v24 = vld [vmem:[%s8346_s11 + $0x8] sm:$0xff] }
 0x286   :  { %v1058_v5 = vmax.f32 %v903_v25, 0.0  ;;  %v1178_v25 = vld [vmem:[%s8346_s11 + $0x100] sm:$0xff] }
 0x29e   :  { %v4246_v31 = vpop.f32.mrb[6].mxu0 }
 0x29f   :  { %v4281_v36 = vpop.f32.mrb[6].mxu1  ;;  %v4247_v32 = vpop.f32.mrb[7].mxu0 }
 0x2a0   :  { %v4248_v37 = vadd.f32 %v4247_v32, %v4246_v31  ;;  %v4282_v38 = vpop.f32.mrb[7].mxu1  ;;  %v1165_v31 = vld [vmem:[%s8346_s11 + $0x98] sm:$0xff] }
 0x2a1   :  { %v4283_v46 = vadd.f32 %v4282_v38, %v4281_v36  ;;  %v4886_v38 = vpack.c.bf16 %v1179_v26, %v1178_v25  ;;  %v4857_v45 = vpack.c.bf16 %v1165_v31, %v1164_v30  ;;  %v1190_v30 = vld [vmem:[%s8346_s11 + $0x160] sm:$0xff]  ;;  %v1191_v31 = vld [vmem:[%s8346_s11 + $0x168] sm:$0xff] }
 0x2a2   :  { %v973_v50 = vadd.f32 %v4248_v37, %v4049_v35  ;;  %v4855_v37 = vpack.c.bf16 %v1147_v24, %v1146_v39  ;;  %v1175_v24 = vld [vmem:[%s8346_s11 + $0xe8] sm:$0xff] }
 0x2a4   :  { %v1043_v53 = vadd.f32 %v4283_v46, %v973_v50  ;;  %v1149_v46 = vld [vmem:[%s8346_s11 + $0x18] sm:$0xff]  ;;  %v1167_v50 = vld [vmem:[%s8346_s11 + $0xa8] sm:$0xff] }
 0x2a5   :  { %v4859_v51 = vpack.c.bf16 %v1149_v46, %v1148_v40  ;;  %v4861_v55 = vpack.c.bf16 %v1167_v50, %v1166_v49  ;;  %v1160_v40 = vld [vmem:[%s8346_s11 + $0x70] sm:$0xff]  ;;  %v1211_v49 = vld [vmem:[%s8347_s12 + $0x88] sm:$0xff] }
 0x2a6   :  { %v1059_v60 = vmax.f32 %v1043_v53, 0.0  ;;  %v4889_v53 = vpack.c.bf16 %v1181_v48, %v1180_v47  ;;  %v1192_v46 = vld [vmem:[%s8346_s11 + $0x170] sm:$0xff]  ;;  %v1193_v47 = vld [vmem:[%s8346_s11 + $0x178] sm:$0xff]  ;;  %v1210_v48 = vld [vmem:[%s8347_s12 + $0x80] sm:$0xff] }
 0x2a8   :  { %v5569_v63 = vpack.i.bf16 %v1047_v59, %v1059_v60  ;;  %v1168_v59 = vld [vmem:[%s8346_s11 + $0xb0] sm:$0xff]  ;;  %v1169_v60 = vld [vmem:[%s8346_s11 + $0xb8] sm:$0xff] }
 0x2a9   :  { %v4865_v57 = vpack.c.bf16 %v1169_v60, %v1168_v59  ;;  %v1212_v60 = vld [vmem:[%s8347_s12 + $0x90] sm:$0xff] }
 0x2aa   :  { %5570 = vrot.lane.b32.xlu0 %v5569_v63, %s5798_s5  ;;  %v4892_v63 = vpack.c.bf16 %v1183_v34, %v1182_v58  ;;  %v1195_v58 = vld [vmem:[%s8347_s12 + $0x8] sm:$0xff] }
 0x2ae   :  { %1065 = vrot.lane.b32.xlu0 %v1058_v5, %s5798_s5 }
 0x2d8   :  { %v1054_v6 = vpop.permute.xlu1 %1053 }
 0x2d9   :  { %v1075_v19 = vrot.slane %v1054_v6, 7  ;;  %v1083_v27 = vrot.slane %v1054_v6, 6 }
 0x31c   :  { %v5571_v2 = vpop.permute.xlu0 %5570 }
 0x31d   :  { %v5573_v3 = vunpack.i.h.bf16 %v5571_v2  ;;  %v5572_v4 = vunpack.i.l.bf16 %v5571_v2  ;;  %v1185_v2 = vld [vmem:[%s8346_s11 + $0x138] sm:$0xff] }
 0x31f   :  { %v1057_v7 = vsel %vm1056_vm3, %v1046_v42, %v5573_v3  ;;  %v1067_v8 = vsel %vm1056_vm3, %v1058_v5, %v5572_v4  ;;  %v1184_v5 = vld [vmem:[%s8346_s11 + $0x130] sm:$0xff]  ;;  %v1170_v3 = vld [vmem:[%s8346_s11 + $0xc0] sm:$0xff]  ;;  %v1171_v4 = vld [vmem:[%s8346_s11 + $0xc8] sm:$0xff] }
 0x320   :  { %v1074_v9 = vrot.slane %v1057_v7, 7  ;;  %v1069_v10 = vrot.slane %v1067_v8, 7  ;;  %v1066_v11 = vpop.permute.xlu0 %1065  ;;  %v1078_v43 = vrot.slane %v1067_v8, 6  ;;  %v1082_v22 = vrot.slane %v1057_v7, 6  ;;  %v1154_v8 = vld [vmem:[%s8346_s11 + $0x40] sm:$0xff] }
 0x321   :  { %v1070_v18 = vrot.slane %v1066_v11, 7  ;;  %v1079_v42 = vrot.slane %v1066_v11, 6  ;;  %v1186_v11 = vld [vmem:[%s8346_s11 + $0x140] sm:$0xff] }
 0x322   :  { %v1086_v52 = vsel %vm399_vm0, %v1057_v7, %v1069_v10  ;;  %v4895_v7 = vpack.c.bf16 %v1185_v2, %v1184_v5  ;;  %v1155_v10 = vld [vmem:[%s8346_s11 + $0x48] sm:$0xff]  ;;  %v4911_v2 = vpack.c.bf16 %v1195_v58, %v1194_v56 }
 0x323   :  { %v1087_v20 = vsel %vm399_vm0, %v1054_v6, %v1070_v18  ;;  %v1088_v44 = vsel %vm402_vm1, %v1086_v52, %v1074_v9  ;;  %v4867_v6 = vpack.c.bf16 %v1153_v62, %v1152_v1  ;;  %v1187_v18 = vld [vmem:[%s8346_s11 + $0x148] sm:$0xff]  ;;  %v1173_v52 = vld [vmem:[%s8346_s11 + $0xd8] sm:$0xff] }
 0x324   :  { %v1089_v21 = vsel %vm402_vm1, %v1087_v20, %v1075_v19  ;;  %v1090_v23 = vsel %vm405_vm2, %v1088_v44, %v1074_v9  ;;  %v4869_v9 = vpack.c.bf16 %v1171_v4, %v1170_v3  ;;  %v4898_v20 = vpack.c.bf16 %v1187_v18, %v1186_v11  ;;  %v1156_v44 = vld [vmem:[%s8346_s11 + $0x50] sm:$0xff]  ;;  %v1229_v4 = vld [vmem:[%s8347_s12 + $0x118] sm:$0xff] }
 0x325   :  { %v1091_v28 = vsel %vm405_vm2, %v1089_v21, %v1075_v19  ;;  %v1093_v29 = vsel %vm1092_vm4, %v1090_v23, %v1078_v43  ;;  %v1172_v19 = vld [vmem:[%s8346_s11 + $0xd0] sm:$0xff]  ;;  %v4871_v43 = vpack.c.bf16 %v1155_v10, %v1154_v8  ;;  %v1174_v23 = vld [vmem:[%s8346_s11 + $0xe0] sm:$0xff]  ;;  %v1197_v8 = vld [vmem:[%s8347_s12 + $0x18] sm:$0xff] }
 0x326   :  { %v1094_v33 = vsel %vm1092_vm4, %v1091_v28, %v1079_v42  ;;  %v6503_v35 = vsel %vm1095_vm5, %v1093_v29, %v1082_v22  ;;  %v4873_v39 = vpack.c.bf16 %v1173_v52, %v1172_v19  ;;  %v1157_v42 = vld [vmem:[%s8346_s11 + $0x58] sm:$0xff]  ;;  %v1188_v21 = vld [vmem:[%s8346_s11 + $0x150] sm:$0xff]  ;;  %v4877_v28 = vpack.c.bf16 %v1175_v24, %v1174_v23  ;;  %v1159_v29 = vld [vmem:[%s8346_s11 + $0x68] sm:$0xff] }
 0x327   :  { %v6506_v36 = vsel %vm1095_vm5, %v1094_v33, %v1083_v27  ;;  %v1246_v32 = vrot.slane %v6503_v35, 7  ;;  %v1189_v22 = vld [vmem:[%s8346_s11 + $0x158] sm:$0xff]  ;;  %v4875_v25 = vpack.c.bf16 %v1157_v42, %v1156_v44  ;;  %v1158_v27 = vld [vmem:[%s8346_s11 + $0x60] sm:$0xff]  ;;  %v1176_v33 = vld [vmem:[%s8346_s11 + $0xf0] sm:$0xff] }
 0x328   :  { %4051 = vmatprep.mubr.msk.f32.mxu0 %vm1056_vm3, %v6506_v36  ;;  %4053 = vmatprep.mubr.msk.f32.mxu1 %vm1056_vm3, %v6506_v36  ;;  %v1247_v41 = vrot.slane %v6506_v36, 7  ;;  %v4901_v26 = vpack.c.bf16 %v1189_v22, %v1188_v21  ;;  %v1228_v3 = vld [vmem:[%s8347_s12 + $0x110] sm:$0xff]  ;;  %v1215_v10 = vld [vmem:[%s8347_s12 + $0xa8] sm:$0xff]  ;;  %v1230_v19 = vld [vmem:[%s8347_s12 + $0x120] sm:$0xff] }
 0x329   :  { %1328 = vmatmul.mubr.f32.vlgmr.msra.gmra.mrb[8].mxu0 %v6503_v35  ;;  %1404 = vmatmul.mubr.f32.vlgmr.msra.gmra.mrb[8].mxu1 %v6503_v35  ;;  %v4945_v11 = vpack.c.bf16 %v1229_v4, %v1228_v3  ;;  %v1231_v52 = vld [vmem:[%s8347_s12 + $0x128] sm:$0xff]  ;;  %v1217_v42 = vld [vmem:[%s8347_s12 + $0xb8] sm:$0xff]  ;;  %v1232_v23 = vld [vmem:[%s8347_s12 + $0x130] sm:$0xff] }
 0x32a   :  { %1248 = vrot.lane.b32.xlu1 %v1246_v32, %s5798_s5  ;;  %1250 = vrot.lane.b32.xlu0 %v1247_v41, %s5798_s5  ;;  %v1177_v32 = vld [vmem:[%s8346_s11 + $0xf8] sm:$0xff]  ;;  %v1199_v44 = vld [vmem:[%s8347_s12 + $0x28] sm:$0xff]  ;;  %v4948_v21 = vpack.c.bf16 %v1231_v52, %v1230_v19 }
 0x32b   :  { %4856 = vmatpush3.bf16.msra.mxu0 %v4855_v37  ;;  %4887 = vmatpush3.bf16.msra.mxu1 %v4886_v38  ;;  %v4879_v37 = vpack.c.bf16 %v1159_v29, %v1158_v27  ;;  %v4904_v38 = vpack.c.bf16 %v1191_v31, %v1190_v30  ;;  %v4881_v41 = vpack.c.bf16 %v1177_v32, %v1176_v33  ;;  %v1233_v24 = vld [vmem:[%s8347_s12 + $0x138] sm:$0xff]  ;;  %v1219_v29 = vld [vmem:[%s8347_s12 + $0xc8] sm:$0xff]  ;;  %v1234_v33 = vld [vmem:[%s8347_s12 + $0x140] sm:$0xff] }
 0x32c   :  { %4858 = vmatprep.subr.bf16.mxu0 %v4857_v45  ;;  %4888 = vmatprep.subr.bf16.mxu1 %v5797_v14  ;;  %v1161_v45 = vld [vmem:[%s8346_s11 + $0x78] sm:$0xff]  ;;  %v4951_v30 = vpack.c.bf16 %v1233_v24, %v1232_v23  ;;  %v1235_v32 = vld [vmem:[%s8347_s12 + $0x148] sm:$0xff]  ;;  %v1240_v4 = vld [vmem:[%s8347_s12 + $0x170] sm:$0xff] }
 0x32d   :  { %4468 = vmatprep.mubr.msk.f32.mxu1 %vm5799_vm6, %v5796_v0  ;;  %v4883_v50 = vpack.c.bf16 %v1161_v45, %v1160_v40  ;;  %v1201_v27 = vld [vmem:[%s8347_s12 + $0x38] sm:$0xff]  ;;  %v1203_v40 = vld [vmem:[%s8347_s12 + $0x48] sm:$0xff]  ;;  %v4050_v19 = vld [vmem:[%s8348_s13] ss:$0 sm:$0xff] }
 0x32e   :  { %v1221_v45 = vld [vmem:[%s8347_s12 + $0xd8] sm:$0xff]  ;;  %v1788_v24 = vld [vmem:[%s8350_s15 + $0x8] sm:$0xff] }
 0x32f   :  { %4860 = vmatpush3.bf16.msra.mxu0 %v4859_v51  ;;  %4890 = vmatpush3.bf16.msra.mxu1 %v4889_v53  ;;  %v4907_v51 = vpack.c.bf16 %v1193_v47, %v1192_v46  ;;  %v4909_v53 = vpack.c.bf16 %v1211_v49, %v1210_v48  ;;  %v4954_v46 = vpack.c.bf16 %v1235_v32, %v1234_v33  ;;  %v1236_v48 = vld [vmem:[%s8347_s12 + $0x150] sm:$0xff]  ;;  %v1237_v49 = vld [vmem:[%s8347_s12 + $0x158] sm:$0xff] }
 0x330   :  { %4862 = vmatprep.subr.bf16.mxu0 %v4861_v55  ;;  %4891 = vmatprep.subr.bf16.mxu1 %v5797_v14  ;;  %v1227_v55 = vld [vmem:[%s8347_s12 + $0x108] sm:$0xff]  ;;  %v4957_v56 = vpack.c.bf16 %v1237_v49, %v1236_v48  ;;  %v1805_v49 = vld [vmem:[%s8350_s15 + $0x90] sm:$0xff] }
 0x333   :  { %4864 = vmatpush3.bf16.msra.mxu0 %v4863_v61  ;;  %4893 = vmatpush3.bf16.msra.mxu1 %v4892_v63  ;;  %v1213_v61 = vld [vmem:[%s8347_s12 + $0x98] sm:$0xff] }
 0x334   :  { %4866 = vmatprep.subr.bf16.mxu0 %v4865_v57  ;;  %4894 = vmatprep.subr.bf16.mxu1 %v5797_v14  ;;  %v4942_v57 = vpack.c.bf16 %v1227_v55, %v1226_v54  ;;  %v1222_v54 = vld [vmem:[%s8347_s12 + $0xe0] sm:$0xff]  ;;  %v1223_v55 = vld [vmem:[%s8347_s12 + $0xe8] sm:$0xff] }
 0x337   :  { %4868 = vmatpush3.bf16.msra.mxu0 %v4867_v6  ;;  %4896 = vmatpush3.bf16.msra.mxu1 %v4895_v7  ;;  %v1410_v6 = vrot.slane %v6503_v35, 1  ;;  %v4913_v7 = vpack.c.bf16 %v1213_v61, %v1212_v60  ;;  %v4933_v60 = vpack.c.bf16 %v1223_v55, %v1222_v54  ;;  %v1206_v61 = vld [vmem:[%s8347_s12 + $0x60] sm:$0xff] }
 0x338   :  { %4870 = vmatprep.subr.bf16.mxu0 %v4869_v9  ;;  %4897 = vmatprep.subr.bf16.mxu1 %v5797_v14  ;;  %v1214_v9 = vld [vmem:[%s8347_s12 + $0xa0] sm:$0xff] }
 0x33b   :  { %4872 = vmatpush3.bf16.msra.mxu0 %v4871_v43  ;;  %4899 = vmatpush3.bf16.msra.mxu1 %v4898_v20  ;;  %v4917_v43 = vpack.c.bf16 %v1215_v10, %v1214_v9  ;;  %v1198_v20 = vld [vmem:[%s8347_s12 + $0x20] sm:$0xff]  ;;  %v1209_v9 = vld [vmem:[%s8347_s12 + $0x78] sm:$0xff] }
 0x33c   :  { %4874 = vmatprep.subr.bf16.mxu0 %v4873_v39  ;;  %4900 = vmatprep.subr.bf16.mxu1 %v5797_v14  ;;  %v1216_v39 = vld [vmem:[%s8347_s12 + $0xb0] sm:$0xff]  ;;  %v4919_v22 = vpack.c.bf16 %v1199_v44, %v1198_v20 }
 0x33f   :  { %4876 = vmatpush3.bf16.msra.mxu0 %v4875_v25  ;;  %4902 = vmatpush3.bf16.msra.mxu1 %v4901_v26  ;;  %v4921_v25 = vpack.c.bf16 %v1217_v42, %v1216_v39  ;;  %v1200_v26 = vld [vmem:[%s8347_s12 + $0x30] sm:$0xff] }
 0x340   :  { %4878 = vmatprep.subr.bf16.mxu0 %v4877_v28  ;;  %4903 = vmatprep.subr.bf16.mxu1 %v5797_v14  ;;  %v1218_v28 = vld [vmem:[%s8347_s12 + $0xc0] sm:$0xff]  ;;  %v4923_v31 = vpack.c.bf16 %v1201_v27, %v1200_v26  ;;  %v1790_v26 = vld [vmem:[%s8350_s15 + $0x18] sm:$0xff] }
 0x343   :  { %4880 = vmatpush3.bf16.msra.mxu0 %v4879_v37  ;;  %4905 = vmatpush3.bf16.msra.mxu1 %v4904_v38  ;;  %v4925_v37 = vpack.c.bf16 %v1219_v29, %v1218_v28  ;;  %v1202_v38 = vld [vmem:[%s8347_s12 + $0x40] sm:$0xff] }
 0x344   :  { %4882 = vmatprep.subr.bf16.mxu0 %v4881_v41  ;;  %4906 = vmatprep.subr.bf16.mxu1 %v5797_v14  ;;  %v1220_v41 = vld [vmem:[%s8347_s12 + $0xd0] sm:$0xff]  ;;  %v4927_v47 = vpack.c.bf16 %v1203_v40, %v1202_v38  ;;  %v1795_v28 = vld [vmem:[%s8350_s15 + $0x40] sm:$0xff]  ;;  %v1794_v38 = vld [vmem:[%s8350_s15 + $0x38] sm:$0xff] }
 0x345   :  { %v1787_v29 = vld [vmem:[%s8350_s15] sm:$0xff]  ;;  %v5005_v33 = vpack.c.bf16 %v1795_v28, %v1790_v26  ;;  %v1832_v28 = vld [vmem:[%s8350_s15 + $0x168] sm:$0xff] }
 0x347   :  { %4884 = vmatpush3.bf16.msra.mxu0 %v4883_v50  ;;  %4908 = vmatpush3.bf16.msra.mxu1 %v4907_v51  ;;  %v4929_v50 = vpack.c.bf16 %v1221_v45, %v1220_v41  ;;  %v1204_v51 = vld [vmem:[%s8347_s12 + $0x50] sm:$0xff]  ;;  %v1798_v45 = vld [vmem:[%s8350_s15 + $0x58] sm:$0xff] }
 0x348   :  { %4910 = vmatprep.subr.bf16.mxu0 %v4909_v53  ;;  %4941 = vmatprep.subr.bf16.mxu1 %v5797_v14  ;;  %v1205_v53 = vld [vmem:[%s8347_s12 + $0x58] sm:$0xff] }
 0x349   :  { %v4931_v58 = vpack.c.bf16 %v1205_v53, %v1204_v51  ;;  %v1802_v51 = vld [vmem:[%s8350_s15 + $0x78] sm:$0xff] }
 0x39c   :  { %v1249_v34 = vpop.permute.xlu1 %1248  ;;  %v1251_v59 = vpop.permute.xlu0 %1250 }
 0x39d   :  { %v1254_v63 = vsel %vm1056_vm3, %v6506_v36, %v1249_v34  ;;  %v6675_v1 = vsel %vm1056_vm3, %v1249_v34, %v1251_v59  ;;  %v1196_v36 = vld [vmem:[%s8347_s12 + $0x10] sm:$0xff]  ;;  %v1238_v34 = vld [vmem:[%s8347_s12 + $0x160] sm:$0xff]  ;;  %v1239_v59 = vld [vmem:[%s8347_s12 + $0x168] sm:$0xff] }
 0x39e   :  { %v1411_v62 = vrot.slane %v1254_v63, 1  ;;  %v1412_v5 = vrot.slane %v6675_v1, 1  ;;  %v4915_v18 = vpack.c.bf16 %v1197_v8, %v1196_v36  ;;  %v1207_v63 = vld [vmem:[%s8347_s12 + $0x68] sm:$0xff]  ;;  %v1208_v8 = vld [vmem:[%s8347_s12 + $0x70] sm:$0xff] }
 0x39f   :  { %v4935_v3 = vpack.c.bf16 %v1207_v63, %v1206_v61  ;;  %v1810_v61 = vld [vmem:[%s8350_s15 + $0xb8] sm:$0xff] }
 0x3a0   :  { %1480 = vmatprep.mubr.f32.mxu0 %v1411_v62  ;;  %4469 = vmatmul.mubr.f32.vlgmr.msra.gmra.mrb[10].mxu1 %v1412_v5 }
 0x3a1   :  { %1481 = vmatmul.mubr.f32.vlgmr.msra.gmra.mrb[10].mxu0 %v1410_v6  ;;  %4943 = vmatpush3.bf16.msra.mxu1 %v4942_v57  ;;  %v1224_v57 = vld [vmem:[%s8347_s12 + $0xf0] sm:$0xff] }
 0x3a2   :  { %4912 = vmatpush3.bf16.msra.mxu0 %v4911_v2  ;;  %1620 = vmatprep.mubr.f32.mxu0 %v1411_v62  ;;  %v1225_v62 = vld [vmem:[%s8347_s12 + $0xf8] sm:$0xff]  ;;  %v4960_v2 = vpack.c.bf16 %v1239_v59, %v1238_v34  ;;  %v1808_v59 = vld [vmem:[%s8350_s15 + $0xa8] sm:$0xff] }
 0x3a3   :  { %4914 = vmatprep.subr.bf16.mxu0 %v4913_v7  ;;  %4944 = vmatprep.subr.bf16.mxu1 %v5797_v14  ;;  %v1241_v7 = vld [vmem:[%s8347_s12 + $0x178] sm:$0xff]  ;;  %v4937_v36 = vpack.c.bf16 %v1225_v62, %v1224_v57  ;;  %v1815_v57 = vld [vmem:[%s8350_s15 + $0xe0] sm:$0xff] }
 0x3a4   :  { %4503 = vmatprep.mubr.msk.f32.mxu1 %vm5799_vm6, %v5796_v0  ;;  %v4963_v10 = vpack.c.bf16 %v1241_v7, %v1240_v4  ;;  %v1807_v62 = vld [vmem:[%s8350_s15 + $0xa0] sm:$0xff]  ;;  %v1809_v4 = vld [vmem:[%s8350_s15 + $0xb0] sm:$0xff]  ;;  %v1814_v7 = vld [vmem:[%s8350_s15 + $0xd8] sm:$0xff] }
 0x3a5   :  { %4946 = vmatpush3.bf16.msra.mxu1 %v4945_v11  ;;  %v4939_v11 = vpack.c.bf16 %v1209_v9, %v1208_v8  ;;  %v5015_v8 = vpack.c.bf16 %v1814_v7, %v1809_v4  ;;  %v1818_v9 = vld [vmem:[%s8350_s15 + $0xf8] sm:$0xff]  ;;  %v1863_v7 = vld [vmem:[%s8350_s15 + $0x260] sm:$0xff] }
 0x3a6   :  { %4916 = vmatpush3.bf16.msra.mxu0 %v4915_v18  ;;  %4947 = vmatprep.subr.bf16.mxu1 %v5797_v14  ;;  %v6819_v18 = vld [vmem:[%s8349_s14] ss:$0 sm:$0xff]  ;;  %v1858_v4 = vld [vmem:[%s8350_s15 + $0x238] sm:$0xff] }
 0x3a7   :  { %4918 = vmatprep.subr.bf16.mxu0 %v4917_v43 }
 0x3a9   :  { %4949 = vmatpush3.bf16.msra.mxu1 %v4948_v21 }
 0x3aa   :  { %4920 = vmatpush3.bf16.msra.mxu0 %v4919_v22  ;;  %4950 = vmatprep.subr.bf16.mxu1 %v5797_v14 }
 0x3ab   :  { %4922 = vmatprep.subr.bf16.mxu0 %v4921_v25  ;;  %v1793_v25 = vld [vmem:[%s8350_s15 + $0x30] sm:$0xff] }
 0x3ac   :  { %v4965_v27 = vpack.c.bf16 %v1793_v25, %v1788_v24  ;;  %v1835_v24 = vld [vmem:[%s8350_s15 + $0x180] sm:$0xff] }
 0x3ad   :  { %4952 = vmatpush3.bf16.msra.mxu1 %v4951_v30  ;;  %v1792_v30 = vld [vmem:[%s8350_s15 + $0x28] sm:$0xff] }
 0x3ae   :  { %4924 = vmatpush3.bf16.msra.mxu0 %v4923_v31  ;;  %4953 = vmatprep.subr.bf16.mxu1 %v5797_v14  ;;  %v4967_v32 = vpack.c.bf16 %v1792_v30, %v1787_v29  ;;  %v1829_v29 = vld [vmem:[%s8350_s15 + $0x150] sm:$0xff] }
 0x3af   :  { %4926 = vmatprep.subr.bf16.mxu0 %v4925_v37  ;;  %v1789_v37 = vld [vmem:[%s8350_s15 + $0x10] sm:$0xff] }
 0x3b0   :  { %v5007_v40 = vpack.c.bf16 %v1794_v38, %v1789_v37  ;;  %v1840_v37 = vld [vmem:[%s8350_s15 + $0x1a8] sm:$0xff]  ;;  %v1845_v38 = vld [vmem:[%s8350_s15 + $0x1d0] sm:$0xff] }
 0x3b1   :  { %4955 = vmatpush3.bf16.msra.mxu1 %v4954_v46  ;;  %v1803_v46 = vld [vmem:[%s8350_s15 + $0x80] sm:$0xff] }
 0x3b2   :  { %4928 = vmatpush3.bf16.msra.mxu0 %v4927_v47  ;;  %4956 = vmatprep.subr.bf16.mxu1 %v5797_v14  ;;  %v1800_v47 = vld [vmem:[%s8350_s15 + $0x68] sm:$0xff]  ;;  %v4969_v48 = vpack.c.bf16 %v1803_v46, %v1798_v45  ;;  %v1837_v46 = vld [vmem:[%s8350_s15 + $0x190] sm:$0xff] }
 0x3b3   :  { %4930 = vmatprep.subr.bf16.mxu0 %v4929_v50  ;;  %v1797_v50 = vld [vmem:[%s8350_s15 + $0x50] sm:$0xff]  ;;  %v5009_v54 = vpack.c.bf16 %v1805_v49, %v1800_v47  ;;  %v1842_v47 = vld [vmem:[%s8350_s15 + $0x1b8] sm:$0xff]  ;;  %v1839_v49 = vld [vmem:[%s8350_s15 + $0x1a0] sm:$0xff] }
 0x3b4   :  { %v4971_v55 = vpack.c.bf16 %v1802_v51, %v1797_v50  ;;  %v1844_v50 = vld [vmem:[%s8350_s15 + $0x1c8] sm:$0xff]  ;;  %v4987_v51 = vpack.c.bf16 %v1842_v47, %v1837_v46 }
 0x3b5   :  { %4958 = vmatpush3.bf16.msra.mxu1 %v4957_v56  ;;  %v1799_v56 = vld [vmem:[%s8350_s15 + $0x60] sm:$0xff] }
 0x3b6   :  { %4932 = vmatpush3.bf16.msra.mxu0 %v4931_v58  ;;  %4959 = vmatprep.subr.bf16.mxu1 %v5797_v14  ;;  %v1804_v58 = vld [vmem:[%s8350_s15 + $0x88] sm:$0xff] }
 0x3b7   :  { %4934 = vmatprep.subr.bf16.mxu0 %v4933_v60  ;;  %v5011_v34 = vpack.c.bf16 %v1804_v58, %v1799_v56  ;;  %v1813_v60 = vld [vmem:[%s8350_s15 + $0xd0] sm:$0xff]  ;;  %v1850_v58 = vld [vmem:[%s8350_s15 + $0x1f8] sm:$0xff] }
 0x3b8   :  { %v4973_v63 = vpack.c.bf16 %v1813_v60, %v1808_v59  ;;  %v1853_v56 = vld [vmem:[%s8350_s15 + $0x210] sm:$0xff]  ;;  %v1855_v59 = vld [vmem:[%s8350_s15 + $0x220] sm:$0xff] }
 0x3b9   :  { %4961 = vmatpush3.bf16.msra.mxu1 %v4960_v2  ;;  %v5013_v2 = vpack.c.bf16 %v1815_v57, %v1810_v61  ;;  %v1847_v60 = vld [vmem:[%s8350_s15 + $0x1e0] sm:$0xff]  ;;  %v1852_v61 = vld [vmem:[%s8350_s15 + $0x208] sm:$0xff] }
 0x3ba   :  { %4936 = vmatpush3.bf16.msra.mxu0 %v4935_v3  ;;  %4962 = vmatprep.subr.bf16.mxu1 %v5797_v14  ;;  %v1812_v3 = vld [vmem:[%s8350_s15 + $0xc8] sm:$0xff]  ;;  %v4991_v57 = vpack.c.bf16 %v1852_v61, %v1847_v60 }
 0x3bb   :  { %4938 = vmatprep.subr.bf16.mxu0 %v4937_v36  ;;  %v4975_v36 = vpack.c.bf16 %v1812_v3, %v1807_v62  ;;  %v1849_v62 = vld [vmem:[%s8350_s15 + $0x1f0] sm:$0xff] }
 0x3bd   :  { %4964 = vmatpush3.bf16.msra.mxu1 %v4963_v10  ;;  %v1823_v10 = vld [vmem:[%s8350_s15 + $0x120] sm:$0xff] }
 0x3be   :  { %4940 = vmatpush3.bf16.msra.mxu0 %v4939_v11  ;;  %5006 = vmatprep.subr.bf16.mxu1 %v5005_v33  ;;  %v1820_v11 = vld [vmem:[%s8350_s15 + $0x108] sm:$0xff]  ;;  %v1838_v33 = vld [vmem:[%s8350_s15 + $0x198] sm:$0xff] }
 0x3bf   :  { %4966 = vmatprep.subr.bf16.mxu0 %v4965_v27  ;;  %v1827_v27 = vld [vmem:[%s8350_s15 + $0x140] sm:$0xff] }
 0x3c0   :  { %4504 = vmatmul.mubr.f32.vlgmr.msra.gmra.mrb[12].mxu1 %v1412_v5 }
 0x3c1   :  { %1621 = vmatmul.mubr.f32.vlgmr.msra.gmra.mrb[12].mxu0 %v1410_v6  ;;  %5008 = vmatpush1.bf16.msra.mxu1 %v5007_v40  ;;  %v4983_v40 = vpack.c.bf16 %v1832_v28, %v1827_v27  ;;  %v1875_v28 = vld [vmem:[%s8350_s15 + $0x2c0] sm:$0xff] }
 0x3c2   :  { %4968 = vmatpush1.bf16.msra.mxu0 %v4967_v32  ;;  %5010 = vmatprep.subr.bf16.mxu1 %v5009_v54  ;;  %v1843_v32 = vld [vmem:[%s8350_s15 + $0x1c0] sm:$0xff]  ;;  %v5027_v54 = vpack.c.bf16 %v1844_v50, %v1839_v49  ;;  %v1877_v49 = vld [vmem:[%s8350_s15 + $0x2d0] sm:$0xff]  ;;  %v1882_v50 = vld [vmem:[%s8350_s15 + $0x2f8] sm:$0xff] }
 0x3c3   :  { %4970 = vmatprep.subr.bf16.mxu0 %v4969_v48  ;;  %v4985_v45 = vpack.c.bf16 %v1843_v32, %v1838_v33  ;;  %v5025_v48 = vpack.c.bf16 %v1845_v38, %v1840_v37  ;;  %v1874_v32 = vld [vmem:[%s8350_s15 + $0x2b8] sm:$0xff] }
 0x3c5   :  { %5012 = vmatpush1.bf16.msra.mxu1 %v5011_v34 }
 0x3c6   :  { %4972 = vmatpush1.bf16.msra.mxu0 %v4971_v55  ;;  %5014 = vmatprep.subr.bf16.mxu1 %v5013_v2  ;;  %v1848_v55 = vld [vmem:[%s8350_s15 + $0x1e8] sm:$0xff]  ;;  %v1854_v2 = vld [vmem:[%s8350_s15 + $0x218] sm:$0xff] }
 0x3c7   :  { %4974 = vmatprep.subr.bf16.mxu0 %v4973_v63  ;;  %v4989_v34 = vpack.c.bf16 %v1853_v56, %v1848_v55  ;;  %v5029_v63 = vpack.c.bf16 %v1855_v59, %v1850_v58  ;;  %v5031_v3 = vpack.c.bf16 %v1854_v2, %v1849_v62  ;;  %v1879_v55 = vld [vmem:[%s8350_s15 + $0x2e0] sm:$0xff]  ;;  %v1884_v56 = vld [vmem:[%s8350_s15 + $0x308] sm:$0xff] }
 0x3c8   :  { %v5043_v58 = vpack.c.bf16 %v1884_v56, %v1879_v55  ;;  %v1892_v59 = vld [vmem:[#allocation9 + $0x28] sm:$0xff]  ;;  %v1801_v55 = vld [vmem:[%s8350_s15 + $0x70] sm:$0xff] }
 0x3c9   :  { %5016 = vmatpush1.bf16.msra.mxu1 %v5015_v8 }
 0x3ca   :  { %4976 = vmatpush1.bf16.msra.mxu0 %v4975_v36  ;;  %v1860_v36 = vld [vmem:[%s8350_s15 + $0x248] sm:$0xff] }
 0x3fc   :  { %v1329_v52 = vpop.f32.mrb[8].mxu0  ;;  %v1405_v43 = vpop.f32.mrb[8].mxu1 }
 0x3fd   :  { %v6825_v20 = vadd.f32 %v6819_v18, %v1405_v43  ;;  %v1331_v44 = vpop.f32.mrb[9].mxu0  ;;  %v1407_v1 = vpop.f32.mrb[9].mxu1  ;;  %v1330_v5 = vadd.f32 %v4050_v19, %v1329_v52  ;;  %v1825_v52 = vld [vmem:[%s8350_s15 + $0x130] sm:$0xff] }
 0x3fe   :  { %v1817_v43 = vld [vmem:[%s8350_s15 + $0xf0] sm:$0xff]  ;;  %v1822_v44 = vld [vmem:[%s8350_s15 + $0x118] sm:$0xff]  ;;  %v5017_v1 = vpack.c.bf16 %v1825_v52, %v1820_v11 }
 0x3ff   :  { %v1697_v35 = vmax.f32 %v6825_v20, 0.0  ;;  %v6831_v6 = vmax.f32 %v1330_v5, 0.0  ;;  %v1819_v5 = vld [vmem:[%s8350_s15 + $0x100] sm:$0xff]  ;;  %v1857_v11 = vld [vmem:[%s8350_s15 + $0x230] sm:$0xff] }
 0x400   :  { %5018 = vmatprep.subr.bf16.mxu1 %v5017_v1 }
 0x401   :  { %1699 = vrot.lane.b32.xlu0 %v1697_v35, %s5792_s26 }
 0x405   :  { %1703 = vrot.lane.b32.xlu0 %v6831_v6, %s5792_s26 }
 0x473   :  { %v1552_v39 = vpop.f32.mrb[10].mxu1  ;;  %v1700_v61 = vpop.permute.xlu0 %1699 }
 0x474   :  { %v4316_v42 = vpop.f32.mrb[10].mxu0  ;;  %v4470_v21 = vpop.f32.mrb[11].mxu1 }
 0x475   :  { %v4317_v22 = vpop.f32.mrb[11].mxu0  ;;  %v4979_v21 = vpack.c.bf16 %v1822_v44, %v1817_v43 }
 0x476   :  { %v4318_v23 = vadd.f32 %v4317_v22, %v4316_v42  ;;  %v1828_v42 = vld [vmem:[%s8350_s15 + $0x148] sm:$0xff]  ;;  %v1833_v22 = vld [vmem:[%s8350_s15 + $0x170] sm:$0xff] }
 0x477   :  { %v4981_v26 = vpack.c.bf16 %v1833_v22, %v1828_v42 }
 0x478   :  { %v1483_v31 = vadd.f32 %v4318_v23, %v4050_v19  ;;  %v4977_v19 = vpack.c.bf16 %v1823_v10, %v1818_v9  ;;  %v1830_v23 = vld [vmem:[%s8350_s15 + $0x158] sm:$0xff]  ;;  %v4993_v9 = vpack.c.bf16 %v1863_v7, %v1858_v4  ;;  %v1865_v10 = vld [vmem:[%s8350_s15 + $0x270] sm:$0xff] }
 0x479   :  { %v5021_v30 = vpack.c.bf16 %v1835_v24, %v1830_v23  ;;  %v5033_v44 = vpack.c.bf16 %v1865_v10, %v1860_v36  ;;  %v1868_v23 = vld [vmem:[%s8350_s15 + $0x288] sm:$0xff]  ;;  %v1873_v24 = vld [vmem:[%s8350_s15 + $0x2b0] sm:$0xff] }
 0x47a   :  { %v1553_v41 = vadd.f32 %v1552_v39, %v1483_v31  ;;  %v1824_v39 = vld [vmem:[%s8350_s15 + $0x128] sm:$0xff]  ;;  %4978 = vmatprep.subr.bf16.mxu0 %v4977_v19  ;;  %v1834_v31 = vld [vmem:[%s8350_s15 + $0x178] sm:$0xff]  ;;  %v4997_v27 = vpack.c.bf16 %v1873_v24, %v1868_v23 }
 0x47b   :  { %v5019_v25 = vpack.c.bf16 %v1824_v39, %v1819_v5  ;;  %4980 = vmatpush1.bf16.msra.mxu0 %v4979_v21  ;;  %v1862_v19 = vld [vmem:[%s8350_s15 + $0x258] sm:$0xff]  ;;  %v1859_v5 = vld [vmem:[%s8350_s15 + $0x240] sm:$0xff]  ;;  %v1864_v39 = vld [vmem:[%s8350_s15 + $0x268] sm:$0xff] }
 0x47c   :  { %v6877_v53 = vmax.f32 %v1553_v41, 0.0  ;;  %4982 = vmatprep.subr.bf16.mxu0 %v4981_v26  ;;  %v5023_v41 = vpack.c.bf16 %v1834_v31, %v1829_v29  ;;  %v4995_v1 = vpack.c.bf16 %v1862_v19, %v1857_v11  ;;  %v5035_v21 = vpack.c.bf16 %v1864_v39, %v1859_v5  ;;  %v1867_v29 = vld [vmem:[%s8350_s15 + $0x280] sm:$0xff] }
 0x47d   :  { %5020 = vmatpush1.bf16.msra.mxu1 %v5019_v25  ;;  %v1870_v25 = vld [vmem:[%s8350_s15 + $0x298] sm:$0xff] }
 0x47e   :  { %1730 = vrot.lane.b32.xlu0 %v6877_v53, %s5798_s5  ;;  %1724 = vrot.lane.b32.xlu1 %v6877_v53, %s5792_s26  ;;  %v5037_v31 = vpack.c.bf16 %v1875_v28, %v1870_v25 }
 0x47f   :  { %5022 = vmatprep.subr.bf16.mxu1 %v5021_v30  ;;  %4984 = vmatpush1.bf16.msra.mxu0 %v4983_v40  ;;  %v1872_v30 = vld [vmem:[%s8350_s15 + $0x2a8] sm:$0xff]  ;;  %v1878_v40 = vld [vmem:[%s8350_s15 + $0x2d8] sm:$0xff] }
 0x480   :  { %4986 = vmatprep.subr.bf16.mxu0 %v4985_v45  ;;  %v4999_v33 = vpack.c.bf16 %v1872_v30, %v1867_v29  ;;  %v1880_v45 = vld [vmem:[%s8350_s15 + $0x2e8] sm:$0xff] }
 0x481   :  { %5024 = vmatpush1.bf16.msra.mxu1 %v5023_v41  ;;  %v1883_v41 = vld [vmem:[%s8350_s15 + $0x300] sm:$0xff]  ;;  %v1796_v30 = vld [vmem:[%s8350_s15 + $0x48] sm:$0xff] }
 0x482   :  { %1709 = vrot.lane.b32.xlu0 %v6831_v6, %s5798_s5  ;;  %5026 = vmatprep.subr.bf16.mxu1 %v5025_v48  ;;  %v5001_v47 = vpack.c.bf16 %v1883_v41, %v1878_v40  ;;  %v1885_v48 = vld [vmem:[%s8350_s15 + $0x310] sm:$0xff] }
 0x483   :  { %4988 = vmatpush1.bf16.msra.mxu0 %v4987_v51  ;;  %v5041_v51 = vpack.c.bf16 %v1885_v48, %v1880_v45 }
 0x484   :  { %4990 = vmatprep.subr.bf16.mxu0 %v4989_v34  ;;  %v1888_v34 = vld [vmem:[#allocation9 + $0x8] sm:$0xff] }
 0x485   :  { %5028 = vmatpush1.bf16.msra.mxu1 %v5027_v54  ;;  %v5003_v54 = vpack.c.bf16 %v1882_v50, %v1877_v49  ;;  %v5075_v60 = vpack.c.bf16 %v1892_v59, %v1888_v34  ;;  %v1896_v50 = vld [vmem:[#allocation9 + $0x48] sm:$0xff]  ;;  %v1806_v34 = vld [vmem:[%s8350_s15 + $0x98] sm:$0xff]  ;;  %v1895_v59 = vld [vmem:[#allocation9 + $0x40] sm:$0xff] }
 0x486   :  { %5030 = vmatprep.subr.bf16.mxu1 %v5029_v63  ;;  %v1704_v63 = vpop.permute.xlu0 %1703 }
 0x487   :  { %4992 = vmatpush1.bf16.msra.mxu0 %v4991_v57 }
 0x488   :  { %4994 = vmatprep.subr.bf16.mxu0 %v4993_v9 }
 0x489   :  { %5032 = vmatpush1.bf16.msra.mxu1 %v5031_v3 }
 0x48a   :  { %5034 = vmatprep.subr.bf16.mxu1 %v5033_v44 }
 0x48b   :  { %4996 = vmatpush1.bf16.msra.mxu0 %v4995_v1 }
 0x48c   :  { %4998 = vmatprep.subr.bf16.mxu0 %v4997_v27  ;;  %v1791_v27 = vld [vmem:[%s8350_s15 + $0x20] sm:$0xff] }
 0x48d   :  { %5036 = vmatpush1.bf16.msra.mxu1 %v5035_v21  ;;  %v1713_v21 = vsel %vm1712_vm9, %v6831_v6, %v1700_v61  ;;  %v1891_v6 = vld [vmem:[#allocation9 + $0x20] sm:$0xff]  ;;  %v5046_v41 = vpack.c.bf16 %v1796_v30, %v1791_v27  ;;  %v1836_v30 = vld [vmem:[%s8350_s15 + $0x188] sm:$0xff] }
 0x48e   :  { %5038 = vmatprep.subr.bf16.mxu1 %v5037_v31  ;;  %v1887_v31 = vld [vmem:[#allocation9] sm:$0xff] }
 0x48f   :  { %5000 = vmatpush1.bf16.msra.mxu0 %v4999_v33  ;;  %v5077_v45 = vpack.c.bf16 %v1891_v6, %v1887_v31  ;;  %v1919_v31 = vld [vmem:[#allocation9 + $0x100] sm:$0xff] }
 0x490   :  { %5002 = vmatprep.subr.bf16.mxu0 %v5001_v47  ;;  %v1923_v6 = vld [vmem:[#allocation9 + $0x120] sm:$0xff] }
 0x493   :  { %v1692_v8 = vpop.f32.mrb[12].mxu1  ;;  %5004 = vmatpush1.bf16.msra.mxu0 %v5003_v54 }
 0x494   :  { %v4368_v52 = vpop.f32.mrb[12].mxu0  ;;  %v4505_v43 = vpop.f32.mrb[13].mxu1  ;;  %5045 = vmatprep.subr.bf16.mxu0 %v5797_v14 }
 0x495   :  { %v4369_v42 = vpop.f32.mrb[13].mxu0 }
 0x496   :  { %v4370_v22 = vadd.f32 %v4369_v42, %v4368_v52 }
 0x498   :  { %v1623_v26 = vadd.f32 %v4370_v22, %v6819_v18  ;;  %v1869_v18 = vld [vmem:[%s8350_s15 + $0x290] sm:$0xff]  ;;  %v1714_v22 = vsel %vm1056_vm3, %v1713_v21, %v1704_v63  ;;  %v1826_v21 = vld [vmem:[%s8350_s15 + $0x138] sm:$0xff] }
 0x499   :  { %v5039_v38 = vpack.c.bf16 %v1874_v32, %v1869_v18 }
 0x49a   :  { %v1693_v37 = vadd.f32 %v1692_v8, %v1623_v26 }
 0x49b   :  { %5040 = vmatpush1.bf16.msra.mxu1 %v5039_v38 }
 0x49c   :  { %v1718_v46 = vmax.f32 %v1693_v37, 0.0  ;;  %5042 = vmatprep.subr.bf16.mxu1 %v5041_v51  ;;  %v1900_v51 = vld [vmem:[#allocation9 + $0x68] sm:$0xff] }
 0x49d   :  { %v5079_v63 = vpack.c.bf16 %v1900_v51, %v1896_v50 }
 0x49e   :  { %1720 = vrot.lane.b32.xlu1 %v1718_v46, %s5792_s26 }
 0x49f   :  { %5044 = vmatpush1.bf16.msra.mxu1 %v5043_v58 }
 0x4a0   :  { %5076 = vmatprep.subr.bf16.mxu1 %v5075_v60  ;;  %v1899_v60 = vld [vmem:[#allocation9 + $0x60] sm:$0xff] }
 0x4a2   :  { %1727 = vrot.lane.b32.xlu1 %v1718_v46, %s5798_s5 }
 0x4a6   :  { %1706 = vrot.lane.b32.xlu1 %v1697_v35, %s5798_s5 }
 0x4f0   :  { %v7090_v57 = vpop.permute.xlu0 %1730  ;;  %v1725_v43 = vpop.permute.xlu1 %1724 }
 0x4f1   :  { %v1737_v62 = vrot.slane %v7090_v57, 7  ;;  %v1746_v4 = vrot.slane %v7090_v57, 6  ;;  %v1754_v8 = vrot.slane %v7090_v57, 5  ;;  %v1762_v56 = vrot.slane %v7090_v57, 4 }
 0x4f4   :  { %v7093_v2 = vpop.permute.xlu0 %1709 }
 0x4f5   :  { %v1742_v3 = vrot.slane %v7093_v2, 7  ;;  %v1770_v7 = vsel %vm399_vm0, %v7093_v2, %v1737_v62  ;;  %v1750_v36 = vrot.slane %v7093_v2, 6  ;;  %v1758_v10 = vrot.slane %v7093_v2, 5 }
 0x4f6   :  { %v1766_v46 = vrot.slane %v7093_v2, 4 }
 0x4f7   :  { %v1772_v20 = vsel %vm402_vm1, %v1770_v7, %v1742_v3  ;;  %v5049_v3 = vpack.c.bf16 %v1806_v34, %v1801_v55  ;;  %v1904_v7 = vld [vmem:[#allocation9 + $0x88] sm:$0xff]  ;;  %v1935_v34 = vld [vmem:[#allocation9 + $0x180] sm:$0xff] }
 0x4f8   :  { %v1774_v35 = vsel %vm405_vm2, %v1772_v20, %v1746_v4  ;;  %v7151_v57 = vsel %vm399_vm0, %v1762_v56, %v1766_v46  ;;  %v5081_v4 = vpack.c.bf16 %v1899_v60, %v1895_v59  ;;  %v1811_v20 = vld [vmem:[%s8350_s15 + $0xc0] sm:$0xff]  ;;  %v1856_v56 = vld [vmem:[%s8350_s15 + $0x228] sm:$0xff] }
 0x4f9   :  { %v1776_v9 = vsel %vm1092_vm4, %v1774_v35, %v1750_v36  ;;  %v1816_v35 = vld [vmem:[%s8350_s15 + $0xe8] sm:$0xff]  ;;  %v1931_v46 = vld [vmem:[#allocation9 + $0x160] sm:$0xff] }
 0x4fa   :  { %v1778_v11 = vsel %vm1095_vm5, %v1776_v9, %v1750_v36  ;;  %v1908_v36 = vld [vmem:[#allocation9 + $0xa8] sm:$0xff]  ;;  %v1907_v9 = vld [vmem:[#allocation9 + $0xa0] sm:$0xff] }
 0x4fb   :  { %v1781_v19 = vsel %vm1779_vm7, %v1778_v11, %v1754_v8  ;;  %v1903_v8 = vld [vmem:[#allocation9 + $0x80] sm:$0xff]  ;;  %v1912_v11 = vld [vmem:[#allocation9 + $0xc8] sm:$0xff] }
 0x4fc   :  { %v7108_v52 = vsel %vm1782_vm8, %v1781_v19, %v1758_v10  ;;  %v1916_v19 = vld [vmem:[#allocation9 + $0xe8] sm:$0xff]  ;;  %v1939_v59 = vld [vmem:[#allocation9 + $0x1a0] sm:$0xff] }
 0x4fd   :  { %4054 = vmatprep.mubr.msk.f32.mxu0 %vm1712_vm9, %v7108_v52  ;;  %4056 = vmatprep.mubr.msk.f32.mxu1 %vm1712_vm9, %v7108_v52  ;;  %v2334_v10 = vrot.slane %v7108_v52, 7  ;;  %v1944_v60 = vld [vmem:[#allocation9 + $0x1c8] sm:$0xff] }
 0x510   :  { %v1721_v44 = vpop.permute.xlu1 %1720 }
 0x511   :  { %v1732_v1 = vsel %vm1712_vm9, %v6877_v53, %v1721_v44  ;;  %v2337_v44 = vrot.slane %v7151_v57, 7 }
 0x512   :  { %v1733_v39 = vsel %vm1056_vm3, %v1732_v1, %v1725_v43  ;;  %v5083_v43 = vpack.c.bf16 %v1908_v36, %v1904_v7  ;;  %v5052_v1 = vpack.c.bf16 %v1816_v35, %v1811_v20  ;;  %v1943_v7 = vld [vmem:[#allocation9 + $0x1c0] sm:$0xff]  ;;  %v1952_v20 = vld [vmem:[#allocation9 + $0x208] sm:$0xff] }
 0x513   :  { %v1947_v36 = vld [vmem:[#allocation9 + $0x1e0] sm:$0xff]  ;;  %v1956_v35 = vld [vmem:[#allocation9 + $0x228] sm:$0xff] }
 0x514   :  { %v1728_v5 = vpop.permute.xlu1 %1727 }
 0x515   :  { %v1734_v42 = vsel %vm1715_vm10, %v1733_v39, %v1728_v5  ;;  %v5085_v5 = vpack.c.bf16 %v1907_v9, %v1903_v8  ;;  %v1821_v39 = vld [vmem:[%s8350_s15 + $0x110] sm:$0xff]  ;;  %v5105_v9 = vpack.c.bf16 %v1947_v36, %v1943_v7  ;;  %v1987_v36 = vld [vmem:[%s8352_s17 + $0xa0] sm:$0xff] }
 0x516   :  { %v1736_v24 = vrot.slane %v1734_v42, 7  ;;  %v1745_v28 = vrot.slane %v1734_v42, 6  ;;  %v1761_v32 = vrot.slane %v1734_v42, 4  ;;  %v1753_v38 = vrot.slane %v1734_v42, 5 }
 0x517   :  { %v5087_v42 = vpack.c.bf16 %v1916_v19, %v1912_v11  ;;  %v5055_v27 = vpack.c.bf16 %v1826_v21, %v1821_v39  ;;  %v5107_v11 = vpack.c.bf16 %v1956_v35, %v1952_v20  ;;  %v1876_v19 = vld [vmem:[%s8350_s15 + $0x2c8] sm:$0xff]  ;;  %v1881_v21 = vld [vmem:[%s8350_s15 + $0x2f0] sm:$0xff]  ;;  %v1918_v35 = vld [vmem:[#allocation9 + $0xf8] sm:$0xff] }
 0x518   :  { %v1707_v23 = vpop.permute.xlu1 %1706  ;;  %v1992_v20 = vld [vmem:[%s8352_s17 + $0xc8] sm:$0xff] }
 0x519   :  { %v1716_v25 = vsel %vm1715_vm10, %v1714_v22, %v1707_v23  ;;  %v1911_v22 = vld [vmem:[#allocation9 + $0xc0] sm:$0xff] }
 0x51a   :  { %v1741_v26 = vrot.slane %v1716_v25, 7  ;;  %v1765_v53 = vrot.slane %v1716_v25, 4  ;;  %v1769_v29 = vsel %vm399_vm0, %v1716_v25, %v1736_v24  ;;  %v1749_v33 = vrot.slane %v1716_v25, 6  ;;  %v1915_v23 = vld [vmem:[#allocation9 + $0xe0] sm:$0xff] }
 0x51b   :  { %v1757_v47 = vrot.slane %v1716_v25, 5  ;;  %v2338_v24 = vsel %vm399_vm0, %v2334_v10, %v2337_v44  ;;  %v1920_v25 = vld [vmem:[#allocation9 + $0x108] sm:$0xff]  ;;  %v1955_v44 = vld [vmem:[#allocation9 + $0x220] sm:$0xff] }
 0x51c   :  { %v1771_v18 = vsel %vm402_vm1, %v1769_v29, %v1741_v26  ;;  %v7133_v49 = vsel %vm399_vm0, %v1761_v32, %v1765_v53  ;;  %v1924_v26 = vld [vmem:[#allocation9 + $0x128] sm:$0xff]  ;;  %v1831_v53 = vld [vmem:[%s8350_s15 + $0x160] sm:$0xff] }
 0x51d   :  { %v1773_v37 = vsel %vm405_vm2, %v1771_v18, %v1745_v28  ;;  %v2335_v62 = vrot.slane %v7133_v49, 7  ;;  %v5089_v28 = vpack.c.bf16 %v1915_v23, %v1911_v22  ;;  %v5091_v29 = vpack.c.bf16 %v1924_v26, %v1920_v25  ;;  %v1932_v18 = vld [vmem:[#allocation9 + $0x168] sm:$0xff]  ;;  %v1886_v22 = vld [vmem:[%s8350_s15 + $0x318] sm:$0xff]  ;;  %v1963_v25 = vld [vmem:[#allocation9 + $0x260] sm:$0xff] }
 0x51e   :  { %v1775_v40 = vsel %vm1092_vm4, %v1773_v37, %v1749_v33  ;;  %v5058_v32 = vpack.c.bf16 %v1836_v30, %v1831_v53  ;;  %v5093_v37 = vpack.c.bf16 %v1923_v6, %v1919_v31  ;;  %v1890_v26 = vld [vmem:[#allocation9 + $0x18] sm:$0xff]  ;;  %v1973_v53 = vld [vmem:[%s8352_s17 + $0x30] sm:$0xff] }
 0x51f   :  { %v1777_v48 = vsel %vm1095_vm5, %v1775_v40, %v1749_v33  ;;  %v1928_v33 = vld [vmem:[#allocation9 + $0x148] sm:$0xff]  ;;  %v1889_v6 = vld [vmem:[#allocation9 + $0x10] sm:$0xff] }
 0x520   :  { %v1780_v54 = vsel %vm1779_vm7, %v1777_v48, %v1753_v38  ;;  %v1841_v38 = vld [vmem:[%s8350_s15 + $0x1b0] sm:$0xff]  ;;  %v5095_v40 = vpack.c.bf16 %v1932_v18, %v1928_v33  ;;  %v1940_v48 = vld [vmem:[#allocation9 + $0x1a8] sm:$0xff] }
 0x521   :  { %v7141_v58 = vsel %vm1782_vm8, %v1780_v54, %v1757_v47  ;;  %v1936_v47 = vld [vmem:[#allocation9 + $0x188] sm:$0xff]  ;;  %v1851_v54 = vld [vmem:[%s8350_s15 + $0x200] sm:$0xff]  ;;  %v1893_v33 = vld [vmem:[#allocation9 + $0x30] sm:$0xff] }
 0x522   :  { %2448 = vmatmul.mubr.f32.vlgmr.msra.gmra.mrb[14].mxu0 %v7141_v58  ;;  %2525 = vmatmul.mubr.f32.vlgmr.msra.gmra.mrb[14].mxu1 %v7141_v58  ;;  %v2333_v61 = vrot.slane %v7141_v58, 7  ;;  %v5099_v55 = vpack.c.bf16 %v1940_v48, %v1936_v47  ;;  %v1901_v47 = vld [vmem:[#allocation9 + $0x70] sm:$0xff] }
 0x523   :  { %5047 = vmatpush1.bf16.msra.mxu0 %v5046_v41  ;;  %5078 = vmatpush1.bf16.msra.mxu1 %v5077_v45  ;;  %v1846_v41 = vld [vmem:[%s8350_s15 + $0x1d8] sm:$0xff]  ;;  %v1927_v45 = vld [vmem:[#allocation9 + $0x140] sm:$0xff] }
 0x524   :  { %4055 = vmatprep.mubr.msk.f32.mxu0 %vm1712_vm9, %v7151_v57  ;;  %4057 = vmatprep.mubr.msk.f32.mxu1 %vm1712_vm9, %v7151_v57  ;;  %v2336_v2 = vsel %vm399_vm0, %v2333_v61, %v2335_v62  ;;  %v5061_v50 = vpack.c.bf16 %v1846_v41, %v1841_v38  ;;  %v5097_v51 = vpack.c.bf16 %v1931_v46, %v1927_v45  ;;  %v1972_v38 = vld [vmem:[%s8352_s17 + $0x28] sm:$0xff]  ;;  %v1978_v41 = vld [vmem:[%s8352_s17 + $0x58] sm:$0xff]  ;;  %v1897_v46 = vld [vmem:[#allocation9 + $0x50] sm:$0xff] }
 0x525   :  { %2339 = vrot.lane.b32.xlu1 %v2333_v61, %s5792_s26  ;;  %5048 = vmatprep.subr.bf16.mxu0 %v5797_v14  ;;  %v1948_v61 = vld [vmem:[#allocation9 + $0x1e8] sm:$0xff]  ;;  %v5101_v62 = vpack.c.bf16 %v1939_v59, %v1935_v34  ;;  %v5117_v45 = vpack.c.bf16 %v1893_v33, %v1889_v6  ;;  %v1910_v34 = vld [vmem:[#allocation9 + $0xb8] sm:$0xff] }
 0x526   :  { %5080 = vmatprep.subr.bf16.mxu1 %v5079_v63  ;;  %2343 = vrot.lane.b32.xlu0 %v2336_v2, %s5792_s26  ;;  %v5064_v63 = vpack.c.bf16 %v1856_v56, %v1851_v54  ;;  %v1861_v2 = vld [vmem:[%s8350_s15 + $0x250] sm:$0xff]  ;;  %v1982_v56 = vld [vmem:[%s8352_s17 + $0x78] sm:$0xff]  ;;  %v1988_v59 = vld [vmem:[%s8352_s17 + $0xa8] sm:$0xff] }
 0x527   :  { %2454 = vmatmul.mubr.f32.gmra.mrb[16].mxu0 %v7133_v49  ;;  %2531 = vmatmul.mubr.f32.gmra.mrb[16].mxu1 %v7133_v49  ;;  %v1934_v6 = vld [vmem:[#allocation9 + $0x178] sm:$0xff] }
 0x528   :  { %5050 = vmatpush1.bf16.msra.mxu0 %v5049_v3  ;;  %5082 = vmatpush1.bf16.msra.mxu1 %v5081_v4  ;;  %v5103_v3 = vpack.c.bf16 %v1948_v61, %v1944_v60  ;;  %v1866_v4 = vld [vmem:[%s8350_s15 + $0x278] sm:$0xff]  ;;  %v1993_v60 = vld [vmem:[%s8352_s17 + $0xd0] sm:$0xff]  ;;  %v5121_v61 = vpack.c.bf16 %v1901_v47, %v1897_v46 }
 0x529   :  { %4058 = vmatprep.mubr.msk.f32.mxu0 %vm1712_vm9, %v7108_v52  ;;  %4060 = vmatprep.mubr.msk.f32.mxu1 %vm1712_vm9, %v7108_v52  ;;  %v5067_v8 = vpack.c.bf16 %v1866_v4, %v1861_v2  ;;  %v1914_v4 = vld [vmem:[#allocation9 + $0xd8] sm:$0xff]  ;;  %v5163_v7 = vpack.c.bf16 %v1993_v60, %v1988_v59  ;;  %v2017_v46 = vld [vmem:[%s8352_s17 + $0x190] sm:$0xff] }
 0x52a   :  { %2341 = vrot.lane.b32.xlu1 %v2334_v10, %s5792_s26  ;;  %5051 = vmatprep.subr.bf16.mxu0 %v5797_v14  ;;  %v1871_v10 = vld [vmem:[%s8350_s15 + $0x2a0] sm:$0xff]  ;;  %v2018_v33 = vld [vmem:[%s8352_s17 + $0x198] sm:$0xff] }
 0x52b   :  { %5084 = vmatprep.subr.bf16.mxu1 %v5083_v43  ;;  %2345 = vrot.lane.b32.xlu0 %v2338_v24, %s5792_s26  ;;  %v1951_v43 = vld [vmem:[#allocation9 + $0x200] sm:$0xff]  ;;  %v5070_v39 = vpack.c.bf16 %v1876_v19, %v1871_v10  ;;  %v1917_v19 = vld [vmem:[#allocation9 + $0xf0] sm:$0xff]  ;;  %v2022_v47 = vld [vmem:[%s8352_s17 + $0x1b8] sm:$0xff] }
 0x52c   :  { %5053 = vmatpush1.bf16.msra.mxu0 %v5052_v1  ;;  %5086 = vmatpush1.bf16.msra.mxu1 %v5085_v5  ;;  %v1960_v1 = vld [vmem:[#allocation9 + $0x248] sm:$0xff]  ;;  %v1959_v24 = vld [vmem:[#allocation9 + $0x240] sm:$0xff]  ;;  %v1946_v60 = vld [vmem:[#allocation9 + $0x1d8] sm:$0xff] }
 0x52d   :  { %5054 = vmatprep.subr.bf16.mxu0 %v5797_v14  ;;  %5088 = vmatprep.subr.bf16.mxu1 %v5087_v42  ;;  %v1964_v5 = vld [vmem:[#allocation9 + $0x268] sm:$0xff]  ;;  %v5109_v42 = vpack.c.bf16 %v1955_v44, %v1951_v43  ;;  %v5113_v30 = vpack.c.bf16 %v1963_v25, %v1959_v24  ;;  %v5165_v43 = vpack.c.bf16 %v1992_v20, %v1987_v36  ;;  %v1921_v25 = vld [vmem:[#allocation9 + $0x110] sm:$0xff] }
 0x52e   :  { %v5111_v23 = vpack.c.bf16 %v1964_v5, %v1960_v1  ;;  %v5127_v44 = vpack.c.bf16 %v1918_v35, %v1914_v4  ;;  %v1922_v1 = vld [vmem:[#allocation9 + $0x118] sm:$0xff]  ;;  %v2043_v4 = vld [vmem:[%s8352_s17 + $0x260] sm:$0xff]  ;;  %v1945_v36 = vld [vmem:[#allocation9 + $0x1d0] sm:$0xff] }
 0x52f   :  { %v1949_v20 = vld [vmem:[#allocation9 + $0x1f0] sm:$0xff] }
 0x530   :  { %5056 = vmatpush1.bf16.msra.mxu0 %v5055_v27  ;;  %5090 = vmatpush1.bf16.msra.mxu1 %v5089_v28  ;;  %v1894_v27 = vld [vmem:[#allocation9 + $0x38] sm:$0xff]  ;;  %v1968_v28 = vld [vmem:[%s8352_s17 + $0x8] sm:$0xff] }
 0x531   :  { %5057 = vmatprep.subr.bf16.mxu0 %v5797_v14  ;;  %5092 = vmatprep.subr.bf16.mxu1 %v5091_v29  ;;  %v5073_v29 = vpack.c.bf16 %v1886_v22, %v1881_v21  ;;  %v5115_v31 = vpack.c.bf16 %v1894_v27, %v1890_v26  ;;  %v5155_v18 = vpack.c.bf16 %v1973_v53, %v1968_v28  ;;  %v1926_v21 = vld [vmem:[#allocation9 + $0x138] sm:$0xff]  ;;  %v2008_v22 = vld [vmem:[%s8352_s17 + $0x148] sm:$0xff]  ;;  %v1925_v26 = vld [vmem:[#allocation9 + $0x130] sm:$0xff] }
 0x532   :  { %v5131_v28 = vpack.c.bf16 %v1926_v21, %v1922_v1  ;;  %v1930_v53 = vld [vmem:[#allocation9 + $0x158] sm:$0xff]  ;;  %v2053_v1 = vld [vmem:[%s8352_s17 + $0x2b0] sm:$0xff] }
 0x534   :  { %5059 = vmatpush1.bf16.msra.mxu0 %v5058_v32  ;;  %5094 = vmatpush1.bf16.msra.mxu1 %v5093_v37  ;;  %v1898_v32 = vld [vmem:[#allocation9 + $0x58] sm:$0xff]  ;;  %v1967_v37 = vld [vmem:[%s8352_s17] sm:$0xff] }
 0x535   :  { %5060 = vmatprep.subr.bf16.mxu0 %v5797_v14  ;;  %5096 = vmatprep.subr.bf16.mxu1 %v5095_v40  ;;  %v1902_v40 = vld [vmem:[#allocation9 + $0x78] sm:$0xff]  ;;  %v5157_v48 = vpack.c.bf16 %v1972_v38, %v1967_v37  ;;  %v1929_v37 = vld [vmem:[#allocation9 + $0x150] sm:$0xff] }
 0x536   :  { %v1933_v38 = vld [vmem:[#allocation9 + $0x170] sm:$0xff] }
 0x538   :  { %5062 = vmatpush1.bf16.msra.mxu0 %v5061_v50  ;;  %5098 = vmatpush1.bf16.msra.mxu1 %v5097_v51  ;;  %v5119_v50 = vpack.c.bf16 %v1902_v40, %v1898_v32  ;;  %v1906_v51 = vld [vmem:[#allocation9 + $0x98] sm:$0xff]  ;;  %v5133_v32 = vpack.c.bf16 %v1925_v26, %v1921_v25  ;;  %v2047_v25 = vld [vmem:[%s8352_s17 + $0x280] sm:$0xff]  ;;  %v2052_v26 = vld [vmem:[%s8352_s17 + $0x2a8] sm:$0xff] }
 0x539   :  { %5063 = vmatprep.subr.bf16.mxu0 %v5797_v14  ;;  %5100 = vmatprep.subr.bf16.mxu1 %v5099_v55  ;;  %v1977_v55 = vld [vmem:[%s8352_s17 + $0x50] sm:$0xff] }
 0x53a   :  { %v5161_v2 = vpack.c.bf16 %v1982_v56, %v1977_v55  ;;  %v1937_v55 = vld [vmem:[#allocation9 + $0x190] sm:$0xff] }
 0x53b   :  { %v1941_v56 = vld [vmem:[#allocation9 + $0x1b0] sm:$0xff] }
 0x53c   :  { %5065 = vmatpush1.bf16.msra.mxu0 %v5064_v63  ;;  %5102 = vmatpush1.bf16.msra.mxu1 %v5101_v62  ;;  %v1905_v63 = vld [vmem:[#allocation9 + $0x90] sm:$0xff] }
 0x53d   :  { %5066 = vmatprep.subr.bf16.mxu0 %v5797_v14  ;;  %5104 = vmatprep.subr.bf16.mxu1 %v5103_v3  ;;  %v1909_v62 = vld [vmem:[#allocation9 + $0xb0] sm:$0xff]  ;;  %v5123_v3 = vpack.c.bf16 %v1910_v34, %v1906_v51  ;;  %v5177_v34 = vpack.c.bf16 %v2022_v47, %v2017_v46 }
 0x53e   :  { %v5125_v10 = vpack.c.bf16 %v1909_v62, %v1905_v63  ;;  %v2033_v51 = vld [vmem:[%s8352_s17 + $0x210] sm:$0xff]  ;;  %v2027_v63 = vld [vmem:[%s8352_s17 + $0x1e0] sm:$0xff]  ;;  %v2032_v62 = vld [vmem:[%s8352_s17 + $0x208] sm:$0xff] }
 0x53f   :  { %v5181_v35 = vpack.c.bf16 %v2032_v62, %v2027_v63  ;;  %v1979_v62 = vld [vmem:[%s8352_s17 + $0x60] sm:$0xff] }
 0x540   :  { %5068 = vmatpush1.bf16.msra.mxu0 %v5067_v8  ;;  %5106 = vmatpush1.bf16.msra.mxu1 %v5105_v9  ;;  %v1998_v8 = vld [vmem:[%s8352_s17 + $0xf8] sm:$0xff]  ;;  %v2003_v9 = vld [vmem:[%s8352_s17 + $0x120] sm:$0xff] }
 0x541   :  { %5069 = vmatprep.subr.bf16.mxu0 %v5797_v14  ;;  %5108 = vmatprep.subr.bf16.mxu1 %v5107_v11  ;;  %v1913_v11 = vld [vmem:[#allocation9 + $0xd0] sm:$0xff]  ;;  %v5167_v5 = vpack.c.bf16 %v2003_v9, %v1998_v8  ;;  %v1954_v9 = vld [vmem:[#allocation9 + $0x218] sm:$0xff] }
 0x542   :  { %v5129_v24 = vpack.c.bf16 %v1917_v19, %v1913_v11  ;;  %v2037_v11 = vld [vmem:[%s8352_s17 + $0x230] sm:$0xff]  ;;  %v2042_v19 = vld [vmem:[%s8352_s17 + $0x258] sm:$0xff] }
 0x543   :  { %v5185_v21 = vpack.c.bf16 %v2042_v19, %v2037_v11  ;;  %v1989_v19 = vld [vmem:[%s8352_s17 + $0xb0] sm:$0xff] }
 0x544   :  { %5071 = vmatpush1.bf16.msra.mxu0 %v5070_v39  ;;  %5110 = vmatpush1.bf16.msra.mxu1 %v5109_v42  ;;  %v1997_v39 = vld [vmem:[%s8352_s17 + $0xf0] sm:$0xff]  ;;  %v2002_v42 = vld [vmem:[%s8352_s17 + $0x118] sm:$0xff] }
 0x545   :  { %5072 = vmatprep.subr.bf16.mxu0 %v5797_v14  ;;  %5112 = vmatprep.subr.bf16.mxu1 %v5111_v23  ;;  %v1983_v14 = vld [vmem:[%s8352_s17 + $0x80] sm:$0xff]  ;;  %v2013_v23 = vld [vmem:[%s8352_s17 + $0x170] sm:$0xff]  ;;  %v5169_v27 = vpack.c.bf16 %v2002_v42, %v1997_v39 }
 0x546   :  { %v5159_v54 = vpack.c.bf16 %v1983_v14, %v1978_v41  ;;  %v5135_v41 = vpack.c.bf16 %v1934_v6, %v1930_v53  ;;  %v1938_v14 = vld [vmem:[#allocation9 + $0x198] sm:$0xff]  ;;  %v1953_v39 = vld [vmem:[#allocation9 + $0x210] sm:$0xff]  ;;  %v2063_v53 = vld [vmem:[%s8352_s17 + $0x300] sm:$0xff]  ;;  %v5189_v6 = vpack.c.bf16 %v2052_v26, %v2047_v25 }
 0x547   :  { %v1957_v42 = vld [vmem:[#allocation9 + $0x230] sm:$0xff]  ;;  %v1999_v26 = vld [vmem:[%s8352_s17 + $0x100] sm:$0xff] }
 0x548   :  { %5074 = vmatpush1.bf16.msra.mxu0 %v5073_v29  ;;  %5114 = vmatpush1.bf16.msra.mxu1 %v5113_v30  ;;  %v5171_v29 = vpack.c.bf16 %v2013_v23, %v2008_v22  ;;  %v2007_v30 = vld [vmem:[%s8352_s17 + $0x140] sm:$0xff]  ;;  %v1962_v23 = vld [vmem:[#allocation9 + $0x258] sm:$0xff] }
 0x549   :  { %5116 = vmatprep.subr.bf16.mxu0 %v5115_v31  ;;  %5156 = vmatprep.subr.bf16.mxu1 %v5155_v18  ;;  %v2012_v31 = vld [vmem:[%s8352_s17 + $0x168] sm:$0xff]  ;;  %v2023_v18 = vld [vmem:[%s8352_s17 + $0x1c0] sm:$0xff] }
 0x54a   :  { %v5173_v40 = vpack.c.bf16 %v2012_v31, %v2007_v30  ;;  %v1961_v30 = vld [vmem:[#allocation9 + $0x250] sm:$0xff] }
 0x54b   :  { %2602 = vmatmul.mubr.f32.vlgmr.msra.gmra.mrb[18].mxu0 %v7141_v58  ;;  %2698 = vmatmul.mubr.f32.vlgmr.msra.gmra.mrb[18].mxu1 %v7141_v58  ;;  %v1965_v31 = vld [vmem:[#allocation9 + $0x270] sm:$0xff] }
 0x54c   :  { %4059 = vmatprep.mubr.msk.f32.mxu0 %vm1712_vm9, %v7151_v57  ;;  %4061 = vmatprep.mubr.msk.f32.mxu1 %vm1712_vm9, %v7151_v57 }
 0x54d   :  { %5118 = vmatpush1.bf16.msra.mxu0 %v5117_v45  ;;  %5158 = vmatpush1.bf16.msra.mxu1 %v5157_v48  ;;  %v5175_v45 = vpack.c.bf16 %v2023_v18, %v2018_v33  ;;  %v1942_v48 = vld [vmem:[#allocation9 + $0x1b8] sm:$0xff] }
 0x54e   :  { %5120 = vmatprep.subr.bf16.mxu0 %v5119_v50  ;;  %5160 = vmatprep.subr.bf16.mxu1 %v5159_v54  ;;  %v2028_v50 = vld [vmem:[%s8352_s17 + $0x1e8] sm:$0xff]  ;;  %v5137_v54 = vpack.c.bf16 %v1933_v38, %v1929_v37  ;;  %v5139_v59 = vpack.c.bf16 %v1942_v48, %v1938_v14  ;;  %v1970_v18 = vld [vmem:[%s8352_s17 + $0x18] sm:$0xff]  ;;  %v2057_v37 = vld [vmem:[%s8352_s17 + $0x2d0] sm:$0xff] }
 0x54f   :  { %2607 = vmatmul.mubr.f32.gmra.mrb[20].mxu0 %v7133_v49  ;;  %2704 = vmatmul.mubr.f32.gmra.mrb[20].mxu1 %v7133_v49  ;;  %v2062_v38 = vld [vmem:[%s8352_s17 + $0x2f8] sm:$0xff]  ;;  %v2073_v14 = vld [vmem:[%s8352_s17 + $0x350] sm:$0xff] }
 0x550   :  { %4062 = vmatprep.mubr.msk.f32.mxu0 %vm1712_vm9, %v7108_v52  ;;  %v5193_v46 = vpack.c.bf16 %v2062_v38, %v2057_v37  ;;  %v1969_v48 = vld [vmem:[%s8352_s17 + $0x10] sm:$0xff] }
 0x551   :  { %5122 = vmatpush1.bf16.msra.mxu0 %v5121_v61  ;;  %5162 = vmatpush1.bf16.msra.mxu1 %v5161_v2  ;;  %v5179_v61 = vpack.c.bf16 %v2033_v51, %v2028_v50  ;;  %v1950_v2 = vld [vmem:[#allocation9 + $0x1f8] sm:$0xff]  ;;  %v1980_v51 = vld [vmem:[%s8352_s17 + $0x68] sm:$0xff]  ;;  %v2009_v38 = vld [vmem:[%s8352_s17 + $0x150] sm:$0xff] }
 0x552   :  { %5124 = vmatprep.subr.bf16.mxu0 %v5123_v3  ;;  %5164 = vmatprep.subr.bf16.mxu1 %v5163_v7  ;;  %v2038_v3 = vld [vmem:[%s8352_s17 + $0x238] sm:$0xff]  ;;  %v5141_v7 = vpack.c.bf16 %v1941_v56, %v1937_v55  ;;  %v5143_v8 = vpack.c.bf16 %v1950_v2, %v1946_v60  ;;  %v1985_v55 = vld [vmem:[%s8352_s17 + $0x90] sm:$0xff]  ;;  %v2067_v56 = vld [vmem:[%s8352_s17 + $0x320] sm:$0xff] }
 0x553   :  { %v1974_v50 = vld [vmem:[%s8352_s17 + $0x38] sm:$0xff]  ;;  %v2083_v60 = vld [vmem:[%s8352_s17 + $0x3a0] sm:$0xff]  ;;  %v5239_v63 = vpack.c.bf16 %v1985_v55, %v1980_v51  ;;  %v1984_v2 = vld [vmem:[%s8352_s17 + $0x88] sm:$0xff] }
 0x554   :  { %v2123_v51 = vld [vmem:[%s8352_s17 + $0x4e0] sm:$0xff] }
 0x555   :  { %5126 = vmatpush1.bf16.msra.mxu0 %v5125_v10  ;;  %5166 = vmatpush1.bf16.msra.mxu1 %v5165_v43  ;;  %v5183_v10 = vpack.c.bf16 %v2043_v4, %v2038_v3  ;;  %v1958_v43 = vld [vmem:[#allocation9 + $0x238] sm:$0xff] }
 0x556   :  { %5128 = vmatprep.subr.bf16.mxu0 %v5127_v44  ;;  %5168 = vmatprep.subr.bf16.mxu1 %v5167_v5  ;;  %v2048_v44 = vld [vmem:[%s8352_s17 + $0x288] sm:$0xff]  ;;  %v5145_v5 = vpack.c.bf16 %v1949_v20, %v1945_v36  ;;  %v5147_v22 = vpack.c.bf16 %v1958_v43, %v1954_v9  ;;  %v1990_v3 = vld [vmem:[%s8352_s17 + $0xb8] sm:$0xff]  ;;  %v2077_v20 = vld [vmem:[%s8352_s17 + $0x370] sm:$0xff] }
 0x557   :  { %v2093_v9 = vld [vmem:[%s8352_s17 + $0x3f0] sm:$0xff]  ;;  %v1994_v43 = vld [vmem:[%s8352_s17 + $0xd8] sm:$0xff] }
 0x559   :  { %5130 = vmatpush1.bf16.msra.mxu0 %v5129_v24  ;;  %5170 = vmatpush1.bf16.msra.mxu1 %v5169_v27  ;;  %v5187_v24 = vpack.c.bf16 %v2053_v1, %v2048_v44  ;;  %v1966_v27 = vld [vmem:[#allocation9 + $0x278] sm:$0xff]  ;;  %v2000_v44 = vld [vmem:[%s8352_s17 + $0x108] sm:$0xff] }
 0x55a   :  { %5132 = vmatprep.subr.bf16.mxu0 %v5131_v28  ;;  %5172 = vmatprep.subr.bf16.mxu1 %v5171_v29  ;;  %v2058_v28 = vld [vmem:[%s8352_s17 + $0x2d8] sm:$0xff]  ;;  %v5149_v29 = vpack.c.bf16 %v1957_v42, %v1953_v39  ;;  %v5151_v33 = vpack.c.bf16 %v1966_v27, %v1962_v23  ;;  %v2087_v42 = vld [vmem:[%s8352_s17 + $0x3c0] sm:$0xff]  ;;  %v2004_v27 = vld [vmem:[%s8352_s17 + $0x128] sm:$0xff] }
 0x55b   :  { %v2103_v23 = vld [vmem:[%s8352_s17 + $0x440] sm:$0xff] }
 0x55d   :  { %5134 = vmatpush1.bf16.msra.mxu0 %v5133_v32  ;;  %5174 = vmatpush1.bf16.msra.mxu1 %v5173_v40  ;;  %v5191_v32 = vpack.c.bf16 %v2063_v53, %v2058_v28  ;;  %v1975_v40 = vld [vmem:[%s8352_s17 + $0x40] sm:$0xff]  ;;  %v2010_v28 = vld [vmem:[%s8352_s17 + $0x158] sm:$0xff] }
 0x55e   :  { %5136 = vmatprep.subr.bf16.mxu0 %v5135_v41  ;;  %5176 = vmatprep.subr.bf16.mxu1 %v5175_v45  ;;  %v2068_v41 = vld [vmem:[%s8352_s17 + $0x328] sm:$0xff]  ;;  %v5153_v45 = vpack.c.bf16 %v1965_v31, %v1961_v30  ;;  %v5235_v47 = vpack.c.bf16 %v1975_v40, %v1970_v18  ;;  %v2097_v31 = vld [vmem:[%s8352_s17 + $0x410] sm:$0xff]  ;;  %v2014_v40 = vld [vmem:[%s8352_s17 + $0x178] sm:$0xff] }
 0x55f   :  { %v2113_v18 = vld [vmem:[%s8352_s17 + $0x490] sm:$0xff] }
 0x561   :  { %5138 = vmatpush1.bf16.msra.mxu0 %v5137_v54  ;;  %5178 = vmatpush1.bf16.msra.mxu1 %v5177_v34  ;;  %v5195_v54 = vpack.c.bf16 %v2073_v14, %v2068_v41  ;;  %v2072_v34 = vld [vmem:[%s8352_s17 + $0x348] sm:$0xff] }
 0x562   :  { %5140 = vmatprep.subr.bf16.mxu0 %v5139_v59  ;;  %5180 = vmatprep.subr.bf16.mxu1 %v5179_v61  ;;  %v2078_v59 = vld [vmem:[%s8352_s17 + $0x378] sm:$0xff]  ;;  %v5237_v61 = vpack.c.bf16 %v1974_v50, %v1969_v48  ;;  %v5197_v4 = vpack.c.bf16 %v2072_v34, %v2067_v56  ;;  %v2020_v41 = vld [vmem:[%s8352_s17 + $0x1a8] sm:$0xff]  ;;  %v2019_v56 = vld [vmem:[%s8352_s17 + $0x1a0] sm:$0xff] }
 0x563   :  { %v5199_v36 = vpack.c.bf16 %v2083_v60, %v2078_v59  ;;  %v2112_v48 = vld [vmem:[%s8352_s17 + $0x488] sm:$0xff]  ;;  %v2118_v50 = vld [vmem:[%s8352_s17 + $0x4b8] sm:$0xff] }
 0x564   :  { %v2024_v34 = vld [vmem:[%s8352_s17 + $0x1c8] sm:$0xff]  ;;  %v2030_v59 = vld [vmem:[%s8352_s17 + $0x1f8] sm:$0xff] }
 0x565   :  { %5142 = vmatpush1.bf16.msra.mxu0 %v5141_v7  ;;  %5182 = vmatpush1.bf16.msra.mxu1 %v5181_v35  ;;  %v1995_v7 = vld [vmem:[%s8352_s17 + $0xe0] sm:$0xff]  ;;  %v2082_v35 = vld [vmem:[%s8352_s17 + $0x398] sm:$0xff] }
 0x566   :  { %5144 = vmatprep.subr.bf16.mxu0 %v5143_v8  ;;  %5184 = vmatprep.subr.bf16.mxu1 %v5183_v10  ;;  %v2088_v8 = vld [vmem:[%s8352_s17 + $0x3c8] sm:$0xff]  ;;  %v5241_v10 = vpack.c.bf16 %v1984_v2, %v1979_v62  ;;  %v5243_v11 = vpack.c.bf16 %v1995_v7, %v1990_v3  ;;  %v5201_v1 = vpack.c.bf16 %v2082_v35, %v2077_v20  ;;  %v2117_v62 = vld [vmem:[%s8352_s17 + $0x4b0] sm:$0xff]  ;;  %v2122_v2 = vld [vmem:[%s8352_s17 + $0x4d8] sm:$0xff] }
 0x567   :  { %v5203_v39 = vpack.c.bf16 %v2093_v9, %v2088_v8  ;;  %v2128_v3 = vld [vmem:[%s8352_s17 + $0x508] sm:$0xff]  ;;  %v5257_v7 = vpack.c.bf16 %v2024_v34, %v2019_v56  ;;  %v2029_v20 = vld [vmem:[%s8352_s17 + $0x1f0] sm:$0xff]  ;;  %v2034_v35 = vld [vmem:[%s8352_s17 + $0x218] sm:$0xff]  ;;  %v5217_v8 = vpack.c.bf16 %v2122_v2, %v2117_v62 }
 0x568   :  { %v2040_v9 = vld [vmem:[%s8352_s17 + $0x248] sm:$0xff]  ;;  %v2142_v62 = vld [vmem:[%s8352_s17 + $0x578] sm:$0xff] }
 0x569   :  { %5146 = vmatpush1.bf16.msra.mxu0 %v5145_v5  ;;  %5186 = vmatpush1.bf16.msra.mxu1 %v5185_v21  ;;  %v2005_v5 = vld [vmem:[%s8352_s17 + $0x130] sm:$0xff]  ;;  %v2092_v21 = vld [vmem:[%s8352_s17 + $0x3e8] sm:$0xff] }
 0x56a   :  { %5148 = vmatprep.subr.bf16.mxu0 %v5147_v22  ;;  %5188 = vmatprep.subr.bf16.mxu1 %v5187_v24  ;;  %v2098_v22 = vld [vmem:[%s8352_s17 + $0x418] sm:$0xff]  ;;  %v5245_v24 = vpack.c.bf16 %v1994_v43, %v1989_v19  ;;  %v5247_v25 = vpack.c.bf16 %v2005_v5, %v2000_v44  ;;  %v5205_v53 = vpack.c.bf16 %v2092_v21, %v2087_v42  ;;  %v2039_v44 = vld [vmem:[%s8352_s17 + $0x240] sm:$0xff] }
 0x56b   :  { %v5207_v30 = vpack.c.bf16 %v2103_v23, %v2098_v22  ;;  %v5261_v19 = vpack.c.bf16 %v2034_v35, %v2029_v20  ;;  %v2050_v5 = vld [vmem:[%s8352_s17 + $0x298] sm:$0xff]  ;;  %v2049_v22 = vld [vmem:[%s8352_s17 + $0x290] sm:$0xff] }
 0x56c   :  { %v2054_v23 = vld [vmem:[%s8352_s17 + $0x2b8] sm:$0xff]  ;;  %v2089_v20 = vld [vmem:[%s8352_s17 + $0x3d0] sm:$0xff] }
 0x56d   :  { %5150 = vmatpush1.bf16.msra.mxu0 %v5149_v29  ;;  %5190 = vmatpush1.bf16.msra.mxu1 %v5189_v6  ;;  %v2015_v29 = vld [vmem:[%s8352_s17 + $0x180] sm:$0xff]  ;;  %v2102_v6 = vld [vmem:[%s8352_s17 + $0x438] sm:$0xff] }
 0x56e   :  { %5152 = vmatprep.subr.bf16.mxu0 %v5151_v33  ;;  %5192 = vmatprep.subr.bf16.mxu1 %v5191_v32  ;;  %v2108_v33 = vld [vmem:[%s8352_s17 + $0x468] sm:$0xff]  ;;  %v5249_v32 = vpack.c.bf16 %v2004_v27, %v1999_v26  ;;  %v5251_v37 = vpack.c.bf16 %v2015_v29, %v2010_v28  ;;  %v5209_v14 = vpack.c.bf16 %v2102_v6, %v2097_v31  ;;  %v2059_v28 = vld [vmem:[%s8352_s17 + $0x2e0] sm:$0xff]  ;;  %v2070_v29 = vld [vmem:[%s8352_s17 + $0x338] sm:$0xff] }
 0x56f   :  { %v5269_v26 = vpack.c.bf16 %v2054_v23, %v2049_v22  ;;  %v2094_v35 = vld [vmem:[%s8352_s17 + $0x3f8] sm:$0xff] }
 0x571   :  { %5154 = vmatpush1.bf16.msra.mxu0 %v5153_v45  ;;  %5194 = vmatpush1.bf16.msra.mxu1 %v5193_v46  ;;  %v2025_v45 = vld [vmem:[%s8352_s17 + $0x1d0] sm:$0xff]  ;;  %v5211_v46 = vpack.c.bf16 %v2113_v18, %v2108_v33  ;;  %v2074_v18 = vld [vmem:[%s8352_s17 + $0x358] sm:$0xff] }
 0x572   :  { %5236 = vmatprep.subr.bf16.mxu0 %v5235_v47  ;;  %5196 = vmatprep.subr.bf16.mxu1 %v5195_v54  ;;  %v2107_v47 = vld [vmem:[%s8352_s17 + $0x460] sm:$0xff]  ;;  %v5253_v54 = vpack.c.bf16 %v2014_v40, %v2009_v38  ;;  %v5255_v55 = vpack.c.bf16 %v2025_v45, %v2020_v41  ;;  %v2069_v33 = vld [vmem:[%s8352_s17 + $0x330] sm:$0xff]  ;;  %v2132_v41 = vld [vmem:[%s8352_s17 + $0x528] sm:$0xff] }
 0x573   :  { %v5213_v60 = vpack.c.bf16 %v2112_v48, %v2107_v47  ;;  %v2085_v45 = vld [vmem:[%s8352_s17 + $0x3b0] sm:$0xff]  ;;  %v5277_v47 = vpack.c.bf16 %v2074_v18, %v2069_v33  ;;  %v2789_v48 = vrot.slane %v7141_v58, 1 }
 0x574   :  { %2775 = vmatmul.mubr.f32.vlgmr.msra.gmra.mrb[22].mxu0 %v7141_v58  ;;  %v7610_v58 = vrot.slane %v7133_v49, 1 }
 0x575   :  { %4063 = vmatprep.mubr.msk.f32.mxu0 %vm1712_vm9, %v7151_v57  ;;  %5238 = vmatpush1.bf16.msra.mxu0 %v5237_v61  ;;  %v2035_v61 = vld [vmem:[%s8352_s17 + $0x220] sm:$0xff] }
 0x576   :  { %5240 = vmatprep.subr.bf16.mxu0 %v5239_v63  ;;  %5198 = vmatpush1.bf16.msra.mxu1 %v5197_v4  ;;  %v5215_v63 = vpack.c.bf16 %v2123_v51, %v2118_v50  ;;  %v2133_v4 = vld [vmem:[%s8352_s17 + $0x530] sm:$0xff]  ;;  %v2138_v50 = vld [vmem:[%s8352_s17 + $0x558] sm:$0xff]  ;;  %v2143_v51 = vld [vmem:[%s8352_s17 + $0x580] sm:$0xff]  ;;  %v7631_v2 = vsel %vm1782_vm8, %v2789_v48, %v7610_v58 }
 0x577   :  { %5200 = vmatprep.subr.bf16.mxu1 %v5199_v36  ;;  %v5259_v36 = vpack.c.bf16 %v2035_v61, %v2030_v59  ;;  %v2090_v59 = vld [vmem:[%s8352_s17 + $0x3d8] sm:$0xff] }
 0x578   :  { %2781 = vmatmul.mubr.f32.gmra.mrb[24].mxu0 %v7133_v49  ;;  %v2137_v49 = vld [vmem:[%s8352_s17 + $0x550] sm:$0xff] }
 0x579   :  { %5242 = vmatpush1.bf16.msra.mxu0 %v5241_v10  ;;  %v2045_v10 = vld [vmem:[%s8352_s17 + $0x270] sm:$0xff] }
 0x57a   :  { %5244 = vmatprep.subr.bf16.mxu0 %v5243_v11  ;;  %5202 = vmatpush1.bf16.msra.mxu1 %v5201_v1  ;;  %v5219_v11 = vpack.c.bf16 %v2133_v4, %v2128_v3  ;;  %v5263_v43 = vpack.c.bf16 %v2045_v10, %v2040_v9  ;;  %v2044_v1 = vld [vmem:[%s8352_s17 + $0x268] sm:$0xff]  ;;  %v2105_v10 = vld [vmem:[%s8352_s17 + $0x450] sm:$0xff] }
 0x57b   :  { %5204 = vmatprep.subr.bf16.mxu1 %v5203_v39  ;;  %v2055_v39 = vld [vmem:[%s8352_s17 + $0x2c0] sm:$0xff]  ;;  %v5265_v42 = vpack.c.bf16 %v2044_v1, %v2039_v44  ;;  %v2148_v4 = vld [vmem:[%s8352_s17 + $0x5a8] sm:$0xff]  ;;  %v5285_v44 = vpack.c.bf16 %v2094_v35, %v2089_v20  ;;  %v2158_v1 = vld [vmem:[%s8352_s17 + $0x5f8] sm:$0xff] }
 0x57c   :  { %v5267_v21 = vpack.c.bf16 %v2055_v39, %v2050_v5  ;;  %v2100_v9 = vld [vmem:[%s8352_s17 + $0x428] sm:$0xff]  ;;  %v2163_v5 = vld [vmem:[%s8352_s17 + $0x620] sm:$0xff]  ;;  %v2129_v35 = vld [vmem:[%s8352_s17 + $0x510] sm:$0xff] }
 0x57d   :  { %5246 = vmatpush1.bf16.msra.mxu0 %v5245_v24  ;;  %v2060_v24 = vld [vmem:[%s8352_s17 + $0x2e8] sm:$0xff]  ;;  %v5287_v39 = vpack.c.bf16 %v2105_v10, %v2100_v9 }
 0x57e   :  { %5248 = vmatprep.subr.bf16.mxu0 %v5247_v25  ;;  %5206 = vmatpush1.bf16.msra.mxu1 %v5205_v53  ;;  %v2065_v25 = vld [vmem:[%s8352_s17 + $0x310] sm:$0xff]  ;;  %v2064_v53 = vld [vmem:[%s8352_s17 + $0x308] sm:$0xff] }
 0x57f   :  { %5208 = vmatprep.subr.bf16.mxu1 %v5207_v30  ;;  %v5271_v27 = vpack.c.bf16 %v2065_v25, %v2060_v24  ;;  %v2075_v30 = vld [vmem:[%s8352_s17 + $0x360] sm:$0xff]  ;;  %v5273_v31 = vpack.c.bf16 %v2064_v53, %v2059_v28  ;;  %v2110_v25 = vld [vmem:[%s8352_s17 + $0x478] sm:$0xff]  ;;  %v2157_v28 = vld [vmem:[%s8352_s17 + $0x5f0] sm:$0xff] }
 0x580   :  { %v5275_v6 = vpack.c.bf16 %v2075_v30, %v2070_v29  ;;  %v2162_v53 = vld [vmem:[%s8352_s17 + $0x618] sm:$0xff]  ;;  %v2051_v30 = vld [vmem:[%s8352_s17 + $0x2a0] sm:$0xff]  ;;  %v2140_v10 = vld [vmem:[%s8352_s17 + $0x568] sm:$0xff] }
 0x581   :  { %5250 = vmatpush1.bf16.msra.mxu0 %v5249_v32 }
 0x582   :  { %5252 = vmatprep.subr.bf16.mxu0 %v5251_v37  ;;  %5210 = vmatpush1.bf16.msra.mxu1 %v5209_v14  ;;  %v2127_v37 = vld [vmem:[%s8352_s17 + $0x500] sm:$0xff]  ;;  %v2080_v14 = vld [vmem:[%s8352_s17 + $0x388] sm:$0xff] }
 0x583   :  { %5212 = vmatprep.subr.bf16.mxu1 %v5211_v46  ;;  %v5221_v56 = vpack.c.bf16 %v2132_v41, %v2127_v37  ;;  %v5279_v34 = vpack.c.bf16 %v2085_v45, %v2080_v14  ;;  %v2109_v37 = vld [vmem:[%s8352_s17 + $0x470] sm:$0xff]  ;;  %v5233_v41 = vpack.c.bf16 %v2162_v53, %v2157_v28  ;;  %v2120_v14 = vld [vmem:[%s8352_s17 + $0x4c8] sm:$0xff]  ;;  %v1971_v45 = vld [vmem:[%s8352_s17 + $0x20] sm:$0xff] }
 0x584   :  { %v2006_v28 = vld [vmem:[%s8352_s17 + $0x138] sm:$0xff] }
 0x585   :  { %5254 = vmatpush1.bf16.msra.mxu0 %v5253_v54 }
 0x586   :  { %5256 = vmatprep.subr.bf16.mxu0 %v5255_v55  ;;  %5214 = vmatpush1.bf16.msra.mxu1 %v5213_v60  ;;  %v2079_v55 = vld [vmem:[%s8352_s17 + $0x380] sm:$0xff] }
 0x587   :  { %5216 = vmatprep.subr.bf16.mxu1 %v5215_v63  ;;  %v2095_v60 = vld [vmem:[%s8352_s17 + $0x400] sm:$0xff]  ;;  %v5223_v63 = vpack.c.bf16 %v2143_v51, %v2138_v50  ;;  %v2061_v50 = vld [vmem:[%s8352_s17 + $0x2f0] sm:$0xff]  ;;  %v2066_v51 = vld [vmem:[%s8352_s17 + $0x318] sm:$0xff] }
 0x589   :  { %5258 = vmatpush1.bf16.msra.mxu0 %v5257_v7  ;;  %v2153_v7 = vld [vmem:[%s8352_s17 + $0x5d0] sm:$0xff] }
 0x58a   :  { %5260 = vmatprep.subr.bf16.mxu0 %v5259_v36  ;;  %5218 = vmatpush1.bf16.msra.mxu1 %v5217_v8  ;;  %v5283_v36 = vpack.c.bf16 %v2095_v60, %v2090_v59  ;;  %v5225_v8 = vpack.c.bf16 %v2142_v62, %v2137_v49  ;;  %v2130_v59 = vld [vmem:[%s8352_s17 + $0x518] sm:$0xff]  ;;  %v2135_v60 = vld [vmem:[%s8352_s17 + $0x540] sm:$0xff]  ;;  %v1981_v49 = vld [vmem:[%s8352_s17 + $0x70] sm:$0xff] }
 0x58b   :  { %5220 = vmatprep.subr.bf16.mxu1 %v5219_v11  ;;  %v5227_v11 = vpack.c.bf16 %v2153_v7, %v2148_v4  ;;  %v1986_v62 = vld [vmem:[%s8352_s17 + $0x98] sm:$0xff]  ;;  %v2071_v7 = vld [vmem:[%s8352_s17 + $0x340] sm:$0xff]  ;;  %v5299_v20 = vpack.c.bf16 %v2135_v60, %v2130_v59 }
 0x58c   :  { %v5321_v9 = vpack.c.bf16 %v1986_v62, %v1981_v49  ;;  %v2026_v59 = vld [vmem:[%s8352_s17 + $0x1d8] sm:$0xff]  ;;  %v2116_v49 = vld [vmem:[%s8352_s17 + $0x4a8] sm:$0xff] }
 0x58d   :  { %5262 = vmatpush1.bf16.msra.mxu0 %v5261_v19  ;;  %v2147_v19 = vld [vmem:[%s8352_s17 + $0x5a0] sm:$0xff] }
 0x58e   :  { %5264 = vmatprep.subr.bf16.mxu0 %v5263_v43  ;;  %v2152_v43 = vld [vmem:[%s8352_s17 + $0x5c8] sm:$0xff] }
 0x58f   :  { %v5229_v24 = vpack.c.bf16 %v2152_v43, %v2147_v19  ;;  %v1991_v43 = vld [vmem:[%s8352_s17 + $0xc0] sm:$0xff] }
 0x591   :  { %5266 = vmatpush1.bf16.msra.mxu0 %v5265_v42  ;;  %v2099_v42 = vld [vmem:[%s8352_s17 + $0x420] sm:$0xff] }
 0x592   :  { %5268 = vmatprep.subr.bf16.mxu0 %v5267_v21  ;;  %v2104_v21 = vld [vmem:[%s8352_s17 + $0x448] sm:$0xff] }
 0x593   :  { %v5289_v29 = vpack.c.bf16 %v2104_v21, %v2099_v42  ;;  %v2139_v21 = vld [vmem:[%s8352_s17 + $0x560] sm:$0xff] }
 0x595   :  { %5270 = vmatpush1.bf16.msra.mxu0 %v5269_v26  ;;  %v2115_v26 = vld [vmem:[%s8352_s17 + $0x4a0] sm:$0xff] }
 0x596   :  { %5272 = vmatprep.subr.bf16.mxu0 %v5271_v27  ;;  %v5231_v27 = vpack.c.bf16 %v2163_v5, %v2158_v1  ;;  %v5291_v18 = vpack.c.bf16 %v2115_v26, %v2110_v25  ;;  %v2081_v5 = vld [vmem:[%s8352_s17 + $0x390] sm:$0xff]  ;;  %v2155_v25 = vld [vmem:[%s8352_s17 + $0x5e0] sm:$0xff] }
 0x597   :  { %v7572_v32 = vpop.permute.xlu1 %2339 }
 0x598   :  { %v2351_v38 = vsel %vm1712_vm9, %v7108_v52, %v7572_v32  ;;  %v7580_v40 = vpop.permute.xlu0 %2343 }
 0x599   :  { %5274 = vmatpush1.bf16.msra.mxu0 %v5273_v31  ;;  %v2792_v46 = vrot.slane %v2351_v38, 1  ;;  %v2352_v52 = vsel %vm1712_vm9, %v7151_v57, %v7580_v40  ;;  %v2084_v57 = vld [vmem:[%s8352_s17 + $0x3a8] sm:$0xff]  ;;  %v2114_v38 = vld [vmem:[%s8352_s17 + $0x498] sm:$0xff] }
 0x59a   :  { %v7601_v54 = vrot.slane %v2352_v52, 1  ;;  %5276 = vmatprep.subr.bf16.mxu0 %v5275_v6  ;;  %v5281_v3 = vpack.c.bf16 %v2084_v57, %v2079_v55  ;;  %v2056_v31 = vld [vmem:[%s8352_s17 + $0x2c8] sm:$0xff]  ;;  %v5293_v48 = vpack.c.bf16 %v2114_v38, %v2109_v37  ;;  %v2119_v57 = vld [vmem:[%s8352_s17 + $0x4c0] sm:$0xff]  ;;  %v2165_v38 = vld [vmem:[%s8352_s17 + $0x630] sm:$0xff] }
 0x59b   :  { %v2160_v37 = vld [vmem:[%s8352_s17 + $0x608] sm:$0xff] }
 0x59c   :  { %v7620_v61 = vsel %vm1782_vm8, %v2792_v46, %v7601_v54  ;;  %v2342_v22 = vpop.permute.xlu1 %2341  ;;  %v1976_v46 = vld [vmem:[%s8352_s17 + $0x48] sm:$0xff] }
 0x59d   :  { %5278 = vmatpush1.bf16.msra.mxu0 %v5277_v47  ;;  %2870 = vmatprep.mubr.f32.mxu1 %v7620_v61  ;;  %v2346_v23 = vpop.permute.xlu0 %2345  ;;  %v2347_v6 = vsel %vm1712_vm9, %v7572_v32, %v2342_v22  ;;  %v2125_v32 = vld [vmem:[%s8352_s17 + $0x4f0] sm:$0xff]  ;;  %v2144_v22 = vld [vmem:[%s8352_s17 + $0x588] sm:$0xff] }
 0x59e   :  { %3024 = vmatprep.mubr.f32.mxu0 %v7620_v61  ;;  %2871 = vmatmul.mubr.f32.vlgmr.msra.gmra.mrb[22].mxu1 %v7631_v2  ;;  %v2348_v33 = vsel %vm1712_vm9, %v7580_v40, %v2346_v23  ;;  %v5315_v40 = vpack.c.bf16 %v2056_v31, %v2051_v30  ;;  %v2795_v52 = vrot.slane %v2347_v6, 1  ;;  %v5295_v55 = vpack.c.bf16 %v2125_v32, %v2120_v14  ;;  %v2096_v30 = vld [vmem:[%s8352_s17 + $0x408] sm:$0xff]  ;;  %v2149_v6 = vld [vmem:[%s8352_s17 + $0x5b0] sm:$0xff]  ;;  %v2011_v14 = vld [vmem:[%s8352_s17 + $0x160] sm:$0xff] }
 0x59f   :  { %5222 = vmatpush1.bf16.msra.mxu1 %v5221_v56  ;;  %5280 = vmatprep.subr.bf16.mxu0 %v5279_v34  ;;  %v7714_v47 = vrot.slane %v2348_v33, 1  ;;  %v2124_v56 = vld [vmem:[%s8352_s17 + $0x4e8] sm:$0xff]  ;;  %v5317_v34 = vpack.c.bf16 %v1976_v46, %v1971_v45  ;;  %v5305_v53 = vpack.c.bf16 %v2144_v22, %v2139_v21  ;;  %v2154_v33 = vld [vmem:[%s8352_s17 + $0x5d8] sm:$0xff]  ;;  %v2101_v45 = vld [vmem:[%s8352_s17 + $0x430] sm:$0xff] }
 0x5a0   :  { %2876 = vmatprep.mubr.f32.mxu1 %v7601_v54  ;;  %5224 = vmatprep.subr.bf16.mxu1 %v5223_v63  ;;  %v5319_v63 = vpack.c.bf16 %v2066_v51, %v2061_v50  ;;  %v5297_v4 = vpack.c.bf16 %v2124_v56, %v2119_v57  ;;  %v2016_v32 = vld [vmem:[%s8352_s17 + $0x188] sm:$0xff]  ;;  %v2106_v46 = vld [vmem:[%s8352_s17 + $0x458] sm:$0xff] }
 0x5a1   :  { %5282 = vmatpush1.bf16.msra.mxu0 %v5281_v3  ;;  %v7742_v3 = vsel %vm1782_vm8, %v2795_v52, %v7714_v47  ;;  %v5311_v52 = vpack.c.bf16 %v2165_v38, %v2160_v37  ;;  %v2164_v50 = vld [vmem:[%s8352_s17 + $0x628] sm:$0xff]  ;;  %v5333_v51 = vpack.c.bf16 %v2016_v32, %v2011_v14  ;;  %v5335_v56 = vpack.c.bf16 %v2106_v46, %v2101_v45  ;;  %v2141_v37 = vld [vmem:[%s8352_s17 + $0x570] sm:$0xff]  ;;  %v2146_v38 = vld [vmem:[%s8352_s17 + $0x598] sm:$0xff] }
 0x5a2   :  { %2877 = vmatmul.mubr.f32.gmra.mrb[24].mxu1 %v7610_v58  ;;  %5284 = vmatprep.subr.bf16.mxu0 %v5283_v36  ;;  %v2076_v36 = vld [vmem:[%s8352_s17 + $0x368] sm:$0xff]  ;;  %v2191_v14 = vld [vmem:[#allocation10 + $0xc0] sm:$0xff]  ;;  %v5351_v46 = vpack.c.bf16 %v2146_v38, %v2141_v37 }
 0x5a3   :  { %5226 = vmatpush1.bf16.msra.mxu1 %v5225_v8  ;;  %2947 = vmatprep.mubr.f32.mxu1 %v5796_v0  ;;  %v2134_v8 = vld [vmem:[%s8352_s17 + $0x538] sm:$0xff]  ;;  %v5323_v19 = vpack.c.bf16 %v2076_v36, %v2071_v7  ;;  %v2172_v57 = vld [vmem:[#allocation10 + $0x28] sm:$0xff]  ;;  %v2171_v7 = vld [vmem:[#allocation10 + $0x20] sm:$0xff] }
 0x5a4   :  { %5228 = vmatprep.subr.bf16.mxu1 %v5227_v11  ;;  %v2145_v11 = vld [vmem:[%s8352_s17 + $0x590] sm:$0xff]  ;;  %v5301_v1 = vpack.c.bf16 %v2134_v8, %v2129_v35  ;;  %v2180_v35 = vld [vmem:[#allocation10 + $0x68] sm:$0xff]  ;;  %v2195_v32 = vld [vmem:[#allocation10 + $0xe0] sm:$0xff] }
 0x5a5   :  { %5286 = vmatpush1.bf16.msra.mxu0 %v5285_v44  ;;  %v1996_v44 = vld [vmem:[%s8352_s17 + $0xe8] sm:$0xff]  ;;  %v5303_v42 = vpack.c.bf16 %v2145_v11, %v2140_v10  ;;  %v2231_v38 = vld [vmem:[#allocation10 + $0x200] sm:$0xff] }
 0x5a6   :  { %5288 = vmatprep.subr.bf16.mxu0 %v5287_v39  ;;  %v2086_v39 = vld [vmem:[%s8352_s17 + $0x3b8] sm:$0xff]  ;;  %v5325_v23 = vpack.c.bf16 %v1996_v44, %v1991_v43  ;;  %v2036_v10 = vld [vmem:[%s8352_s17 + $0x228] sm:$0xff] }
 0x5a7   :  { %5230 = vmatpush1.bf16.msra.mxu1 %v5229_v24  ;;  %v2150_v24 = vld [vmem:[%s8352_s17 + $0x5b8] sm:$0xff]  ;;  %v5327_v26 = vpack.c.bf16 %v2086_v39, %v2081_v5  ;;  %v2179_v5 = vld [vmem:[#allocation10 + $0x60] sm:$0xff]  ;;  %v2188_v21 = vld [vmem:[#allocation10 + $0xa8] sm:$0xff] }
 0x5a8   :  { %5232 = vmatprep.subr.bf16.mxu1 %v5231_v27  ;;  %v2001_v27 = vld [vmem:[%s8352_s17 + $0x110] sm:$0xff]  ;;  %v5307_v31 = vpack.c.bf16 %v2155_v25, %v2150_v24  ;;  %v2126_v43 = vld [vmem:[%s8352_s17 + $0x4f8] sm:$0xff]  ;;  %v2204_v45 = vld [vmem:[#allocation10 + $0x128] sm:$0xff] }
 0x5a9   :  { %5290 = vmatpush1.bf16.msra.mxu0 %v5289_v29  ;;  %v2091_v29 = vld [vmem:[%s8352_s17 + $0x3e0] sm:$0xff]  ;;  %v2046_v24 = vld [vmem:[%s8352_s17 + $0x278] sm:$0xff] }
 0x5aa   :  { %5292 = vmatprep.subr.bf16.mxu0 %v5291_v18  ;;  %v5329_v18 = vpack.c.bf16 %v2006_v28, %v2001_v27  ;;  %v2136_v27 = vld [vmem:[%s8352_s17 + $0x548] sm:$0xff] }
 0x5ab   :  { %5234 = vmatpush1.bf16.msra.mxu1 %v5233_v41  ;;  %v5331_v41 = vpack.c.bf16 %v2096_v30, %v2091_v29  ;;  %v2187_v29 = vld [vmem:[#allocation10 + $0xa0] sm:$0xff] }
 0x5ac   :  { %5316 = vmatprep.subr.bf16.mxu1 %v5315_v40  ;;  %v5309_v40 = vpack.c.bf16 %v2154_v33, %v2149_v6  ;;  %v2196_v6 = vld [vmem:[#allocation10 + $0xe8] sm:$0xff] }
 0x5ad   :  { %5294 = vmatpush1.bf16.msra.mxu0 %v5293_v48  ;;  %v2159_v48 = vld [vmem:[%s8352_s17 + $0x600] sm:$0xff] }
 0x5ae   :  { %4064 = vmatmul.mubr.msk.f32.vlgmr.msra.gmra.mrb[22].mxu1 %vm1056_vm3, %v7742_v3  ;;  %5296 = vmatprep.subr.bf16.mxu0 %v5295_v55  ;;  %v2168_v55 = vld [vmem:[#allocation10 + $0x8] sm:$0xff]  ;;  %v5313_v60 = vpack.c.bf16 %v2164_v50, %v2159_v48  ;;  %v2151_v48 = vld [vmem:[%s8352_s17 + $0x5c0] sm:$0xff] }
 0x5af   :  { %5318 = vmatpush3.bf16.msra.mxu1 %v5317_v34  ;;  %2953 = vmatprep.mubr.f32.mxu1 %v5796_v0  ;;  %v2021_v34 = vld [vmem:[%s8352_s17 + $0x1b0] sm:$0xff]  ;;  %v5363_v62 = vpack.c.bf16 %v2172_v57, %v2168_v55  ;;  %v2156_v50 = vld [vmem:[%s8352_s17 + $0x5e8] sm:$0xff]  ;;  %v2199_v55 = vld [vmem:[#allocation10 + $0x100] sm:$0xff] }
 0x5b0   :  { %5320 = vmatprep.subr.bf16.mxu1 %v5319_v63  ;;  %v2111_v63 = vld [vmem:[%s8352_s17 + $0x480] sm:$0xff]  ;;  %v5337_v36 = vpack.c.bf16 %v2026_v59, %v2021_v34  ;;  %v2212_v34 = vld [vmem:[#allocation10 + $0x168] sm:$0xff]  ;;  %v5355_v59 = vpack.c.bf16 %v2156_v50, %v2151_v48  ;;  %v2194_v50 = vld [vmem:[#allocation10 + $0xd8] sm:$0xff] }
 0x5b1   :  { %5298 = vmatpush1.bf16.msra.mxu0 %v5297_v4  ;;  %v2167_v4 = vld [vmem:[#allocation10] sm:$0xff]  ;;  %v5339_v8 = vpack.c.bf16 %v2116_v49, %v2111_v63  ;;  %v2161_v63 = vld [vmem:[%s8352_s17 + $0x610] sm:$0xff]  ;;  %v2166_v49 = vld [vmem:[%s8352_s17 + $0x638] sm:$0xff] }
 0x5b2   :  { %4065 = vmatmul.mubr.msk.f32.gmra.mrb[24].mxu1 %vm1056_vm3, %v7714_v47  ;;  %5300 = vmatprep.subr.bf16.mxu0 %v5299_v20  ;;  %v2176_v20 = vld [vmem:[#allocation10 + $0x48] sm:$0xff]  ;;  %v5365_v11 = vpack.c.bf16 %v2171_v7, %v2167_v4  ;;  %v2203_v57 = vld [vmem:[#allocation10 + $0x120] sm:$0xff] }
 0x5b3   :  { %5322 = vmatpush3.bf16.msra.mxu1 %v5321_v9  ;;  %3178 = vmatprep.mubr.f32.mxu1 %v7620_v61  ;;  %v2031_v9 = vld [vmem:[%s8352_s17 + $0x200] sm:$0xff]  ;;  %v5367_v44 = vpack.c.bf16 %v2180_v35, %v2176_v20  ;;  %v2220_v20 = vld [vmem:[#allocation10 + $0x1a8] sm:$0xff]  ;;  %v5359_v35 = vpack.c.bf16 %v2166_v49, %v2161_v63  ;;  %v2193_v63 = vld [vmem:[#allocation10 + $0xd0] sm:$0xff] }
 0x5b4   :  { %3025 = vmatmul.mubr.f32.vlgmr.msra.gmra.mrb[26].mxu0 %v7631_v2  ;;  %5324 = vmatprep.subr.bf16.mxu1 %v5323_v19  ;;  %v2121_v19 = vld [vmem:[%s8352_s17 + $0x4d0] sm:$0xff]  ;;  %v5341_v39 = vpack.c.bf16 %v2036_v10, %v2031_v9  ;;  %v2207_v4 = vld [vmem:[#allocation10 + $0x140] sm:$0xff]  ;;  %v2170_v9 = vld [vmem:[#allocation10 + $0x18] sm:$0xff] }
 0x5b5   :  { %3030 = vmatprep.mubr.f32.mxu0 %v7601_v54  ;;  %5302 = vmatpush1.bf16.msra.mxu0 %v5301_v1  ;;  %v2175_v1 = vld [vmem:[#allocation10 + $0x40] sm:$0xff]  ;;  %v5343_v22 = vpack.c.bf16 %v2126_v43, %v2121_v19  ;;  %v2174_v10 = vld [vmem:[#allocation10 + $0x38] sm:$0xff]  ;;  %v2197_v49 = vld [vmem:[#allocation10 + $0xf0] sm:$0xff] }
 0x5b6   :  { %5304 = vmatprep.subr.bf16.mxu0 %v5303_v42  ;;  %v2184_v42 = vld [vmem:[#allocation10 + $0x88] sm:$0xff]  ;;  %v5369_v25 = vpack.c.bf16 %v2179_v5, %v2175_v1  ;;  %v2211_v7 = vld [vmem:[#allocation10 + $0x160] sm:$0xff]  ;;  %v5443_v5 = vpack.c.bf16 %v2174_v10, %v2170_v9 }
 0x5b7   :  { %5326 = vmatpush3.bf16.msra.mxu1 %v5325_v23  ;;  %v2041_v23 = vld [vmem:[%s8352_s17 + $0x250] sm:$0xff]  ;;  %v5371_v28 = vpack.c.bf16 %v2188_v21, %v2184_v42  ;;  %v2215_v19 = vld [vmem:[#allocation10 + $0x180] sm:$0xff]  ;;  %v2228_v1 = vld [vmem:[#allocation10 + $0x1e8] sm:$0xff] }
 0x5b8   :  { %3031 = vmatmul.mubr.f32.gmra.mrb[28].mxu0 %v7610_v58  ;;  %5328 = vmatprep.subr.bf16.mxu1 %v5327_v26  ;;  %v2131_v26 = vld [vmem:[%s8352_s17 + $0x520] sm:$0xff]  ;;  %v5345_v30 = vpack.c.bf16 %v2046_v24, %v2041_v23  ;;  %v2173_v42 = vld [vmem:[#allocation10 + $0x30] sm:$0xff]  ;;  %v2182_v23 = vld [vmem:[#allocation10 + $0x78] sm:$0xff] }
 0x5b9   :  { %5306 = vmatpush1.bf16.msra.mxu0 %v5305_v53  ;;  %3101 = vmatprep.mubr.f32.mxu0 %v5796_v0  ;;  %v2183_v53 = vld [vmem:[#allocation10 + $0x80] sm:$0xff]  ;;  %v5347_v33 = vpack.c.bf16 %v2136_v27, %v2131_v26  ;;  %v2256_v9 = vld [vmem:[#allocation10 + $0x2c8] sm:$0xff] }
 0x5ba   :  { %5308 = vmatprep.subr.bf16.mxu0 %v5307_v31  ;;  %v2192_v31 = vld [vmem:[#allocation10 + $0xc8] sm:$0xff]  ;;  %v2219_v43 = vld [vmem:[#allocation10 + $0x1a0] sm:$0xff] }
 0x5bb   :  { %5330 = vmatpush3.bf16.msra.mxu1 %v5329_v18  ;;  %v5373_v18 = vpack.c.bf16 %v2187_v29, %v2183_v53  ;;  %v5389_v21 = vpack.c.bf16 %v2219_v43, %v2215_v19  ;;  %v2227_v26 = vld [vmem:[#allocation10 + $0x1e0] sm:$0xff]  ;;  %v2236_v53 = vld [vmem:[#allocation10 + $0x228] sm:$0xff]  ;;  %v2201_v19 = vld [vmem:[#allocation10 + $0x110] sm:$0xff] }
 0x5bc   :  { %5332 = vmatprep.subr.bf16.mxu1 %v5331_v41  ;;  %v5375_v41 = vpack.c.bf16 %v2196_v6, %v2192_v31  ;;  %v2181_v31 = vld [vmem:[#allocation10 + $0x70] sm:$0xff]  ;;  %v2260_v10 = vld [vmem:[#allocation10 + $0x2e8] sm:$0xff] }
 0x5bd   :  { %5310 = vmatpush1.bf16.msra.mxu0 %v5309_v40  ;;  %v2200_v40 = vld [vmem:[#allocation10 + $0x108] sm:$0xff]  ;;  %v2205_v43 = vld [vmem:[#allocation10 + $0x130] sm:$0xff] }
 0x5be   :  { %5312 = vmatprep.subr.bf16.mxu0 %v5311_v52  ;;  %v5377_v52 = vpack.c.bf16 %v2195_v32, %v2191_v14  ;;  %v2240_v32 = vld [vmem:[#allocation10 + $0x248] sm:$0xff] }
 0x5bf   :  { %5334 = vmatpush3.bf16.msra.mxu1 %v5333_v51  ;;  %v5379_v51 = vpack.c.bf16 %v2204_v45, %v2200_v40  ;;  %v2244_v40 = vld [vmem:[#allocation10 + $0x268] sm:$0xff] }
 0x5c0   :  { %5336 = vmatprep.subr.bf16.mxu1 %v5335_v56  ;;  %v2208_v56 = vld [vmem:[#allocation10 + $0x148] sm:$0xff] }
 0x5c1   :  { %5314 = vmatpush1.bf16.msra.mxu0 %v5313_v60  ;;  %v5381_v60 = vpack.c.bf16 %v2203_v57, %v2199_v55  ;;  %v5399_v55 = vpack.c.bf16 %v2244_v40, %v2240_v32  ;;  %v2239_v57 = vld [vmem:[#allocation10 + $0x240] sm:$0xff]  ;;  %v2226_v40 = vld [vmem:[#allocation10 + $0x1d8] sm:$0xff] }
 0x5c2   :  { %5364 = vmatprep.subr.bf16.mxu0 %v5363_v62  ;;  %v5383_v62 = vpack.c.bf16 %v2212_v34, %v2208_v56  ;;  %v2243_v56 = vld [vmem:[#allocation10 + $0x260] sm:$0xff] }
 0x5c3   :  { %5338 = vmatpush3.bf16.msra.mxu1 %v5337_v36  ;;  %v2216_v36 = vld [vmem:[#allocation10 + $0x188] sm:$0xff] }
 0x5c4   :  { %4066 = vmatmul.mubr.msk.f32.vlgmr.msra.gmra.mrb[26].mxu0 %vm1056_vm3, %v7742_v3  ;;  %5340 = vmatprep.subr.bf16.mxu1 %v5339_v8  ;;  %v5385_v8 = vpack.c.bf16 %v2211_v7, %v2207_v4  ;;  %v2202_v4 = vld [vmem:[#allocation10 + $0x118] sm:$0xff] }
 0x5c5   :  { %5366 = vmatpush1.bf16.msra.mxu0 %v5365_v11  ;;  %3107 = vmatprep.mubr.f32.mxu0 %v5796_v0  ;;  %v5387_v11 = vpack.c.bf16 %v2220_v20, %v2216_v36  ;;  %v2206_v7 = vld [vmem:[#allocation10 + $0x138] sm:$0xff]  ;;  %v2247_v20 = vld [vmem:[#allocation10 + $0x280] sm:$0xff] }
 0x5c6   :  { %5368 = vmatprep.subr.bf16.mxu0 %v5367_v44  ;;  %v2224_v44 = vld [vmem:[#allocation10 + $0x1c8] sm:$0xff] }
 0x5c7   :  { %5342 = vmatpush3.bf16.msra.mxu1 %v5341_v39  ;;  %v2169_v39 = vld [vmem:[#allocation10 + $0x10] sm:$0xff]  ;;  %v5391_v24 = vpack.c.bf16 %v2228_v1, %v2224_v44  ;;  %v2210_v1 = vld [vmem:[#allocation10 + $0x158] sm:$0xff] }
 0x5c8   :  { %4067 = vmatmul.mubr.msk.f32.gmra.mrb[28].mxu0 %vm1056_vm3, %v7714_v47  ;;  %5344 = vmatprep.subr.bf16.mxu1 %v5343_v22  ;;  %v2178_v22 = vld [vmem:[#allocation10 + $0x58] sm:$0xff]  ;;  %v5445_v27 = vpack.c.bf16 %v2173_v42, %v2169_v39  ;;  %v5407_v39 = vpack.c.bf16 %v2260_v10, %v2256_v9  ;;  %v2255_v42 = vld [vmem:[#allocation10 + $0x2c0] sm:$0xff]  ;;  %v2292_v9 = vld [vmem:[#allocation10 + $0x3e8] sm:$0xff] }
 0x5c9   :  { %5370 = vmatpush1.bf16.msra.mxu0 %v5369_v25  ;;  %3328 = vmatprep.mubr.f32.mxu0 %v7620_v61  ;;  %v2223_v25 = vld [vmem:[#allocation10 + $0x1c0] sm:$0xff]  ;;  %v5447_v29 = vpack.c.bf16 %v2182_v23, %v2178_v22  ;;  %v5461_v22 = vpack.c.bf16 %v2205_v43, %v2201_v19  ;;  %v2264_v23 = vld [vmem:[#allocation10 + $0x308] sm:$0xff]  ;;  %v2237_v19 = vld [vmem:[#allocation10 + $0x230] sm:$0xff] }
 0x5ca   :  { %5372 = vmatprep.subr.bf16.mxu0 %v5371_v28  ;;  %v2232_v28 = vld [vmem:[#allocation10 + $0x208] sm:$0xff]  ;;  %v5393_v6 = vpack.c.bf16 %v2227_v26, %v2223_v25  ;;  %v2209_v26 = vld [vmem:[#allocation10 + $0x150] sm:$0xff] }
 0x5cb   :  { %5346 = vmatpush3.bf16.msra.mxu1 %v5345_v30  ;;  %v2177_v30 = vld [vmem:[#allocation10 + $0x50] sm:$0xff]  ;;  %v5395_v37 = vpack.c.bf16 %v2236_v53, %v2232_v28  ;;  %v2218_v53 = vld [vmem:[#allocation10 + $0x198] sm:$0xff] }
 0x5cc   :  { %5348 = vmatprep.subr.bf16.mxu1 %v5347_v33  ;;  %v5449_v14 = vpack.c.bf16 %v2181_v31, %v2177_v30  ;;  %v2263_v31 = vld [vmem:[#allocation10 + $0x300] sm:$0xff] }
 0x5cd   :  { %5374 = vmatpush1.bf16.msra.mxu0 %v5373_v18  ;;  %v2190_v18 = vld [vmem:[#allocation10 + $0xb8] sm:$0xff] }
 0x5ce   :  { %3179 = vmatmul.mubr.f32.vlgmr.msra.gmra.mrb[26].mxu1 %v7631_v2  ;;  %5376 = vmatprep.subr.bf16.mxu0 %v5375_v41  ;;  %v2235_v41 = vld [vmem:[#allocation10 + $0x220] sm:$0xff] }
 0x5cf   :  { %3183 = vmatprep.mubr.f32.mxu1 %v7601_v54  ;;  %5350 = vmatpush3.bf16.msra.mxu1 %v5347_v33  ;;  %v2186_v33 = vld [vmem:[#allocation10 + $0x98] sm:$0xff]  ;;  %v5397_v48 = vpack.c.bf16 %v2235_v41, %v2231_v38  ;;  %v2217_v41 = vld [vmem:[#allocation10 + $0x190] sm:$0xff] }
 0x5d0   :  { %5352 = vmatprep.subr.bf16.mxu1 %v5351_v46  ;;  %v5451_v45 = vpack.c.bf16 %v2190_v18, %v2186_v33  ;;  %v2272_v18 = vld [vmem:[#allocation10 + $0x348] sm:$0xff] }
 0x5d1   :  { %5378 = vmatpush1.bf16.msra.mxu0 %v5377_v52  ;;  %v2189_v52 = vld [vmem:[#allocation10 + $0xb0] sm:$0xff] }
 0x5d2   :  { %3184 = vmatmul.mubr.f32.gmra.mrb[28].mxu1 %v7610_v58  ;;  %5380 = vmatprep.subr.bf16.mxu0 %v5379_v51  ;;  %v2198_v51 = vld [vmem:[#allocation10 + $0xf8] sm:$0xff] }
 0x5d3   :  { %5354 = vmatpush3.bf16.msra.mxu1 %v5351_v46  ;;  %4522 = vmatprep.mubr.msk.f32.mxu1 %vm1056_vm3, %v7742_v3  ;;  %v2185_v46 = vld [vmem:[#allocation10 + $0x90] sm:$0xff] }
 0x5d4   :  { %5356 = vmatprep.subr.bf16.mxu1 %v5355_v59  ;;  %v5453_v34 = vpack.c.bf16 %v2189_v52, %v2185_v46  ;;  %v2271_v52 = vld [vmem:[#allocation10 + $0x340] sm:$0xff] }
 0x5d5   :  { %5382 = vmatpush1.bf16.msra.mxu0 %v5381_v60  ;;  %v2252_v60 = vld [vmem:[#allocation10 + $0x2a8] sm:$0xff] }
 0x5d6   :  { %5384 = vmatprep.subr.bf16.mxu0 %v5383_v62  ;;  %v5401_v62 = vpack.c.bf16 %v2243_v56, %v2239_v57  ;;  %v2225_v56 = vld [vmem:[#allocation10 + $0x1d0] sm:$0xff] }
 0x5d7   :  { %5358 = vmatpush3.bf16.msra.mxu1 %v5355_v59  ;;  %v2248_v59 = vld [vmem:[#allocation10 + $0x288] sm:$0xff] }
 0x5d8   :  { %5360 = vmatprep.subr.bf16.mxu1 %v5359_v35  ;;  %v5403_v36 = vpack.c.bf16 %v2252_v60, %v2248_v59 }
 0x5d9   :  { %5386 = vmatpush1.bf16.msra.mxu0 %v5385_v8  ;;  %v5457_v8 = vpack.c.bf16 %v2197_v49, %v2193_v63  ;;  %v2234_v63 = vld [vmem:[#allocation10 + $0x218] sm:$0xff] }
 0x5da   :  { %5388 = vmatprep.subr.bf16.mxu0 %v5387_v11  ;;  %v5459_v11 = vpack.c.bf16 %v2206_v7, %v2202_v4  ;;  %v2238_v49 = vld [vmem:[#allocation10 + $0x238] sm:$0xff] }
 0x5db   :  { %5362 = vmatpush3.bf16.msra.mxu1 %v5359_v35  ;;  %v2251_v35 = vld [vmem:[#allocation10 + $0x2a0] sm:$0xff]  ;;  %v5475_v10 = vpack.c.bf16 %v2238_v49, %v2234_v63  ;;  %v2257_v63 = vld [vmem:[#allocation10 + $0x2d0] sm:$0xff] }
 0x5dc   :  { %5444 = vmatprep.subr.bf16.mxu1 %v5443_v5  ;;  %v5405_v44 = vpack.c.bf16 %v2251_v35, %v2247_v20  ;;  %v2214_v5 = vld [vmem:[#allocation10 + $0x178] sm:$0xff]  ;;  %v2283_v20 = vld [vmem:[#allocation10 + $0x3a0] sm:$0xff]  ;;  %v2261_v49 = vld [vmem:[#allocation10 + $0x2f0] sm:$0xff] }
 0x5dd   :  { %5390 = vmatpush1.bf16.msra.mxu0 %v5389_v21  ;;  %v2259_v21 = vld [vmem:[#allocation10 + $0x2e0] sm:$0xff]  ;;  %v5463_v25 = vpack.c.bf16 %v2214_v5, %v2210_v1  ;;  %v2246_v1 = vld [vmem:[#allocation10 + $0x278] sm:$0xff] }
 0x5de   :  { %4523 = vmatmul.mubr.msk.f32.vlgmr.msra.gmra.mrb[30].mxu1 %vm1056_vm3, %v7714_v47  ;;  %5392 = vmatprep.subr.bf16.mxu0 %v5391_v24  ;;  %v2268_v24 = vld [vmem:[#allocation10 + $0x328] sm:$0xff]  ;;  %v5409_v28 = vpack.c.bf16 %v2259_v21, %v2255_v42  ;;  %v2287_v21 = vld [vmem:[#allocation10 + $0x3c0] sm:$0xff] }
 0x5df   :  { %5446 = vmatpush1.bf16.msra.mxu1 %v5445_v27  ;;  %3482 = vmatprep.mubr.f32.mxu1 %v7620_v61  ;;  %v5455_v61 = vpack.c.bf16 %v2198_v51, %v2194_v50  ;;  %v2213_v27 = vld [vmem:[#allocation10 + $0x170] sm:$0xff]  ;;  %v5411_v30 = vpack.c.bf16 %v2268_v24, %v2264_v23  ;;  %v2280_v51 = vld [vmem:[#allocation10 + $0x388] sm:$0xff] }
 0x5e0   :  { %5448 = vmatprep.subr.bf16.mxu1 %v5447_v29  ;;  %v2222_v29 = vld [vmem:[#allocation10 + $0x1b8] sm:$0xff]  ;;  %v5465_v33 = vpack.c.bf16 %v2213_v27, %v2209_v26  ;;  %v2296_v26 = vld [vmem:[#allocation10 + $0x408] sm:$0xff] }
 0x5e1   :  { %5394 = vmatpush1.bf16.msra.mxu0 %v5393_v6  ;;  %v2267_v6 = vld [vmem:[#allocation10 + $0x320] sm:$0xff]  ;;  %v5467_v38 = vpack.c.bf16 %v2222_v29, %v2218_v53  ;;  %v2300_v27 = vld [vmem:[#allocation10 + $0x428] sm:$0xff]  ;;  %v2241_v53 = vld [vmem:[#allocation10 + $0x250] sm:$0xff] }
 0x5e2   :  { %5396 = vmatprep.subr.bf16.mxu0 %v5395_v37  ;;  %v2276_v37 = vld [vmem:[#allocation10 + $0x368] sm:$0xff]  ;;  %v5413_v32 = vpack.c.bf16 %v2267_v6, %v2263_v31  ;;  %v2245_v29 = vld [vmem:[#allocation10 + $0x270] sm:$0xff]  ;;  %v2250_v31 = vld [vmem:[#allocation10 + $0x298] sm:$0xff] }
 0x5e3   :  { %5450 = vmatpush1.bf16.msra.mxu1 %v5449_v14  ;;  %v2221_v14 = vld [vmem:[#allocation10 + $0x1b0] sm:$0xff]  ;;  %v5415_v46 = vpack.c.bf16 %v2276_v37, %v2272_v18  ;;  %v2254_v6 = vld [vmem:[#allocation10 + $0x2b8] sm:$0xff]  ;;  %v2295_v18 = vld [vmem:[#allocation10 + $0x400] sm:$0xff] }
 0x5e4   :  { %5452 = vmatprep.subr.bf16.mxu1 %v5451_v45  ;;  %v2230_v45 = vld [vmem:[#allocation10 + $0x1f8] sm:$0xff]  ;;  %v5469_v50 = vpack.c.bf16 %v2221_v14, %v2217_v41  ;;  %v2299_v37 = vld [vmem:[#allocation10 + $0x420] sm:$0xff]  ;;  %v2304_v41 = vld [vmem:[#allocation10 + $0x448] sm:$0xff] }
 0x5e5   :  { %5398 = vmatpush1.bf16.msra.mxu0 %v5397_v48  ;;  %v2275_v48 = vld [vmem:[#allocation10 + $0x360] sm:$0xff]  ;;  %v5471_v57 = vpack.c.bf16 %v2230_v45, %v2226_v40  ;;  %v2308_v14 = vld [vmem:[#allocation10 + $0x468] sm:$0xff]  ;;  %v2249_v40 = vld [vmem:[#allocation10 + $0x290] sm:$0xff] }
 0x5e6   :  { %5400 = vmatprep.subr.bf16.mxu0 %v5399_v55  ;;  %v2284_v55 = vld [vmem:[#allocation10 + $0x3a8] sm:$0xff]  ;;  %v2253_v45 = vld [vmem:[#allocation10 + $0x2b0] sm:$0xff] }
 0x5e7   :  { %5454 = vmatpush1.bf16.msra.mxu1 %v5453_v34  ;;  %v2229_v34 = vld [vmem:[#allocation10 + $0x1f0] sm:$0xff]  ;;  %v5419_v7 = vpack.c.bf16 %v2284_v55, %v2280_v51  ;;  %v2303_v51 = vld [vmem:[#allocation10 + $0x440] sm:$0xff] }
 0x5e8   :  { %5456 = vmatprep.subr.bf16.mxu1 %v5455_v61  ;;  %v5417_v61 = vpack.c.bf16 %v2275_v48, %v2271_v52  ;;  %v5473_v35 = vpack.c.bf16 %v2229_v34, %v2225_v56  ;;  %v2258_v52 = vld [vmem:[#allocation10 + $0x2d8] sm:$0xff]  ;;  %v2307_v55 = vld [vmem:[#allocation10 + $0x460] sm:$0xff]  ;;  %v2312_v56 = vld [vmem:[#allocation10 + $0x488] sm:$0xff] }
 0x5e9   :  { %5402 = vmatpush1.bf16.msra.mxu0 %v5401_v62  ;;  %v2262_v48 = vld [vmem:[#allocation10 + $0x2f8] sm:$0xff]  ;;  %v2316_v34 = vld [vmem:[#allocation10 + $0x4a8] sm:$0xff] }
 0x5ea   :  { %5404 = vmatprep.subr.bf16.mxu0 %v5403_v36  ;;  %v2279_v36 = vld [vmem:[#allocation10 + $0x380] sm:$0xff] }
 0x5eb   :  { %5458 = vmatpush1.bf16.msra.mxu1 %v5457_v8  ;;  %v2288_v8 = vld [vmem:[#allocation10 + $0x3c8] sm:$0xff]  ;;  %v5421_v43 = vpack.c.bf16 %v2283_v20, %v2279_v36  ;;  %v2266_v36 = vld [vmem:[#allocation10 + $0x318] sm:$0xff] }
 0x5ec   :  { %5460 = vmatprep.subr.bf16.mxu1 %v5459_v11  ;;  %v2233_v11 = vld [vmem:[#allocation10 + $0x210] sm:$0xff]  ;;  %v5423_v42 = vpack.c.bf16 %v2292_v9, %v2288_v8  ;;  %v2270_v20 = vld [vmem:[#allocation10 + $0x338] sm:$0xff]  ;;  %v2311_v8 = vld [vmem:[#allocation10 + $0x480] sm:$0xff] }
 0x5ed   :  { %5406 = vmatpush1.bf16.msra.mxu0 %v5405_v44  ;;  %v2242_v44 = vld [vmem:[#allocation10 + $0x258] sm:$0xff]  ;;  %v2315_v9 = vld [vmem:[#allocation10 + $0x4a0] sm:$0xff] }
 0x5ee   :  { %5408 = vmatprep.subr.bf16.mxu0 %v5407_v39 }
 0x5ef   :  { %5462 = vmatpush1.bf16.msra.mxu1 %v5461_v22  ;;  %v2291_v22 = vld [vmem:[#allocation10 + $0x3e0] sm:$0xff] }
 0x5f0   :  { %5464 = vmatprep.subr.bf16.mxu1 %v5463_v25  ;;  %v5477_v25 = vpack.c.bf16 %v2237_v19, %v2233_v11  ;;  %v2320_v11 = vld [vmem:[#allocation10 + $0x4c8] sm:$0xff] }
 0x5f1   :  { %5410 = vmatpush1.bf16.msra.mxu0 %v5409_v28  ;;  %v5479_v28 = vpack.c.bf16 %v2246_v1, %v2242_v44  ;;  %v2324_v19 = vld [vmem:[#allocation10 + $0x4e8] sm:$0xff]  ;;  %v2265_v44 = vld [vmem:[#allocation10 + $0x310] sm:$0xff] }
 0x5f2   :  { %5412 = vmatprep.subr.bf16.mxu0 %v5411_v30  ;;  %v5425_v30 = vpack.c.bf16 %v2291_v22, %v2287_v21  ;;  %v2269_v1 = vld [vmem:[#allocation10 + $0x330] sm:$0xff]  ;;  %v2274_v21 = vld [vmem:[#allocation10 + $0x358] sm:$0xff] }
 0x5f3   :  { %5466 = vmatpush1.bf16.msra.mxu1 %v5465_v33  ;;  %v5427_v33 = vpack.c.bf16 %v2300_v27, %v2296_v26  ;;  %v2278_v22 = vld [vmem:[#allocation10 + $0x378] sm:$0xff]  ;;  %v2319_v26 = vld [vmem:[#allocation10 + $0x4c0] sm:$0xff] }
 0x5f4   :  { %5468 = vmatprep.subr.bf16.mxu1 %v5467_v38  ;;  %v5481_v38 = vpack.c.bf16 %v2245_v29, %v2241_v53  ;;  %v2323_v27 = vld [vmem:[#allocation10 + $0x4e0] sm:$0xff]  ;;  %v5495_v53 = vpack.c.bf16 %v2278_v22, %v2274_v21  ;;  %v2273_v29 = vld [vmem:[#allocation10 + $0x350] sm:$0xff]  ;;  %v2326_v21 = vld [vmem:[#allocation10 + $0x4f8] sm:$0xff] }
 0x5f5   :  { %5414 = vmatpush1.bf16.msra.mxu0 %v5413_v32  ;;  %v7906_v59 = vpop.f32.mrb[14].mxu0  ;;  %v7908_v60 = vpop.f32.mrb[14].mxu1  ;;  %v5483_v32 = vpack.c.bf16 %v2254_v6, %v2250_v31  ;;  %v5441_v31 = vpack.c.bf16 %v2323_v27, %v2319_v26  ;;  %v2282_v6 = vld [vmem:[#allocation10 + $0x398] sm:$0xff] }
 0x5f6   :  { %5416 = vmatprep.subr.bf16.mxu0 %v5415_v46  ;;  %v7910_v62 = vpop.f32.mrb[15].mxu0  ;;  %v7912_v4 = vpop.f32.mrb[15].mxu1  ;;  %v5429_v46 = vpack.c.bf16 %v2299_v37, %v2295_v18 }
 0x5f7   :  { %5470 = vmatpush1.bf16.msra.mxu1 %v5469_v50  ;;  %v5431_v50 = vpack.c.bf16 %v2308_v14, %v2304_v41  ;;  %v2285_v41 = vld [vmem:[#allocation10 + $0x3b0] sm:$0xff]  ;;  %v2290_v14 = vld [vmem:[#allocation10 + $0x3d8] sm:$0xff] }
 0x5f8   :  { %5472 = vmatprep.subr.bf16.mxu1 %v5471_v57  ;;  %v5485_v57 = vpack.c.bf16 %v2253_v45, %v2249_v40 }
 0x5f9   :  { %5418 = vmatpush1.bf16.msra.mxu0 %v5417_v61  ;;  %v5487_v61 = vpack.c.bf16 %v2262_v48, %v2258_v52  ;;  %v2293_v52 = vld [vmem:[#allocation10 + $0x3f0] sm:$0xff]  ;;  %v2298_v48 = vld [vmem:[#allocation10 + $0x418] sm:$0xff] }
 0x5fa   :  { %v7914_v5 = vpop.f32.mrb[16].mxu0  ;;  %v7916_v39 = vpop.f32.mrb[16].mxu1  ;;  %5420 = vmatprep.subr.bf16.mxu0 %v5419_v7  ;;  %v5433_v7 = vpack.c.bf16 %v2307_v55, %v2303_v51 }
 0x5fb   :  { %5474 = vmatpush1.bf16.msra.mxu1 %v5473_v35  ;;  %v7918_v23 = vpop.f32.mrb[17].mxu0  ;;  %v7920_v24 = vpop.f32.mrb[17].mxu1  ;;  %v5435_v35 = vpack.c.bf16 %v2316_v34, %v2312_v56  ;;  %v2301_v56 = vld [vmem:[#allocation10 + $0x430] sm:$0xff]  ;;  %v2306_v34 = vld [vmem:[#allocation10 + $0x458] sm:$0xff] }
 0x5fc   :  { %5476 = vmatprep.subr.bf16.mxu1 %v5475_v10  ;;  %v5489_v10 = vpack.c.bf16 %v2261_v49, %v2257_v63 }
 0x5fd   :  { %5422 = vmatpush1.bf16.msra.mxu0 %v5421_v43  ;;  %v5491_v43 = vpack.c.bf16 %v2270_v20, %v2266_v36  ;;  %v2309_v36 = vld [vmem:[#allocation10 + $0x470] sm:$0xff]  ;;  %v2314_v20 = vld [vmem:[#allocation10 + $0x498] sm:$0xff] }
 0x5fe   :  { %5424 = vmatprep.subr.bf16.mxu0 %v5423_v42  ;;  %v5437_v42 = vpack.c.bf16 %v2315_v9, %v2311_v8 }
 0x5ff   :  { %5478 = vmatpush1.bf16.msra.mxu1 %v5477_v25  ;;  %v5439_v25 = vpack.c.bf16 %v2324_v19, %v2320_v11 }
 0x600   :  { %5480 = vmatprep.subr.bf16.mxu1 %v5479_v28  ;;  %v5493_v28 = vpack.c.bf16 %v2269_v1, %v2265_v44  ;;  %v2313_v44 = vld [vmem:[#allocation10 + $0x490] sm:$0xff] }
 0x601   :  { %5426 = vmatpush1.bf16.msra.mxu0 %v5425_v30  ;;  %v2277_v30 = vld [vmem:[#allocation10 + $0x370] sm:$0xff] }
 0x602   :  { %5428 = vmatprep.subr.bf16.mxu0 %v5427_v33  ;;  %v2286_v33 = vld [vmem:[#allocation10 + $0x3b8] sm:$0xff]  ;;  %v5497_v18 = vpack.c.bf16 %v2277_v30, %v2273_v29  ;;  %v2317_v1 = vld [vmem:[#allocation10 + $0x4b0] sm:$0xff] }
 0x603   :  { %5482 = vmatpush1.bf16.msra.mxu1 %v5481_v38  ;;  %v5499_v37 = vpack.c.bf16 %v2286_v33, %v2282_v6  ;;  %v2281_v38 = vld [vmem:[#allocation10 + $0x390] sm:$0xff]  ;;  %v5517_v27 = vpack.c.bf16 %v2317_v1, %v2313_v44  ;;  %v7963_v33 = vld [vmem:[%s8354_s19] sm:$0x1f] }
 0x604   :  { %3329 = vmatmul.mubr.f32.vlgmr.msra.gmra.mrb[30].mxu0 %v7631_v2  ;;  %5484 = vmatprep.subr.bf16.mxu1 %v5483_v32  ;;  %v2294_v32 = vld [vmem:[#allocation10 + $0x3f8] sm:$0xff]  ;;  %v5501_v40 = vpack.c.bf16 %v2285_v41, %v2281_v38  ;;  %v7975_v41 = vrot.slane %v7963_v33, %v6110_v15 }
 0x605   :  { %3334 = vmatprep.mubr.f32.mxu0 %v7601_v54  ;;  %5430 = vmatpush1.bf16.msra.mxu0 %v5429_v46  ;;  %v5503_v45 = vpack.c.bf16 %v2294_v32, %v2290_v14  ;;  %v2289_v46 = vld [vmem:[#allocation10 + $0x3d0] sm:$0xff]  ;;  %v7979_v14 = vrot.slane %v7963_v33, %v6116_v17 }
 0x606   :  { %5432 = vmatprep.subr.bf16.mxu0 %v5431_v50  ;;  %v2302_v50 = vld [vmem:[#allocation10 + $0x438] sm:$0xff]  ;;  %v5505_v51 = vpack.c.bf16 %v2293_v52, %v2289_v46 }
 0x607   :  { %5486 = vmatpush1.bf16.msra.mxu1 %v5485_v57  ;;  %v5507_v55 = vpack.c.bf16 %v2302_v50, %v2298_v48  ;;  %v2297_v57 = vld [vmem:[#allocation10 + $0x410] sm:$0xff]  ;;  %v2535_v46 = vadd.f32 %v7920_v24, %v7979_v14 }
 0x608   :  { %3335 = vmatmul.mubr.f32.gmra.mrb[32].mxu0 %v7610_v58  ;;  %5488 = vmatprep.subr.bf16.mxu1 %v5487_v61  ;;  %v2310_v61 = vld [vmem:[#allocation10 + $0x478] sm:$0xff]  ;;  %v5509_v63 = vpack.c.bf16 %v2301_v56, %v2297_v57 }
 0x609   :  { %5434 = vmatpush1.bf16.msra.mxu0 %v5433_v7  ;;  %3405 = vmatprep.mubr.f32.mxu0 %v5796_v0  ;;  %v5511_v49 = vpack.c.bf16 %v2310_v61, %v2306_v34  ;;  %v2305_v7 = vld [vmem:[#allocation10 + $0x450] sm:$0xff] }
 0x60a   :  { %5436 = vmatprep.subr.bf16.mxu0 %v5435_v35  ;;  %v2318_v35 = vld [vmem:[#allocation10 + $0x4b8] sm:$0xff]  ;;  %v5513_v19 = vpack.c.bf16 %v2309_v36, %v2305_v7 }
 0x60b   :  { %5490 = vmatpush1.bf16.msra.mxu1 %v5489_v10 }
 0x60c   :  { %5492 = vmatprep.subr.bf16.mxu1 %v5491_v43  ;;  %v5515_v43 = vpack.c.bf16 %v2318_v35, %v2314_v20 }
 0x60d   :  { %5438 = vmatpush1.bf16.msra.mxu0 %v5437_v42  ;;  %v2322_v42 = vld [vmem:[#allocation10 + $0x4d8] sm:$0xff] }
 0x60e   :  { %5440 = vmatprep.subr.bf16.mxu0 %v5439_v25 }
 0x60f   :  { %5494 = vmatpush1.bf16.msra.mxu1 %v5493_v28  ;;  %v2321_v28 = vld [vmem:[#allocation10 + $0x4d0] sm:$0xff] }
 0x610   :  { %5496 = vmatprep.subr.bf16.mxu1 %v5495_v53  ;;  %v2325_v53 = vld [vmem:[#allocation10 + $0x4f0] sm:$0xff] }
 0x611   :  { %5442 = vmatpush1.bf16.msra.mxu0 %v5441_v31  ;;  %v5521_v29 = vpack.c.bf16 %v2325_v53, %v2321_v28 }
 0x613   :  { %5498 = vmatpush1.bf16.msra.mxu1 %v5497_v18 }
 0x614   :  { %4070 = vmatmul.mubr.msk.f32.vlgmr.msra.gmra.mrb[30].mxu0 %vm1056_vm3, %v7742_v3  ;;  %5500 = vmatprep.subr.bf16.mxu1 %v5499_v37 }
 0x615   :  { %3411 = vmatprep.mubr.f32.mxu0 %v5796_v0 }
 0x617   :  { %5502 = vmatpush1.bf16.msra.mxu1 %v5501_v40 }
 0x618   :  { %4071 = vmatmul.mubr.msk.f32.gmra.mrb[32].mxu0 %vm1056_vm3, %v7714_v47  ;;  %5504 = vmatprep.subr.bf16.mxu1 %v5503_v45  ;;  %v2533_v45 = vadd.f32 %v7916_v39, %v7975_v41 }
 0x61b   :  { %5506 = vmatpush1.bf16.msra.mxu1 %v5505_v51 }
 0x61c   :  { %5508 = vmatprep.subr.bf16.mxu1 %v5507_v55 }
 0x61e   :  { %v7931_v8 = vpop.f32.mrb[18].mxu0  ;;  %v7933_v9 = vpop.f32.mrb[18].mxu1  ;;  %3483 = vmatmul.mubr.f32.vlgmr.msra.gmra.mrb[32].mxu1 %v7631_v2 }
 0x61f   :  { %v2605_v10 = vpop.f32.mrb[19].mxu0  ;;  %v7936_v11 = vpop.f32.mrb[19].mxu1  ;;  %3488 = vmatprep.mubr.f32.mxu1 %v7601_v54  ;;  %5510 = vmatpush1.bf16.msra.mxu1 %v5509_v63  ;;  %v5519_v54 = vpack.c.bf16 %v2326_v21, %v2322_v42 }
 0x620   :  { %5512 = vmatprep.subr.bf16.mxu1 %v5511_v49 }
 0x622   :  { %v7939_v22 = vpop.f32.mrb[20].mxu0  ;;  %v7941_v25 = vpop.f32.mrb[20].mxu1  ;;  %3489 = vmatmul.mubr.f32.gmra.mrb[34].mxu1 %v7610_v58 }
 0x623   :  { %v2610_v2 = vpop.f32.mrb[21].mxu0  ;;  %v7944_v26 = vpop.f32.mrb[21].mxu1  ;;  %5514 = vmatpush1.bf16.msra.mxu1 %v5513_v19  ;;  %3559 = vmatprep.mubr.f32.mxu1 %v5796_v0 }
 0x624   :  { %5516 = vmatprep.subr.bf16.mxu1 %v5515_v43 }
 0x627   :  { %5518 = vmatpush1.bf16.msra.mxu1 %v5517_v27 }
 0x628   :  { %5520 = vmatprep.subr.bf16.mxu1 %v5519_v54 }
 0x62b   :  { %5522 = vmatpush1.bf16.msra.mxu1 %v5521_v29 }
 0x62e   :  { %4072 = vmatmul.mubr.msk.f32.vlgmr.msra.gmra.mrb[32].mxu1 %vm1056_vm3, %v7742_v3  ;;  %v2357_v3 = vrot.slane %v7963_v33, %v6104_v13 }
 0x62f   :  { %3565 = vmatprep.mubr.f32.mxu1 %v5796_v0  ;;  %v2361_v0 = vrot.slane %v7963_v33, %v6113_v16 }
 0x630   :  { %v2456_v37 = vadd.f32 %v7914_v5, %v2357_v3 }
 0x631   :  { %v2452_v18 = vadd.f32 %v7910_v62, %v2361_v0  ;;  %v2458_v38 = vadd.f32 %v7918_v23, %v2361_v0  ;;  %v2529_v23 = vadd.f32 %v7912_v4, %v7979_v14 }
 0x632   :  { %4073 = vmatmul.mubr.msk.f32.gmra.mrb[34].mxu1 %vm1056_vm3, %v7714_v47  ;;  %v2450_v47 = vadd.f32 %v7906_v59, %v2357_v3  ;;  %v2527_v59 = vadd.f32 %v7908_v60, %v7975_v41 }
 0x634   :  { %5574 = vtanh.f32 %v2450_v47 }
 0x635   :  { %5576 = vtanh.f32 %v2452_v18 }
 0x636   :  { %5578 = vtanh.f32 %v2456_v37 }
 0x637   :  { %5580 = vtanh.f32 %v2458_v38 }
 0x63e   :  { %v5575_v51 = vpop.eup %5574 }
 0x63f   :  { %v7989_v55 = vpop.eup %5576  ;;  %v3644_v57 = vrot.slane %v5575_v51, 7  ;;  %v3680_v56 = vrot.slane %v5575_v51, 6  ;;  %v3716_v24 = vrot.slane %v5575_v51, 5  ;;  %v3752_v34 = vrot.slane %v5575_v51, 4 }
 0x640   :  { %v7991_v4 = vpop.eup %5578  ;;  %v3788_v61 = vrot.slane %v5575_v51, 3  ;;  %v3824_v63 = vrot.slane %v5575_v51, 2  ;;  %v3646_v49 = vrot.slane %v7989_v55, 7  ;;  %v3682_v7 = vrot.slane %v7989_v55, 6 }
 0x641   :  { %v7993_v39 = vpop.eup %5580  ;;  %v3718_v36 = vrot.slane %v7989_v55, 5  ;;  %v3754_v20 = vrot.slane %v7989_v55, 4  ;;  %v3790_v10 = vrot.slane %v7989_v55, 3  ;;  %v3826_v19 = vrot.slane %v7989_v55, 2 }
 0x642   :  { %v3869_v43 = vrot.slane %v7991_v4, 1  ;;  %v3871_v44 = vrot.slane %v7993_v39, 1 }
 0x647   :  { %v7952_v58 = vpop.f32.mrb[22].mxu0 }
 0x648   :  { %v7954_v30 = vpop.f32.mrb[23].mxu0 }
 0x64b   :  { %v7956_v31 = vpop.f32.mrb[24].mxu0 }
 0x64c   :  { %v7958_v6 = vpop.f32.mrb[25].mxu0 }
 0x681   :  { %v2949_v32 = vpop.f32.mrb[22].mxu1 }
 0x682   :  { %v5523_v62 = vadd.f32 %v2949_v32, %v2357_v3  ;;  %v2951_v5 = vpop.f32.mrb[23].mxu1 }
 0x683   :  { %v5524_v40 = vadd.f32 %v2951_v5, %v2361_v0 }
 0x684   :  { %5582 = vtanh.f32 %v5523_v62 }
 0x685   :  { %5584 = vtanh.f32 %v5524_v40  ;;  %v2955_v52 = vpop.f32.mrb[24].mxu1 }
 0x686   :  { %5586 = vtanh.f32 %v2527_v59  ;;  %v5525_v48 = vadd.f32 %v2955_v52, %v2357_v3  ;;  %v2957_v50 = vpop.f32.mrb[25].mxu1 }
 0x687   :  { %5588 = vtanh.f32 %v2529_v23  ;;  %v5526_v60 = vadd.f32 %v2957_v50, %v2361_v0 }
 0x688   :  { %5590 = vtanh.f32 %v2533_v45 }
 0x689   :  { %5592 = vtanh.f32 %v2535_v46 }
 0x68a   :  { %5594 = vtanh.f32 %v5525_v48 }
 0x68b   :  { %5596 = vtanh.f32 %v5526_v60 }
 0x68e   :  { %v5583_v35 = vpop.eup %5582 }
 0x68f   :  { %v5585_v1 = vpop.eup %5584  ;;  %v3617_v42 = vrot.slane %v5583_v35, 7  ;;  %v3662_v21 = vrot.slane %v5583_v35, 6  ;;  %v3698_v2 = vrot.slane %v5583_v35, 5  ;;  %v3734_v27 = vrot.slane %v5583_v35, 4 }
 0x690   :  { %v8003_v54 = vpop.eup %5586  ;;  %v3770_v28 = vrot.slane %v5583_v35, 3  ;;  %v3806_v53 = vrot.slane %v5583_v35, 2  ;;  %v3842_v29 = vrot.slane %v5583_v35, 1  ;;  %v3619_v3 = vrot.slane %v5585_v1, 7 }
 0x691   :  { %v8005_v0 = vpop.eup %5588  ;;  %v3887_v47 = vsel %vm399_vm0, %v5575_v51, %v3617_v42  ;;  %v3664_v18 = vrot.slane %v5585_v1, 6  ;;  %v3700_v37 = vrot.slane %v5585_v1, 5  ;;  %v3736_v38 = vrot.slane %v5585_v1, 4 }
 0x692   :  { %v8008_v32 = vpop.eup %5590  ;;  %v3896_v59 = vsel %vm402_vm1, %v3887_v47, %v3644_v57  ;;  %v3950_v62 = vsel %vm402_vm1, %v3752_v34, %v3770_v28  ;;  %v3772_v5 = vrot.slane %v5585_v1, 3  ;;  %v3808_v23 = vrot.slane %v5585_v1, 2 }
 0x693   :  { %v8012_v40 = vpop.eup %5592  ;;  %v3905_v45 = vsel %vm405_vm2, %v3896_v59, %v3662_v21  ;;  %v3959_v46 = vsel %vm405_vm2, %v3950_v62, %v3788_v61  ;;  %v3844_v52 = vrot.slane %v5585_v1, 1  ;;  %v3889_v48 = vsel %vm399_vm0, %v7989_v55, %v3619_v3 }
 0x694   :  { %v5595_v50 = vpop.eup %5594  ;;  %v3914_v60 = vsel %vm1092_vm4, %v3905_v45, %v3680_v56  ;;  %v3968_v51 = vsel %vm1092_vm4, %v3959_v46, %v3806_v53  ;;  %v3898_v57 = vsel %vm402_vm1, %v3889_v48, %v3646_v49  ;;  %v3952_v34 = vsel %vm402_vm1, %v3754_v20, %v3772_v5 }
 0x695   :  { %v5597_v35 = vpop.eup %5596  ;;  %v3923_v42 = vsel %vm1095_vm5, %v3914_v60, %v3698_v2  ;;  %v3977_v21 = vsel %vm1095_vm5, %v3968_v51, %v3824_v63  ;;  %v3907_v61 = vsel %vm405_vm2, %v3898_v57, %v3664_v18  ;;  %v3961_v1 = vsel %vm405_vm2, %v3952_v34, %v3790_v10 }
 0x696   :  { %v3932_v55 = vsel %vm1779_vm7, %v3923_v42, %v3716_v24  ;;  %v3986_v28 = vsel %vm1779_vm7, %v3977_v21, %v3842_v29  ;;  %v3916_v56 = vsel %vm1092_vm4, %v3907_v61, %v3682_v7  ;;  %v3970_v53 = vsel %vm1092_vm4, %v3961_v1, %v3808_v23 }
 0x697   :  { %v3941_v49 = vsel %vm1782_vm8, %v3932_v55, %v3734_v27  ;;  %v3995_v20 = vsel %vm1782_vm8, %v3986_v28, %v3869_v43  ;;  %v3925_v2 = vsel %vm1095_vm5, %v3916_v56, %v3700_v37  ;;  %v3979_v63 = vsel %vm1095_vm5, %v3970_v53, %v3826_v19  ;;  %v3103_v3 = vpop.f32.mrb[26].mxu0 }
 0x698   :  { %4013 = vst [vmem:[%s8380_s30] sm:$0xff] %v3941_v49  ;;  %4022 = vst [vmem:[%s8380_s30 + $0x48] sm:$0xff] %v3995_v20  ;;  %v3934_v24 = vsel %vm1779_vm7, %v3925_v2, %v3718_v36  ;;  %v3988_v7 = vsel %vm1779_vm7, %v3979_v63, %v3844_v52  ;;  %v4004_v10 = vsel %vm399_vm0, %v5595_v50, %v7991_v4  ;;  %v3105_v19 = vpop.f32.mrb[27].mxu0  ;;  %v2372_v47 = vsub.s32 4, %v6101_v12 }
 0x699   :  { %v4006_v43 = vsel %vm399_vm0, %v5597_v35, %v7993_v39  ;;  %v3943_v27 = vsel %vm1782_vm8, %v3934_v24, %v3736_v38  ;;  %v3997_v29 = vsel %vm1782_vm8, %v3988_v7, %v3871_v44  ;;  %4031 = vst [vmem:[%s8380_s30 + $0x90] sm:$0x3] %v4004_v10  ;;  %v5527_v36 = vadd.f32 %v3103_v3, %v7975_v41 }
 0x69a   :  { %4033 = vst [vmem:[%s8380_s30 + $0xa0] sm:$0x3] %v4006_v43  ;;  %v5528_v4 = vadd.f32 %v3105_v19, %v7979_v14  ;;  %4015 = vst [vmem:[%s8380_s30 + $0x10] sm:$0xff] %v3943_v27  ;;  %v3648_v38 = vrot.slane %v8003_v54, 7  ;;  %v8067_v59 = vrot.slane %v7963_v33, %v2372_v47  ;;  %v3684_v5 = vrot.slane %v8003_v54, 6 }
 0x69b   :  { %4024 = vst [vmem:[%s8380_s30 + $0x58] sm:$0xff] %v3997_v29  ;;  %5598 = vtanh.f32 %v5527_v36  ;;  %v3109_v39 = vpop.f32.mrb[28].mxu0  ;;  %v3720_v23 = vrot.slane %v8003_v54, 5  ;;  %v3756_v45 = vrot.slane %v8003_v54, 4  ;;  %v3792_v12 = vrot.slane %v8003_v54, 3 }
 0x69c   :  { %5600 = vtanh.f32 %v5528_v4  ;;  %v3111_v44 = vpop.f32.mrb[29].mxu0  ;;  %v5529_v18 = vadd.f32 %v3109_v39, %v7975_v41  ;;  %v3828_v41 = vrot.slane %v8003_v54, 2  ;;  %v3686_v33 = vrot.slane %v8005_v0, 6 }
 0x69d   :  { %v5530_v37 = vadd.f32 %v3111_v44, %v7979_v14  ;;  %v3650_v14 = vrot.slane %v8005_v0, 7  ;;  %v3722_v48 = vrot.slane %v8005_v0, 5  ;;  %v3758_v50 = vrot.slane %v8005_v0, 4 }
 0x69e   :  { %5602 = vtanh.f32 %v5529_v18  ;;  %v3794_v60 = vrot.slane %v8005_v0, 3  ;;  %v3830_v57 = vrot.slane %v8005_v0, 2  ;;  %v3873_v34 = vrot.slane %v8008_v32, 1 }
 0x69f   :  { %5604 = vtanh.f32 %v5530_v37  ;;  %v3875_v35 = vrot.slane %v8012_v40, 1  ;;  %v2604_v42 = vadd.f32 %v7931_v8, %v8067_v59 }
 0x6a1   :  { %v4420_v62 = vpop.f32.mrb[26].mxu1  ;;  %5606 = vtanh.f32 %v2604_v42 }
 0x6a2   :  { %v4421_v46 = vpop.f32.mrb[27].mxu1 }
 0x6a3   :  { %v8075_v52 = vadd.f32 %v4421_v46, %v4420_v62 }
 0x6a5   :  { %v5599_v51 = vpop.eup %5598  ;;  %v4423_v21 = vpop.f32.mrb[28].mxu1 }
 0x6a6   :  { %v5601_v61 = vpop.eup %5600  ;;  %v3621_v1 = vrot.slane %v5599_v51, 7  ;;  %v3666_v55 = vrot.slane %v5599_v51, 6  ;;  %v3702_v28 = vrot.slane %v5599_v51, 5  ;;  %v3738_v56 = vrot.slane %v5599_v51, 4  ;;  %v4424_v53 = vpop.f32.mrb[29].mxu1 }
 0x6a7   :  { %v3774_v49 = vrot.slane %v5599_v51, 3  ;;  %v3810_v20 = vrot.slane %v5599_v51, 2  ;;  %v3846_v2 = vrot.slane %v5599_v51, 1  ;;  %v3623_v63 = vrot.slane %v5601_v61, 7 }
 0x6a8   :  { %v3891_v3 = vsel %vm399_vm0, %v8003_v54, %v3621_v1  ;;  %v3668_v24 = vrot.slane %v5601_v61, 6  ;;  %v3704_v7 = vrot.slane %v5601_v61, 5  ;;  %v3740_v10 = vrot.slane %v5601_v61, 4  ;;  %v5603_v44 = vpop.eup %5602 }
 0x6a9   :  { %v3900_v43 = vsel %vm402_vm1, %v3891_v3, %v3648_v38  ;;  %v3954_v8 = vsel %vm402_vm1, %v3756_v45, %v3774_v49  ;;  %v3776_v19 = vrot.slane %v5601_v61, 3  ;;  %v3812_v27 = vrot.slane %v5601_v61, 2  ;;  %v5605_v38 = vpop.eup %5604 }
 0x6aa   :  { %v3909_v29 = vsel %vm405_vm2, %v3900_v43, %v3666_v55  ;;  %v3963_v36 = vsel %vm405_vm2, %v3954_v8, %v3792_v12  ;;  %v3848_v4 = vrot.slane %v5601_v61, 1  ;;  %v3893_v39 = vsel %vm399_vm0, %v8005_v0, %v3623_v63 }
 0x6ab   :  { %v3918_v54 = vsel %vm1092_vm4, %v3909_v29, %v3684_v5  ;;  %v3972_v47 = vsel %vm1092_vm4, %v3963_v36, %v3810_v20  ;;  %v3902_v18 = vsel %vm402_vm1, %v3893_v39, %v3650_v14  ;;  %v3956_v37 = vsel %vm402_vm1, %v3758_v50, %v3776_v19 }
 0x6ac   :  { %v3927_v62 = vsel %vm1095_vm5, %v3918_v54, %v3702_v28  ;;  %v3981_v45 = vsel %vm1095_vm5, %v3972_v47, %v3828_v41  ;;  %v3911_v46 = vsel %vm405_vm2, %v3902_v18, %v3668_v24  ;;  %v3965_v12 = vsel %vm405_vm2, %v3956_v37, %v3794_v60 }
 0x6ad   :  { %v3936_v0 = vsel %vm1779_vm7, %v3927_v62, %v3720_v23  ;;  %v3990_v51 = vsel %vm1779_vm7, %v3981_v45, %v3846_v2  ;;  %v3920_v5 = vsel %vm1092_vm4, %v3911_v46, %v3686_v33  ;;  %v3974_v61 = vsel %vm1092_vm4, %v3965_v12, %v3812_v27 }
 0x6ae   :  { %v3945_v14 = vsel %vm1782_vm8, %v3936_v0, %v3738_v56  ;;  %v3999_v50 = vsel %vm1782_vm8, %v3990_v51, %v3873_v34  ;;  %v3929_v1 = vsel %vm1095_vm5, %v3920_v5, %v3704_v7  ;;  %v3983_v41 = vsel %vm1095_vm5, %v3974_v61, %v3830_v57  ;;  %v2328_v5 = vld [vmem:[%s8381_s1] sm:$0xf] }
 0x6af   :  { %4017 = vst [vmem:[%s8380_s30 + $0x20] sm:$0xff] %v3945_v14  ;;  %4026 = vst [vmem:[%s8380_s30 + $0x68] sm:$0xff] %v3999_v50  ;;  %v3938_v23 = vsel %vm1779_vm7, %v3929_v1, %v3722_v48  ;;  %v3992_v33 = vsel %vm1779_vm7, %v3983_v41, %v3848_v4  ;;  %v4008_v60 = vsel %vm399_vm0, %v5603_v44, %v8008_v32 }
 0x6b0   :  { %v4010_v34 = vsel %vm399_vm0, %v5605_v38, %v8012_v40  ;;  %v2609_v57 = vadd.f32 %v7939_v22, %v8067_v59  ;;  %v3947_v55 = vsel %vm1782_vm8, %v3938_v23, %v3740_v10  ;;  %v4001_v28 = vsel %vm1782_vm8, %v3992_v33, %v3875_v35  ;;  %4035 = vst [vmem:[%s8380_s30 + $0xb0] sm:$0x3] %v4008_v60 }
 0x6b1   :  { %4037 = vst [vmem:[%s8380_s30 + $0xc0] sm:$0x3] %v4010_v34  ;;  %v4425_v48 = vadd.f32 %v4424_v53, %v4423_v21  ;;  %4019 = vst [vmem:[%s8380_s30 + $0x30] sm:$0xff] %v3947_v55  ;;  %v4524_v22 = vpop.f32.mrb[30].mxu1  ;;  %v3181_v32 = vadd.f32 %v8075_v52, %v8067_v59  ;;  %v5607_v21 = vpop.eup %5606  ;;  %v2616_v61 = vrot.slane %v2328_v5, %v6104_v13 }
 0x6b2   :  { %4028 = vst [vmem:[%s8380_s30 + $0x78] sm:$0xff] %v4001_v28  ;;  %v3255_v35 = vpop.f32.mrb[31].mxu1  ;;  %5608 = vtanh.f32 %v2609_v57  ;;  %v3652_v3 = vrot.slane %v5607_v21, 7  ;;  %v3760_v24 = vrot.slane %v5607_v21, 4  ;;  %v3796_v52 = vrot.slane %v5607_v21, 3 }
 0x6b3   :  { %v3186_v40 = vadd.f32 %v4425_v48, %v8067_v59  ;;  %v3256_v56 = vadd.f32 %v3255_v35, %v3181_v32  ;;  %v3688_v43 = vrot.slane %v5607_v21, 6  ;;  %v3832_v29 = vrot.slane %v5607_v21, 2 }
 0x6b4   :  { %v3724_v44 = vrot.slane %v5607_v21, 5  ;;  %v2620_v14 = vrot.slane %v2328_v5, %v6113_v16  ;;  %v2700_v50 = vadd.f32 %v7933_v9, %v2616_v61  ;;  %v2706_v41 = vadd.f32 %v7941_v25, %v2616_v61 }
 0x6b5   :  { %v3261_v49 = vadd.f32 %v4524_v22, %v3186_v40  ;;  %5610 = vtanh.f32 %v3256_v56  ;;  %v8176_v9 = vrot.slane %v2328_v5, %v6110_v15  ;;  %v8184_v22 = vrot.slane %v2328_v5, %v6116_v17 }
 0x6b6   :  { %v2702_v1 = vadd.f32 %v7936_v11, %v2620_v14  ;;  %v2708_v23 = vadd.f32 %v7944_v26, %v2620_v14 }
 0x6b7   :  { %5612 = vtanh.f32 %v3261_v49  ;;  %v2777_v15 = vadd.f32 %v7952_v58, %v8176_v9 }
 0x6b8   :  { %5614 = vtanh.f32 %v2700_v50 }
 0x6b9   :  { %5616 = vtanh.f32 %v2702_v1 }
 0x6ba   :  { %5618 = vtanh.f32 %v2706_v41 }
 0x6bb   :  { %5620 = vtanh.f32 %v2708_v23 }
 0x6bc   :  { %v5609_v53 = vpop.eup %5608 }
 0x6bd   :  { %v3877_v37 = vrot.slane %v5609_v53, 1 }
 0x6bf   :  { %v5611_v20 = vpop.eup %5610 }
 0x6c0   :  { %v3625_v63 = vrot.slane %v5611_v20, 7  ;;  %v3778_v10 = vrot.slane %v5611_v20, 3  ;;  %v3670_v59 = vrot.slane %v5611_v20, 6  ;;  %v3814_v8 = vrot.slane %v5611_v20, 2 }
 0x6c1   :  { %v5613_v2 = vpop.eup %5612  ;;  %v3706_v36 = vrot.slane %v5611_v20, 5  ;;  %v3850_v54 = vrot.slane %v5611_v20, 1  ;;  %v3742_v38 = vrot.slane %v5611_v20, 4 }
 0x6c2   :  { %v4012_v7 = vsel %vm399_vm0, %v5613_v2, %v5609_v53  ;;  %v3895_v42 = vsel %vm399_vm0, %v5607_v21, %v3625_v63  ;;  %v3958_v27 = vsel %vm402_vm1, %v3760_v24, %v3778_v10  ;;  %v8173_v16 = vpop.eup %5614  ;;  %v2779_v10 = vadd.f32 %v7954_v30, %v8184_v22 }
 0x6c3   :  { %4039 = vst [vmem:[%s8380_s30 + $0xd0] sm:$0x3] %v4012_v7  ;;  %v3904_v19 = vsel %vm402_vm1, %v3895_v42, %v3652_v3  ;;  %v3967_v39 = vsel %vm405_vm2, %v3958_v27, %v3796_v52  ;;  %v8178_v28 = vpop.eup %5616  ;;  %v3645_v48 = vrot.slane %v8173_v16, 7  ;;  %v3681_v40 = vrot.slane %v8173_v16, 6 }
 0x6c4   :  { %v3913_v4 = vsel %vm405_vm2, %v3904_v19, %v3670_v59  ;;  %v3976_v18 = vsel %vm1092_vm4, %v3967_v39, %v3814_v8  ;;  %v8180_v26 = vpop.eup %5618  ;;  %v3717_v35 = vrot.slane %v8173_v16, 5  ;;  %v3753_v56 = vrot.slane %v8173_v16, 4 }
 0x6c5   :  { %v3922_v47 = vsel %vm1092_vm4, %v3913_v4, %v3688_v43  ;;  %v3985_v45 = vsel %vm1095_vm5, %v3976_v18, %v3832_v29  ;;  %v8186_v32 = vpop.eup %5620  ;;  %v3789_v49 = vrot.slane %v8173_v16, 3  ;;  %v3825_v21 = vrot.slane %v8173_v16, 2 }
 0x6c6   :  { %v3931_v62 = vsel %vm1095_vm5, %v3922_v47, %v3706_v36  ;;  %v3994_v12 = vsel %vm1779_vm7, %v3985_v45, %v3850_v54  ;;  %v3647_v17 = vrot.slane %v8178_v28, 7  ;;  %v3683_v53 = vrot.slane %v8178_v28, 6 }
 0x6c7   :  { %v3940_v46 = vsel %vm1779_vm7, %v3931_v62, %v3724_v44  ;;  %v4003_v51 = vsel %vm1782_vm8, %v3994_v12, %v3877_v37  ;;  %v3719_v20 = vrot.slane %v8178_v28, 5  ;;  %v3755_v2 = vrot.slane %v8178_v28, 4 }
 0x6c8   :  { %v3949_v0 = vsel %vm1782_vm8, %v3940_v46, %v3742_v38  ;;  %4030 = vst [vmem:[%s8380_s30 + $0x88] sm:$0xff] %v4003_v51  ;;  %v3791_v63 = vrot.slane %v8178_v28, 3  ;;  %v3827_v58 = vrot.slane %v8178_v28, 2  ;;  %v3870_v3 = vrot.slane %v8180_v26, 1 }
 0x6c9   :  { %4021 = vst [vmem:[%s8380_s30 + $0x40] sm:$0xff] %v3949_v0  ;;  %v3872_v24 = vrot.slane %v8186_v32, 1  ;;  %v2783_v52 = vadd.f32 %v7956_v31, %v8176_v9  ;;  %v2785_v59 = vadd.f32 %v7958_v6, %v8184_v22 }
 0x6e7   :  { %v3407_v33 = vpop.f32.mrb[30].mxu0 }
 0x6e8   :  { %v5531_v60 = vadd.f32 %v3407_v33, %v2616_v61  ;;  %v3409_v34 = vpop.f32.mrb[31].mxu0 }
 0x6e9   :  { %v5532_v57 = vadd.f32 %v3409_v34, %v2620_v14 }
 0x6ea   :  { %5622 = vtanh.f32 %v5531_v60 }
 0x6eb   :  { %5624 = vtanh.f32 %v5532_v57  ;;  %v3413_v13 = vpop.f32.mrb[32].mxu0 }
 0x6ec   :  { %v5533_v11 = vadd.f32 %v3413_v13, %v2616_v61  ;;  %v3415_v25 = vpop.f32.mrb[33].mxu0 }
 0x6ed   :  { %v5534_v55 = vadd.f32 %v3415_v25, %v2620_v14 }
 0x6ee   :  { %5626 = vtanh.f32 %v5533_v11 }
 0x6ef   :  { %5628 = vtanh.f32 %v5534_v55 }
 0x6f0   :  { %5630 = vtanh.f32 %v2777_v15 }
 0x6f1   :  { %5632 = vtanh.f32 %v2779_v10 }
 0x6f2   :  { %5634 = vtanh.f32 %v2783_v52 }
 0x6f3   :  { %5636 = vtanh.f32 %v2785_v59 }
 0x6f4   :  { %v5623_v7 = vpop.eup %5622 }
 0x6f5   :  { %v5625_v42 = vpop.eup %5624  ;;  %v3618_v43 = vrot.slane %v5623_v7, 7  ;;  %v3663_v8 = vrot.slane %v5623_v7, 6  ;;  %v3699_v19 = vrot.slane %v5623_v7, 5  ;;  %v3735_v27 = vrot.slane %v5623_v7, 4 }
 0x6f6   :  { %v3771_v29 = vrot.slane %v5623_v7, 3  ;;  %v3807_v36 = vrot.slane %v5623_v7, 2  ;;  %v3843_v4 = vrot.slane %v5623_v7, 1  ;;  %v3620_v39 = vrot.slane %v5625_v42, 7 }
 0x6f7   :  { %v3888_v44 = vsel %vm399_vm0, %v8173_v16, %v3618_v43  ;;  %v3665_v54 = vrot.slane %v5625_v42, 6  ;;  %v3701_v30 = vrot.slane %v5625_v42, 5  ;;  %v3737_v47 = vrot.slane %v5625_v42, 4 }
 0x6f8   :  { %v3897_v31 = vsel %vm402_vm1, %v3888_v44, %v3645_v48  ;;  %v3951_v18 = vsel %vm402_vm1, %v3753_v56, %v3771_v29  ;;  %v3773_v6 = vrot.slane %v5625_v42, 3  ;;  %v3809_v37 = vrot.slane %v5625_v42, 2  ;;  %v5627_v12 = vpop.eup %5626 }
 0x6f9   :  { %v3906_v38 = vsel %vm405_vm2, %v3897_v31, %v3663_v8  ;;  %v3960_v62 = vsel %vm405_vm2, %v3951_v18, %v3789_v49  ;;  %v3845_v45 = vrot.slane %v5625_v42, 1  ;;  %v3890_v46 = vsel %vm399_vm0, %v8178_v28, %v3620_v39  ;;  %v5629_v14 = vpop.eup %5628 }
 0x6fa   :  { %v3915_v0 = vsel %vm1092_vm4, %v3906_v38, %v3681_v40  ;;  %v3969_v51 = vsel %vm1092_vm4, %v3960_v62, %v3807_v36  ;;  %v3899_v5 = vsel %vm402_vm1, %v3890_v46, %v3647_v17  ;;  %v3953_v61 = vsel %vm402_vm1, %v3755_v2, %v3773_v6  ;;  %v8233_v55 = vpop.eup %5630 }
 0x6fb   :  { %v3924_v50 = vsel %vm1095_vm5, %v3915_v0, %v3699_v19  ;;  %v3978_v1 = vsel %vm1095_vm5, %v3969_v51, %v3825_v21  ;;  %v3908_v41 = vsel %vm405_vm2, %v3899_v5, %v3665_v54  ;;  %v3962_v23 = vsel %vm405_vm2, %v3953_v61, %v3791_v63  ;;  %v8265_v63 = vpop.eup %5632 }
 0x6fc   :  { %v3933_v33 = vsel %vm1779_vm7, %v3924_v50, %v3717_v35  ;;  %v3987_v60 = vsel %vm1779_vm7, %v3978_v1, %v3843_v4  ;;  %v3917_v34 = vsel %vm1092_vm4, %v3908_v41, %v3683_v53  ;;  %v3971_v57 = vsel %vm1092_vm4, %v3962_v23, %v3809_v37 }
 0x6fd   :  { %v3942_v13 = vsel %vm1782_vm8, %v3933_v33, %v3735_v27  ;;  %v3996_v16 = vsel %vm1782_vm8, %v3987_v60, %v3870_v3  ;;  %v3926_v11 = vsel %vm1095_vm5, %v3917_v34, %v3701_v30  ;;  %v3980_v25 = vsel %vm1095_vm5, %v3971_v57, %v3827_v58  ;;  %v8267_v58 = vpop.eup %5634 }
 0x6fe   :  { %4014 = vst [vmem:[%s8380_s30 + $0x8] sm:$0xff] %v3942_v13  ;;  %4023 = vst [vmem:[%s8380_s30 + $0x50] sm:$0xff] %v3996_v16  ;;  %v3935_v28 = vsel %vm1779_vm7, %v3926_v11, %v3719_v20  ;;  %v3989_v48 = vsel %vm1779_vm7, %v3980_v25, %v3845_v45  ;;  %v4005_v40 = vsel %vm399_vm0, %v5627_v12, %v8180_v26  ;;  %v8269_v3 = vpop.eup %5636  ;;  %v3685_v7 = vrot.slane %v8233_v55, 6 }
 0x6ff   :  { %v4007_v35 = vsel %vm399_vm0, %v5629_v14, %v8186_v32  ;;  %v3944_v15 = vsel %vm1782_vm8, %v3935_v28, %v3737_v47  ;;  %v3998_v56 = vsel %vm1782_vm8, %v3989_v48, %v3872_v24  ;;  %4032 = vst [vmem:[%s8380_s30 + $0x98] sm:$0x3] %v4005_v40  ;;  %v3649_v24 = vrot.slane %v8233_v55, 7 }
 0x700   :  { %4034 = vst [vmem:[%s8380_s30 + $0xa8] sm:$0x3] %v4007_v35  ;;  %4016 = vst [vmem:[%s8380_s30 + $0x18] sm:$0xff] %v3944_v15  ;;  %v3721_v10 = vrot.slane %v8233_v55, 5  ;;  %v3757_v52 = vrot.slane %v8233_v55, 4  ;;  %v3651_v59 = vrot.slane %v8265_v63, 7 }
 0x701   :  { %4025 = vst [vmem:[%s8380_s30 + $0x60] sm:$0xff] %v3998_v56  ;;  %v3561_v26 = vpop.f32.mrb[32].mxu1  ;;  %v3687_v42 = vrot.slane %v8265_v63, 6  ;;  %v3723_v43 = vrot.slane %v8265_v63, 5  ;;  %v3759_v8 = vrot.slane %v8265_v63, 4  ;;  %v3795_v27 = vrot.slane %v8265_v63, 3 }
 0x702   :  { %v5535_v32 = vadd.f32 %v3561_v26, %v8176_v9  ;;  %v3563_v49 = vpop.f32.mrb[33].mxu1  ;;  %v3831_v29 = vrot.slane %v8265_v63, 2  ;;  %v3874_v36 = vrot.slane %v8267_v58, 1  ;;  %v3876_v4 = vrot.slane %v8269_v3, 1 }
 0x703   :  { %v5536_v21 = vadd.f32 %v3563_v49, %v8184_v22 }
 0x704   :  { %5638 = vtanh.f32 %v5535_v32 }
 0x705   :  { %5640 = vtanh.f32 %v5536_v21  ;;  %v3567_v17 = vpop.f32.mrb[34].mxu1 }
 0x706   :  { %v5537_v53 = vadd.f32 %v3567_v17, %v8176_v9  ;;  %v3569_v20 = vpop.f32.mrb[35].mxu1  ;;  %v3793_v9 = vrot.slane %v8233_v55, 3 }
 0x707   :  { %v5538_v2 = vadd.f32 %v3569_v20, %v8184_v22  ;;  %v3829_v22 = vrot.slane %v8233_v55, 2 }
 0x708   :  { %5642 = vtanh.f32 %v5537_v53 }
 0x709   :  { %5644 = vtanh.f32 %v5538_v2 }
 0x70e   :  { %v5639_v19 = vpop.eup %5638 }
 0x70f   :  { %v5641_v39 = vpop.eup %5640  ;;  %v3622_v44 = vrot.slane %v5639_v19, 7  ;;  %v3667_v54 = vrot.slane %v5639_v19, 6  ;;  %v3703_v30 = vrot.slane %v5639_v19, 5  ;;  %v3739_v47 = vrot.slane %v5639_v19, 4 }
 0x710   :  { %v3775_v31 = vrot.slane %v5639_v19, 3  ;;  %v3811_v18 = vrot.slane %v5639_v19, 2  ;;  %v3847_v6 = vrot.slane %v5639_v19, 1  ;;  %v3624_v37 = vrot.slane %v5641_v39, 7 }
 0x711   :  { %v3892_v38 = vsel %vm399_vm0, %v8233_v55, %v3622_v44  ;;  %v3669_v62 = vrot.slane %v5641_v39, 6  ;;  %v3705_v45 = vrot.slane %v5641_v39, 5  ;;  %v3741_v46 = vrot.slane %v5641_v39, 4 }
 0x712   :  { %v3901_v12 = vsel %vm402_vm1, %v3892_v38, %v3649_v24  ;;  %v3955_v0 = vsel %vm402_vm1, %v3757_v52, %v3775_v31  ;;  %v3777_v51 = vrot.slane %v5641_v39, 3  ;;  %v3813_v5 = vrot.slane %v5641_v39, 2  ;;  %v5643_v41 = vpop.eup %5642 }
 0x713   :  { %v3910_v61 = vsel %vm405_vm2, %v3901_v12, %v3667_v54  ;;  %v3964_v14 = vsel %vm405_vm2, %v3955_v0, %v3793_v9  ;;  %v3849_v50 = vrot.slane %v5641_v39, 1  ;;  %v3894_v1 = vsel %vm399_vm0, %v8265_v63, %v3624_v37  ;;  %v5645_v57 = vpop.eup %5644 }
 0x714   :  { %v3919_v23 = vsel %vm1092_vm4, %v3910_v61, %v3685_v7  ;;  %v3973_v33 = vsel %vm1092_vm4, %v3964_v14, %v3811_v18  ;;  %v3903_v60 = vsel %vm402_vm1, %v3894_v1, %v3651_v59  ;;  %v3957_v34 = vsel %vm402_vm1, %v3759_v8, %v3777_v51 }
 0x715   :  { %v3928_v13 = vsel %vm1095_vm5, %v3919_v23, %v3703_v30  ;;  %v3982_v16 = vsel %vm1095_vm5, %v3973_v33, %v3829_v22  ;;  %v3912_v11 = vsel %vm405_vm2, %v3903_v60, %v3669_v62  ;;  %v3966_v25 = vsel %vm405_vm2, %v3957_v34, %v3795_v27 }
 0x716   :  { %v3937_v55 = vsel %vm1779_vm7, %v3928_v13, %v3721_v10  ;;  %v3991_v28 = vsel %vm1779_vm7, %v3982_v16, %v3847_v6  ;;  %v3921_v48 = vsel %vm1092_vm4, %v3912_v11, %v3687_v42  ;;  %v3975_v40 = vsel %vm1092_vm4, %v3966_v25, %v3813_v5 }
 0x717   :  { %v3946_v35 = vsel %vm1782_vm8, %v3937_v55, %v3739_v47  ;;  %v4000_v15 = vsel %vm1782_vm8, %v3991_v28, %v3874_v36  ;;  %v3930_v56 = vsel %vm1095_vm5, %v3921_v48, %v3705_v45  ;;  %v3984_v26 = vsel %vm1095_vm5, %v3975_v40, %v3831_v29 }
 0x718   :  { %4018 = vst [vmem:[%s8380_s30 + $0x28] sm:$0xff] %v3946_v35  ;;  %4027 = vst [vmem:[%s8380_s30 + $0x70] sm:$0xff] %v4000_v15  ;;  %v3939_v32 = vsel %vm1779_vm7, %v3930_v56, %v3723_v43  ;;  %v3993_v49 = vsel %vm1779_vm7, %v3984_v26, %v3849_v50  ;;  %v4009_v21 = vsel %vm399_vm0, %v5643_v41, %v8267_v58 }
 0x719   :  { %v4011_v17 = vsel %vm399_vm0, %v5645_v57, %v8269_v3  ;;  %v3948_v53 = vsel %vm1782_vm8, %v3939_v32, %v3741_v46  ;;  %v4002_v20 = vsel %vm1782_vm8, %v3993_v49, %v3876_v4  ;;  %4036 = vst [vmem:[%s8380_s30 + $0xb8] sm:$0x3] %v4009_v21 }
 0x71a   :  { %4038 = vst [vmem:[%s8380_s30 + $0xc8] sm:$0x3] %v4011_v17  ;;  %4020 = vst [vmem:[%s8380_s30 + $0x38] sm:$0xff] %v3948_v53 }
 0x71b   :  { %4029 = vst [vmem:[%s8380_s30 + $0x80] sm:$0xff] %v4002_v20 }
 0x71c   :  { %4044 = vsyncpa [#allocation3], 1 }
 0x71d   :  { %4045 = vsyncpa [#allocation5], 1 }
 0x71e   :  { %4046 = vsyncpa [#allocation8], 1 }
 0x71f   :  { %4047 = vsyncpa [#allocation11], 1 }

</bundles_post_ra>
